<compile_context>
chip_gen: v5e
topology: v5e:2x2
jax: 0.10.0
libtpu: 0.0.40
codegen_flags: <defaults>
</compile_context>

<pallas_src>
import math
from functools import partial

import jax
import jax.numpy as jnp
from jax.experimental import pallas as pl
from jax.experimental.pallas import tpu as pltpu


def _edge_cross_attn_kernel(q_ref, kv_ref, wq_ref, wkv_ref, wp_ref, bp_ref,
                            o_ref, *, num_heads):
    """One block of `batch_block` batch rows per grid step.

    q_ref  : (Bb, Nq, dim)        bf16  queries (channels-last)
    kv_ref : (Bb, Nk, dim_edge)   bf16  key/value source
    wq_ref : (dim, dim)           bf16  q projection (out, in), scale folded
    wkv_ref: (2*dim, dim_edge)    bf16  stacked [wk; wv] projections (out, in)
    wp_ref : (H, hd, dim)         bf16  per-head slice of the output Linear
    bp_ref : (1, dim)             f32   output Linear bias
    o_ref  : (Bb, Nq, dim)
    """
    H = num_heads
    Bb, Nq, dim = q_ref.shape
    Nk = kv_ref.shape[1]
    hd = dim // H

    # Hoist the (constant) weights once per grid step.
    wq = wq_ref[...]          # (dim, dim)
    wkv = wkv_ref[...]        # (2*dim, dim_edge)
    wp = wp_ref[...]          # (H, hd, dim)
    bias = bp_ref[...]        # (1, dim) f32

    for b in range(Bb):       # short, unrolled at trace time
        q2d = q_ref[b]        # (Nq, dim)       bf16
        kv2d = kv_ref[b]      # (Nk, dim_edge)  bf16

        # ---- Q projection: one full-width feature-major MXU matmul.
        qp = jnp.einsum('od,nd->on', wq, q2d,
                        preferred_element_type=jnp.float32)        # (dim, Nq)
        # Free sublane split in f32, then cast.
        qh = qp.reshape(H, hd, Nq).astype(jnp.bfloat16)            # (H, hd, Nq)

        # ---- Fused K/V projection: single matmul, split on sublanes (f32).
        kvp = jnp.einsum('od,nd->on', wkv, kv2d,
                         preferred_element_type=jnp.float32)       # (2*dim, Nk)
        kvp = kvp.reshape(2, H, hd, Nk)
        kh = kvp[0].astype(jnp.bfloat16)                           # (H, hd, Nk)
        vh = kvp[1].astype(jnp.bfloat16)                           # (H, hd, Nk)

        # ---- Attention logits: heads as the batch axis, transposed-LHS dot
        # (scale already folded into wq).
        logits = jnp.einsum('hcq,hck->hqk', qh, kh,
                            preferred_element_type=jnp.float32)    # (H, Nq, Nk)

        # ---- Softmax over keys in f32; normalization deferred past attn @ V.
        m = jnp.max(logits, axis=-1, keepdims=True)
        e = jnp.exp(logits - m)                                    # (H, Nq, Nk)
        s = jnp.sum(e, axis=-1, keepdims=True)                     # (H, Nq, 1)
        p = e.astype(jnp.bfloat16)
        # attn_drop / proj_drop are identity at inference (p = 0.0).

        # ---- Weighted values (minor/minor contraction over keys, no .T).
        x = jnp.einsum('hqk,hck->hqc', p, vh,
                       preferred_element_type=jnp.float32)         # (H, Nq, hd)
        x = x * pl.reciprocal(s, approx=False)   # exact; s is tiny, EUP idle
        x = x.astype(jnp.bfloat16)

        # ---- Output projection folded per head (fine at small Nq).
        y = jnp.einsum('hqc,hcd->hqd', x, wp,
                       preferred_element_type=jnp.float32)         # (H, Nq, dim)
        out = jnp.sum(y, axis=0) + bias                            # (Nq, dim)

        o_ref[b] = out.astype(o_ref.dtype)


def prepare_params(wq_conv, wk_conv, wv_conv, wp_lin, b_lin,
                   *, num_heads, qk_scale=None):
    """Convert PyTorch-layout weights to the kernel layout (one-time prep).

    wq_conv: (dim, dim)       Conv1d weight (out, in), kernel size 1 squeezed
    wk_conv: (dim, dim_edge)  Conv1d weight (out, in)
    wv_conv: (dim, dim_edge)  Conv1d weight (out, in)
    wp_lin : (dim, dim)       Linear weight (out, in)
    b_lin  : (dim,)           Linear bias
    """
    dim = wq_conv.shape[0]
    hd = dim // num_heads
    scale = qk_scale if qk_scale is not None else hd ** (-0.5)
    # The module applies *both* qk_scale and 1/sqrt(head_dim); fold into wq.
    combined = scale / math.sqrt(hd)

    wq = (wq_conv * combined)                         # (dim, dim), (out, in)
    wkv = jnp.concatenate([wk_conv, wv_conv], axis=0) # (2*dim, dim_edge)
    wp_h = wp_lin.T.reshape(num_heads, hd, dim)       # (H, hd, dim)
    bp = b_lin.reshape(1, dim)

    return (wq.astype(jnp.bfloat16),
            wkv.astype(jnp.bfloat16),
            wp_h.astype(jnp.bfloat16),
            bp.astype(jnp.float32))


def edge_cross_attention(q, kv, kernel_params, *, num_heads,
                         batch_block=None, out_dtype=jnp.float32):
    """q: (B, Nq, dim) f32, kv: (B, Nk, dim_edge) f32."""
    B, Nq, dim = q.shape
    _, Nk, dim_edge = kv.shape
    hd = dim // num_heads
    wq, wkv, wp_h, bp = kernel_params

    if batch_block is None:
        # Exactly 2 grid steps when possible: one per v7x TensorCore, and
        # near-minimal per-step overhead on single-TC v5e/v6e.
        batch_block = B // 2 if (B >= 2 and B % 2 == 0) else B
    assert B % batch_block == 0, "B must be divisible by batch_block"
    grid = (B // batch_block,)

    kernel = partial(_edge_cross_attn_kernel, num_heads=num_heads)

    grid_spec = pltpu.PrefetchScalarGridSpec(
        num_scalar_prefetch=0,
        grid=grid,
        in_specs=[
            pl.BlockSpec((batch_block, Nq, dim), lambda b: (b, 0, 0)),
            pl.BlockSpec((batch_block, Nk, dim_edge), lambda b: (b, 0, 0)),
            pl.BlockSpec((dim, dim), lambda b: (0, 0)),
            pl.BlockSpec((2 * dim, dim_edge), lambda b: (0, 0)),
            pl.BlockSpec((num_heads, hd, dim), lambda b: (0, 0, 0)),
            pl.BlockSpec((1, dim), lambda b: (0, 0)),
        ],
        out_specs=pl.BlockSpec((batch_block, Nq, dim), lambda b: (b, 0, 0)),
    )

    return pl.pallas_call(
        kernel,
        out_shape=jax.ShapeDtypeStruct((B, Nq, dim), out_dtype),
        grid_spec=grid_spec,
        compiler_params=pltpu.CompilerParams(
            dimension_semantics=("parallel",),
            vmem_limit_bytes=32 * 1024 * 1024),
    )(q.astype(jnp.bfloat16), kv.astype(jnp.bfloat16), wq, wkv, wp_h, bp)


def _reference(q, kv, wq_conv, wk_conv, wv_conv, wp_lin, b_lin,
               *, num_heads, qk_scale=None):
    """Pure-JAX f32 reference mirroring the PyTorch forward exactly."""
    B, Nq, dim = q.shape
    hd = dim // num_heads
    scale = qk_scale if qk_scale is not None else hd ** (-0.5)

    qp = jnp.einsum('bni,oi->bno', q, wq_conv)
    kp = jnp.einsum('bni,oi->bno', kv, wk_conv)
    vp = jnp.einsum('bni,oi->bno', kv, wv_conv)

    def split(x):
        b, n, c = x.shape
        return x.reshape(b, n, num_heads, c // num_heads).transpose(0, 2, 1, 3)

    qh, kh, vh = split(qp), split(kp), split(vp)
    attn = jnp.einsum('bhqd,bhkd->bhqk', qh, kh) * scale / math.sqrt(hd)
    attn = jax.nn.softmax(attn, axis=-1)
    x = jnp.einsum('bhqk,bhkd->bhqd', attn, vh)
    x = x.transpose(0, 2, 1, 3).reshape(B, Nq, dim)
    return jnp.einsum('bno,eo->bne', x, wp_lin) + b_lin


if __name__ == "__main__":
    # Small shapes consistent with the module (dim divisible by num_heads,
    # lane-dense dim, 2 parallel grid steps of 2 batch rows each).
    B, Nq, Nk = 4, 16, 32
    dim, dim_edge, num_heads = 128, 64, 8

    key = jax.random.PRNGKey(0)
    kq, kkv, k1, k2, k3, k4, k5 = jax.random.split(key, 7)

    q = jax.random.normal(kq, (B, Nq, dim), dtype=jnp.float32)
    kv = jax.random.normal(kkv, (B, Nk, dim_edge), dtype=jnp.float32)

    # Synthetic parameters in PyTorch layouts (qkv_bias=False).
    wq_conv = jax.random.normal(k1, (dim, dim), dtype=jnp.float32) * 0.05
    wk_conv = jax.random.normal(k2, (dim, dim_edge), dtype=jnp.float32) * 0.05
    wv_conv = jax.random.normal(k3, (dim, dim_edge), dtype=jnp.float32) * 0.05
    wp_lin = jax.random.normal(k4, (dim, dim), dtype=jnp.float32) * 0.05
    b_lin = jax.random.normal(k5, (dim,), dtype=jnp.float32) * 0.05

    params = prepare_params(wq_conv, wk_conv, wv_conv, wp_lin, b_lin,
                            num_heads=num_heads)

    out = edge_cross_attention(q, kv, params, num_heads=num_heads)
    out = jax.block_until_ready(out)

    ref = _reference(q, kv, wq_conv, wk_conv, wv_conv, wp_lin, b_lin,
                     num_heads=num_heads)
    assert out.shape == (B, Nq, dim)
    # bf16 matmul intermediates vs. f32 reference.
    assert jnp.allclose(out, ref, rtol=2e-2, atol=2e-2), "mismatch vs reference"

    print("KERNEL_OK")
</pallas_src>

<mosaic_0001>
module attributes {stable_mosaic.version = 11 : i64} {
  func.func @_edge_cross_attn_kernel(%arg0: i32, %arg1: memref<2x16x128xbf16, #tpu.memory_space<vmem>>, %arg2: memref<2x32x64xbf16, #tpu.memory_space<vmem>>, %arg3: memref<128x128xbf16, #tpu.memory_space<vmem>>, %arg4: memref<256x64xbf16, #tpu.memory_space<vmem>>, %arg5: memref<8x16x128xbf16, #tpu.memory_space<vmem>>, %arg6: memref<1x128xf32, #tpu.memory_space<vmem>>, %arg7: memref<2x16x128xf32, #tpu.memory_space<vmem>>) attributes {dimension_semantics = [#tpu.dimension_semantics<parallel>], iteration_bounds = array<i64: 2>, scalar_prefetch = 0 : i64, scratch_operands = 0 : i64, tpu.core_type = #tpu.core_type<tc>, window_params = [{transform_indices = @transform_0, window_bounds = array<i64: 2, 16, 128>}, {transform_indices = @transform_1, window_bounds = array<i64: 2, 32, 64>}, {pipeline_mode = #tpu.pipeline_mode<synchronous>, transform_indices = @transform_2, window_bounds = array<i64: 128, 128>}, {pipeline_mode = #tpu.pipeline_mode<synchronous>, transform_indices = @transform_3, window_bounds = array<i64: 256, 64>}, {pipeline_mode = #tpu.pipeline_mode<synchronous>, transform_indices = @transform_4, window_bounds = array<i64: 8, 16, 128>}, {pipeline_mode = #tpu.pipeline_mode<synchronous>, transform_indices = @transform_5, window_bounds = array<i64: 1, 128>}, {transform_indices = @transform_6, window_bounds = array<i64: 2, 16, 128>}]} {
    %c0 = arith.constant 0 : index
    %c0_0 = arith.constant 0 : index
    %0 = vector.load %arg3[%c0, %c0_0] : memref<128x128xbf16, #tpu.memory_space<vmem>>, vector<128x128xbf16>
    %c0_1 = arith.constant 0 : index
    %c0_2 = arith.constant 0 : index
    %1 = vector.load %arg4[%c0_1, %c0_2] : memref<256x64xbf16, #tpu.memory_space<vmem>>, vector<256x64xbf16>
    %c0_3 = arith.constant 0 : index
    %c0_4 = arith.constant 0 : index
    %c0_5 = arith.constant 0 : index
    %2 = vector.load %arg5[%c0_3, %c0_4, %c0_5] : memref<8x16x128xbf16, #tpu.memory_space<vmem>>, vector<8x16x128xbf16>
    %c0_6 = arith.constant 0 : index
    %c0_7 = arith.constant 0 : index
    %3 = vector.load %arg6[%c0_6, %c0_7] : memref<1x128xf32, #tpu.memory_space<vmem>>, vector<1x128xf32>
    %c0_8 = arith.constant 0 : index
    %c0_9 = arith.constant 0 : index
    %c0_10 = arith.constant 0 : index
    %4 = vector.load %arg1[%c0_8, %c0_9, %c0_10] : memref<2x16x128xbf16, #tpu.memory_space<vmem>>, vector<1x16x128xbf16>
    %5 = vector.shape_cast %4 : vector<1x16x128xbf16> to vector<16x128xbf16>
    %c0_11 = arith.constant 0 : index
    %c0_12 = arith.constant 0 : index
    %c0_13 = arith.constant 0 : index
    %6 = vector.load %arg2[%c0_11, %c0_12, %c0_13] : memref<2x32x64xbf16, #tpu.memory_space<vmem>>, vector<1x32x64xbf16>
    %7 = vector.shape_cast %6 : vector<1x32x64xbf16> to vector<32x64xbf16>
    "tpu.trace_start"() <{level = 10 : i32, message = "od,nd->on"}> : () -> ()
    %cst = arith.constant dense<0.000000e+00> : vector<128x16xf32>
    %8 = tpu.matmul %0, %5, %cst {dimension_numbers = #tpu.dot_dimension_numbers<[1], [1], [0], [0], [0, 0, 1, 0], [], []>} : vector<128x128xbf16>, vector<16x128xbf16>, vector<128x16xf32> -> vector<128x16xf32>
    "tpu.trace_stop"() : () -> ()
    %9 = vector.shape_cast %8 : vector<128x16xf32> to vector<8x16x16xf32>
    %10 = arith.truncf %9 : vector<8x16x16xf32> to vector<8x16x16xbf16>
    "tpu.trace_start"() <{level = 10 : i32, message = "od,nd->on"}> : () -> ()
    %cst_14 = arith.constant dense<0.000000e+00> : vector<256x32xf32>
    %11 = tpu.matmul %1, %7, %cst_14 {dimension_numbers = #tpu.dot_dimension_numbers<[1], [1], [0], [0], [0, 0, 1, 0], [], []>} : vector<256x64xbf16>, vector<32x64xbf16>, vector<256x32xf32> -> vector<256x32xf32>
    "tpu.trace_stop"() : () -> ()
    %12 = vector.shape_cast %11 : vector<256x32xf32> to vector<2x8x16x32xf32>
    %13 = vector.extract_strided_slice %12 {offsets = [0, 0, 0, 0], sizes = [1, 8, 16, 32], strides = [1, 1, 1, 1]} : vector<2x8x16x32xf32> to vector<1x8x16x32xf32>
    %14 = vector.shape_cast %13 : vector<1x8x16x32xf32> to vector<8x16x32xf32>
    %15 = arith.truncf %14 : vector<8x16x32xf32> to vector<8x16x32xbf16>
    %16 = vector.extract_strided_slice %12 {offsets = [1, 0, 0, 0], sizes = [1, 8, 16, 32], strides = [1, 1, 1, 1]} : vector<2x8x16x32xf32> to vector<1x8x16x32xf32>
    %17 = vector.shape_cast %16 : vector<1x8x16x32xf32> to vector<8x16x32xf32>
    %18 = arith.truncf %17 : vector<8x16x32xf32> to vector<8x16x32xbf16>
    "tpu.trace_start"() <{level = 10 : i32, message = "hcq,hck->hqk"}> : () -> ()
    %cst_15 = arith.constant dense<0.000000e+00> : vector<8x16x32xf32>
    %19 = tpu.matmul %10, %15, %cst_15 {dimension_numbers = #tpu.dot_dimension_numbers<[1], [1], [2], [2], [0, 0, 0, 2, 1, 2], [0], [0]>} : vector<8x16x16xbf16>, vector<8x16x32xbf16>, vector<8x16x32xf32> -> vector<8x16x32xf32>
    "tpu.trace_stop"() : () -> ()
    %cst_16 = arith.constant dense<0xFF800000> : vector<8x16xf32>
    %20 = vector.multi_reduction <maximumf>, %19, %cst_16 [2] : vector<8x16x32xf32> to vector<8x16xf32>
    %21 = vector.shape_cast %20 : vector<8x16xf32> to vector<8x16x1xf32>
    %22 = vector.broadcast %21 : vector<8x16x1xf32> to vector<8x16x32xf32>
    %23 = arith.subf %19, %22 : vector<8x16x32xf32>
    %24 = math.exp %23 : vector<8x16x32xf32>
    %cst_17 = arith.constant dense<0.000000e+00> : vector<8x16xf32>
    %25 = vector.multi_reduction <add>, %24, %cst_17 [2] : vector<8x16x32xf32> to vector<8x16xf32>
    %26 = vector.shape_cast %25 : vector<8x16xf32> to vector<8x16x1xf32>
    %27 = arith.truncf %24 : vector<8x16x32xf32> to vector<8x16x32xbf16>
    "tpu.trace_start"() <{level = 10 : i32, message = "hqk,hck->hqc"}> : () -> ()
    %cst_18 = arith.constant dense<0.000000e+00> : vector<8x16x16xf32>
    %28 = tpu.matmul %27, %18, %cst_18 {dimension_numbers = #tpu.dot_dimension_numbers<[2], [2], [1], [1], [0, 0, 0, 1, 1, 1], [0], [0]>} : vector<8x16x32xbf16>, vector<8x16x32xbf16>, vector<8x16x16xf32> -> vector<8x16x16xf32>
    "tpu.trace_stop"() : () -> ()
    %29 = tpu.reciprocal %26 : vector<8x16x1xf32> -> vector<8x16x1xf32>
    %30 = vector.broadcast %29 : vector<8x16x1xf32> to vector<8x16x16xf32>
    %31 = arith.mulf %28, %30 : vector<8x16x16xf32>
    %32 = arith.truncf %31 : vector<8x16x16xf32> to vector<8x16x16xbf16>
    "tpu.trace_start"() <{level = 10 : i32, message = "hqc,hcd->hqd"}> : () -> ()
    %cst_19 = arith.constant dense<0.000000e+00> : vector<8x16x128xf32>
    %33 = tpu.matmul %32, %2, %cst_19 {dimension_numbers = #tpu.dot_dimension_numbers<[2], [1], [1], [2], [0, 0, 0, 1, 1, 2], [0], [0]>} : vector<8x16x16xbf16>, vector<8x16x128xbf16>, vector<8x16x128xf32> -> vector<8x16x128xf32>
    "tpu.trace_stop"() : () -> ()
    %cst_20 = arith.constant dense<0.000000e+00> : vector<16x128xf32>
    %34 = vector.multi_reduction <add>, %33, %cst_20 [0] : vector<8x16x128xf32> to vector<16x128xf32>
    %35 = vector.broadcast %3 : vector<1x128xf32> to vector<16x128xf32>
    %36 = arith.addf %34, %35 : vector<16x128xf32>
    %c0_21 = arith.constant 0 : index
    %c0_22 = arith.constant 0 : index
    %c0_23 = arith.constant 0 : index
    %37 = vector.load %arg7[%c0_21, %c0_22, %c0_23] : memref<2x16x128xf32, #tpu.memory_space<vmem>>, vector<1x16x128xf32>
    %38 = vector.shape_cast %37 : vector<1x16x128xf32> to vector<16x128xf32>
    %39 = vector.shape_cast %36 : vector<16x128xf32> to vector<1x16x128xf32>
    tpu.vector_store %arg7[%c0_21, %c0_22, %c0_23], %39 {strides = array<i32>} : memref<2x16x128xf32, #tpu.memory_space<vmem>>, vector<1x16x128xf32>,
    %c1 = arith.constant 1 : index
    %c0_24 = arith.constant 0 : index
    %c0_25 = arith.constant 0 : index
    %40 = vector.load %arg1[%c1, %c0_24, %c0_25] : memref<2x16x128xbf16, #tpu.memory_space<vmem>>, vector<1x16x128xbf16>
    %41 = vector.shape_cast %40 : vector<1x16x128xbf16> to vector<16x128xbf16>
    %c1_26 = arith.constant 1 : index
    %c0_27 = arith.constant 0 : index
    %c0_28 = arith.constant 0 : index
    %42 = vector.load %arg2[%c1_26, %c0_27, %c0_28] : memref<2x32x64xbf16, #tpu.memory_space<vmem>>, vector<1x32x64xbf16>
    %43 = vector.shape_cast %42 : vector<1x32x64xbf16> to vector<32x64xbf16>
    "tpu.trace_start"() <{level = 10 : i32, message = "od,nd->on"}> : () -> ()
    %cst_29 = arith.constant dense<0.000000e+00> : vector<128x16xf32>
    %44 = tpu.matmul %0, %41, %cst_29 {dimension_numbers = #tpu.dot_dimension_numbers<[1], [1], [0], [0], [0, 0, 1, 0], [], []>} : vector<128x128xbf16>, vector<16x128xbf16>, vector<128x16xf32> -> vector<128x16xf32>
    "tpu.trace_stop"() : () -> ()
    %45 = vector.shape_cast %44 : vector<128x16xf32> to vector<8x16x16xf32>
    %46 = arith.truncf %45 : vector<8x16x16xf32> to vector<8x16x16xbf16>
    "tpu.trace_start"() <{level = 10 : i32, message = "od,nd->on"}> : () -> ()
    %cst_30 = arith.constant dense<0.000000e+00> : vector<256x32xf32>
    %47 = tpu.matmul %1, %43, %cst_30 {dimension_numbers = #tpu.dot_dimension_numbers<[1], [1], [0], [0], [0, 0, 1, 0], [], []>} : vector<256x64xbf16>, vector<32x64xbf16>, vector<256x32xf32> -> vector<256x32xf32>
    "tpu.trace_stop"() : () -> ()
    %48 = vector.shape_cast %47 : vector<256x32xf32> to vector<2x8x16x32xf32>
    %49 = vector.extract_strided_slice %48 {offsets = [0, 0, 0, 0], sizes = [1, 8, 16, 32], strides = [1, 1, 1, 1]} : vector<2x8x16x32xf32> to vector<1x8x16x32xf32>
    %50 = vector.shape_cast %49 : vector<1x8x16x32xf32> to vector<8x16x32xf32>
    %51 = arith.truncf %50 : vector<8x16x32xf32> to vector<8x16x32xbf16>
    %52 = vector.extract_strided_slice %48 {offsets = [1, 0, 0, 0], sizes = [1, 8, 16, 32], strides = [1, 1, 1, 1]} : vector<2x8x16x32xf32> to vector<1x8x16x32xf32>
    %53 = vector.shape_cast %52 : vector<1x8x16x32xf32> to vector<8x16x32xf32>
    %54 = arith.truncf %53 : vector<8x16x32xf32> to vector<8x16x32xbf16>
    "tpu.trace_start"() <{level = 10 : i32, message = "hcq,hck->hqk"}> : () -> ()
    %cst_31 = arith.constant dense<0.000000e+00> : vector<8x16x32xf32>
    %55 = tpu.matmul %46, %51, %cst_31 {dimension_numbers = #tpu.dot_dimension_numbers<[1], [1], [2], [2], [0, 0, 0, 2, 1, 2], [0], [0]>} : vector<8x16x16xbf16>, vector<8x16x32xbf16>, vector<8x16x32xf32> -> vector<8x16x32xf32>
    "tpu.trace_stop"() : () -> ()
    %cst_32 = arith.constant dense<0xFF800000> : vector<8x16xf32>
    %56 = vector.multi_reduction <maximumf>, %55, %cst_32 [2] : vector<8x16x32xf32> to vector<8x16xf32>
    %57 = vector.shape_cast %56 : vector<8x16xf32> to vector<8x16x1xf32>
    %58 = vector.broadcast %57 : vector<8x16x1xf32> to vector<8x16x32xf32>
    %59 = arith.subf %55, %58 : vector<8x16x32xf32>
    %60 = math.exp %59 : vector<8x16x32xf32>
    %cst_33 = arith.constant dense<0.000000e+00> : vector<8x16xf32>
    %61 = vector.multi_reduction <add>, %60, %cst_33 [2] : vector<8x16x32xf32> to vector<8x16xf32>
    %62 = vector.shape_cast %61 : vector<8x16xf32> to vector<8x16x1xf32>
    %63 = arith.truncf %60 : vector<8x16x32xf32> to vector<8x16x32xbf16>
    "tpu.trace_start"() <{level = 10 : i32, message = "hqk,hck->hqc"}> : () -> ()
    %cst_34 = arith.constant dense<0.000000e+00> : vector<8x16x16xf32>
    %64 = tpu.matmul %63, %54, %cst_34 {dimension_numbers = #tpu.dot_dimension_numbers<[2], [2], [1], [1], [0, 0, 0, 1, 1, 1], [0], [0]>} : vector<8x16x32xbf16>, vector<8x16x32xbf16>, vector<8x16x16xf32> -> vector<8x16x16xf32>
    "tpu.trace_stop"() : () -> ()
    %65 = tpu.reciprocal %62 : vector<8x16x1xf32> -> vector<8x16x1xf32>
    %66 = vector.broadcast %65 : vector<8x16x1xf32> to vector<8x16x16xf32>
    %67 = arith.mulf %64, %66 : vector<8x16x16xf32>
    %68 = arith.truncf %67 : vector<8x16x16xf32> to vector<8x16x16xbf16>
    "tpu.trace_start"() <{level = 10 : i32, message = "hqc,hcd->hqd"}> : () -> ()
    %cst_35 = arith.constant dense<0.000000e+00> : vector<8x16x128xf32>
    %69 = tpu.matmul %68, %2, %cst_35 {dimension_numbers = #tpu.dot_dimension_numbers<[2], [1], [1], [2], [0, 0, 0, 1, 1, 2], [0], [0]>} : vector<8x16x16xbf16>, vector<8x16x128xbf16>, vector<8x16x128xf32> -> vector<8x16x128xf32>
    "tpu.trace_stop"() : () -> ()
    %cst_36 = arith.constant dense<0.000000e+00> : vector<16x128xf32>
    %70 = vector.multi_reduction <add>, %69, %cst_36 [0] : vector<8x16x128xf32> to vector<16x128xf32>
    %71 = vector.broadcast %3 : vector<1x128xf32> to vector<16x128xf32>
    %72 = arith.addf %70, %71 : vector<16x128xf32>
    %c1_37 = arith.constant 1 : index
    %c0_38 = arith.constant 0 : index
    %c0_39 = arith.constant 0 : index
    %73 = vector.load %arg7[%c1_37, %c0_38, %c0_39] : memref<2x16x128xf32, #tpu.memory_space<vmem>>, vector<1x16x128xf32>
    %74 = vector.shape_cast %73 : vector<1x16x128xf32> to vector<16x128xf32>
    %75 = vector.shape_cast %72 : vector<16x128xf32> to vector<1x16x128xf32>
    tpu.vector_store %arg7[%c1_37, %c0_38, %c0_39], %75 {strides = array<i32>} : memref<2x16x128xf32, #tpu.memory_space<vmem>>, vector<1x16x128xf32>,
    return
  }
  func.func @transform_0(%arg0: i32) -> (i32, i32, i32) {
    %c0_i32 = arith.constant 0 : i32
    %c0_i32_0 = arith.constant 0 : i32
    %c0_i32_1 = arith.constant 0 : i32
    return %arg0, %c0_i32, %c0_i32_0 : i32, i32, i32
  }
  func.func @transform_1(%arg0: i32) -> (i32, i32, i32) {
    %c0_i32 = arith.constant 0 : i32
    %c0_i32_0 = arith.constant 0 : i32
    %c0_i32_1 = arith.constant 0 : i32
    return %arg0, %c0_i32, %c0_i32_0 : i32, i32, i32
  }
  func.func @transform_2(%arg0: i32) -> (i32, i32) {
    %c0_i32 = arith.constant 0 : i32
    %c0_i32_0 = arith.constant 0 : i32
    %c0_i32_1 = arith.constant 0 : i32
    return %c0_i32, %c0_i32_0 : i32, i32
  }
  func.func @transform_3(%arg0: i32) -> (i32, i32) {
    %c0_i32 = arith.constant 0 : i32
    %c0_i32_0 = arith.constant 0 : i32
    %c0_i32_1 = arith.constant 0 : i32
    return %c0_i32, %c0_i32_0 : i32, i32
  }
  func.func @transform_4(%arg0: i32) -> (i32, i32, i32) {
    %c0_i32 = arith.constant 0 : i32
    %c0_i32_0 = arith.constant 0 : i32
    %c0_i32_1 = arith.constant 0 : i32
    %c0_i32_2 = arith.constant 0 : i32
    return %c0_i32, %c0_i32_0, %c0_i32_1 : i32, i32, i32
  }
  func.func @transform_5(%arg0: i32) -> (i32, i32) {
    %c0_i32 = arith.constant 0 : i32
    %c0_i32_0 = arith.constant 0 : i32
    %c0_i32_1 = arith.constant 0 : i32
    return %c0_i32, %c0_i32_0 : i32, i32
  }
  func.func @transform_6(%arg0: i32) -> (i32, i32, i32) {
    %c0_i32 = arith.constant 0 : i32
    %c0_i32_0 = arith.constant 0 : i32
    %c0_i32_1 = arith.constant 0 : i32
    return %arg0, %c0_i32, %c0_i32_0 : i32, i32, i32
  }
}

</mosaic_0001>

<bundles_post_ra>
// kernel: tpu_custom_call.1
= control target key start
LH: loop header
LB: loop body
LE: loop exit
PB: predicated region body
PF: predicated region fallthrough
CT: control target
= control target key end

     0   :  { %11 = vsyncpa [#allocation3], 0  ;;  %s5189_s0 = inlined_call_operand.hbm [shape: bf16[4,16,128], index: 0, kind: input, shape index: {}]   ;;  %s5190_s1 = inlined_call_operand.vmem [shape: bf16[4,32,64], index: 1, kind: input, shape index: {}]   ;;  %s5191_s2 = inlined_call_operand.vmem [shape: bf16[128,128], index: 2, kind: input, shape index: {}]   ;;  %s5192_s3 = inlined_call_operand.vmem [shape: bf16[256,64], index: 3, kind: input, shape index: {}]   ;;  %s5193_s4 = inlined_call_operand.vmem [shape: bf16[8,16,128], index: 4, kind: input, shape index: {}]   ;;  %s5194_s5 = inlined_call_operand.vmem [shape: f32[1,128], index: 5, kind: input, shape index: {}]   ;;  %s5195_s6 = inlined_call_operand.hbm [shape: f32[4,16,128], index: 6, kind: output, shape index: {}]  }
   0x1   :  { %13 = vsyncpa [#allocation3 + $0x1], 0 }
   0x2   :  { %14 = vsyncpa [#allocation4], 0 }
   0x3   :  { %16 = vsyncpa [#allocation4 + $0x1], 0  ;;  %s4212_s21 = smov 0   ;;  %s4214_s22 = smov 0  }
   0x4   :  { %s4216_s23 = smov 0   ;;  %s4218_s24 = smov 0  }
   0x5 LB: > { %s4233_s25 = sadd.s32 4294967295, %s4171_s24   ;;  %s3549_s26 = sadd.s32 4294967294, %s4171_s24   ;;  %s4171_s24 = sphi %s4218_s24, %s5223_s24   ;;  %s4167_s23 = sphi %s4216_s23, %s5222_s23   ;;  %s4163_s22 = sphi %s4214_s22, %s5221_s22   ;;  %s4159_s21 = sphi %s4212_s21, %s5220_s21  }
   0x6   : > { %s4237_s27 = sadd.s32 1, %s4171_s24   ;;  %s29_s28 = sadd.s32 1, %s4167_s23 }
   0x7   : > { %s26_s29 = ssub.s32 %s4171_s24, %s4237_s27  ;;  %p36_p0 = scmp.ne.s32.totalorder %s4167_s23, %s4163_s22 }
   0x8   : > { %p27_p1 = scmp.eq.s32.totalorder %s26_s29, 0  ;;  %p37_p2 = scmp.eq.s32.totalorder %s4171_s24, 0 }
   0x9   : > { %p42_p3 = scmp.ne.s32.totalorder %s4163_s22, %s4159_s21  ;;  %p43_p4 = scmp.eq.s32.totalorder %s4233_s25, 0 }
   0xa   : > { %s4249_s30 = scalar_select %p27_p1, %s4167_s23, %s29_s28  }
   0xb   : > { %p4251_p5 = por %p37_p2, %p36_p0  ;;  %p4255_p6 = por %p43_p4, %p42_p3 }
   0xc   : > { %p176_p7 = scmp.eq.s32.totalorder %s4233_s25, 1  ;;  %p182_p8 = scmp.eq.s32.totalorder %s3549_s26, 1 }
   0xd   : > { %p3865_p10 = scmp.lt.s32.totalorder %s4171_s24, 2  ;;  %s214_s11 = sand.u32 1, %s4167_s23  }
   0xe   : > { %p4262_p11 = por %p176_p7, %p36_p0  ;;  %p4266_p12 = por %p182_p8, %p42_p3 }
   0xf   : > { %s3809_s12 = sshll.u32 %s4171_s24, 4  ;;  %s3552_s13 = sshll.u32 %s214_s11, 4 }
  0x10   : > { %s224_s16 = scalar_lea.hbm %s5189_s0, %s3809_s12  ;;  %s218_s18 = scalar_lea.vmem [#allocation2], %s3552_s13 }
  0x11   : > { %s225_s17 = sshll.u32 %s224_s16, 4  ;;  %s227_s19 = sshll.u32 %s218_s18, 4  ;;  %s226_s17 = int_to_ptr.hbm [resolvable:$true] %s225_s17  ;;  %s228_s19 = int_to_ptr.vmem [resolvable:$true] %s227_s19 }
  0x12   : > { %p4277_p13 = pnand %p3865_p10, %p4251_p5  ;;  %p3556_p0 = scmp.ge.s32.totalorder %s4171_s24, 1 }
  0x13   : > { %p245_p1 = scmp.lt.s32.totalorder %s4171_s24, 3  ;;  %s215_s26 = scalar_lea.sflag [#allocation3], %s214_s11 }
  0x14   : > { %s4075_s28 = sshra.s32 %s226_s17, 4  ;;  %p4079_p3 = pneg %p4277_p13  ;;  %s4076_s28 = int_to_ptr.hbm [resolvable:$true] %s4075_s28 }
  0x15   : > { %s4077_s29 = scalar_lea.hbm %s4076_s28, 16  ;;  %s4082_s7 = scalar_lea.hbm %s5189_s0, 32 }
  0x16   : > { %p4078_p2 = scmp.ne.s32.totalorder %s4076_s28, %s4077_s29  ;;  %p4083_p5 = scmp.lt.s32.totalorder %s4076_s28, %s5189_s0 }
  0x17   : > { %p4084_p8 = scmp.lt.s32.totalorder %s4082_s7, %s4077_s29 }
  0x18   : > { %p4080_p4 = pnand %p4079_p3, %p4078_p2 }
  0x19   : > { %p4085_p10 = por %p4084_p8, %p4083_p5 }
  0x1a   : > { %p4081_p7 = pneg %p4080_p4 }
  0x1c   : > { %p4086_p9 = pnand %p4085_p10, %p4081_p7 }
  0x1e   : > { %4089 = shalt.err (!%p4086_p9)
}
  0x1f   : > { %s4173_s11 = smov 64   ;;  %s4174_s16 = smov 4  }
  0x20   : > { %3860 = dma.hbm_to_vmem [thread:$0]  (!%p4277_p13), %s226_s17, 256, %s228_s19, %s215_s26, %s4173_s11, %s4173_s11, %s4174_s16  }
  0x21   : > { %p246_p2 = pnand %p3556_p0, %p245_p1 }
  0x22   : > { %s4298_s18 = sand.u32 (!%p246_p2), 1, %s4163_s22  }
  0x23   : > { %249 = sbr.rel (%p246_p2) target bundleno = 1878 (0x756), region = 44  ;;  %s3557_s28 = sshll.u32 (!%p246_p2), %s4298_s18, 4 }
  0x24   : > { %s252_s29 = scalar_lea.sflag (!%p246_p2), [#allocation3], %s4298_s18  ;;  %s4302_s12 = scalar_lea.vmem (!%p246_p2), [#allocation2], %s3557_s28 }
  0x28   : > { %4150 = dma.done.wait (%p4255_p6), %s252_s29, 256  }
  0x29   : > { %4152 = vsyncadd (%p4255_p6), %s252_s29, 4294967040  ;;  %s3559_s17 = sshll.u32 %s4233_s25, 1  ;;  %vm581_vm0 = vcmask 523264   ;;  %v3843_v0 = vld [vmem:[%s4302_s12] sm:$0xff]  ;;  %v3812_v7 = vld [vmem:[%s5191_s2 + $0x8] sm:$0xff]  ;;  %vm785_vm1 = vcmask 130048  }
  0x2a   : > { %p293_p9 = scmp.lt.s32.totalorder %s3559_s17, 3  ;;  %433 = vmatpush.bf16.xpose.msra.mxu0 %v3843_v0  ;;  %v3811_v4 = vld [vmem:[%s5191_s2] sm:$0xff]  ;;  %v3820_v8 = vld [vmem:[%s5192_s3 + $0x8] sm:$0xff]  ;;  %v3813_v9 = vld [vmem:[%s5191_s2 + $0x10] sm:$0xff]  ;;  %vm1118_vm2 = vcmask 261120   ;;  %s3558_s26 = sshll.u32 %s4298_s18, 5 }
  0x2b   : > { %v3819_v6 = vld [vmem:[%s5192_s3] sm:$0xff]  ;;  %v3814_v10 = vld [vmem:[%s5191_s2 + $0x18] sm:$0xff]  ;;  %v3821_v12 = vld [vmem:[%s5192_s3 + $0x10] sm:$0xff]  ;;  %s4870_s7 = scalar_lea.vmem [#allocation5], %s3558_s26  ;;  %s3850_s11 = sshll.u32 %s4233_s25, 5 }
  0x2c   : > { %s5225_s17 = smov (!%p293_p9, %s3559_s17), 3  ;;  %v3815_v11 = vld [vmem:[%s5191_s2 + $0x20] sm:$0xff]  ;;  %v3816_v13 = vld [vmem:[%s5191_s2 + $0x28] sm:$0xff]  ;;  %v3817_v14 = vld [vmem:[%s5191_s2 + $0x30] sm:$0xff]  ;;  %s3448_s20 = scalar_lea.sflag [#allocation4], %s4298_s18 }
  0x2d   : > { %s3810_s19 = sshll.u32 %s5225_s17, 4  ;;  %v3822_v15 = vld [vmem:[%s5192_s3 + $0x18] sm:$0xff]  ;;  %v3823_v17 = vld [vmem:[%s5192_s3 + $0x20] sm:$0xff]  ;;  %v3824_v19 = vld [vmem:[%s5192_s3 + $0x28] sm:$0xff]  ;;  %s3460_s17 = scalar_lea.hbm %s5195_s6, %s3850_s11 }
  0x2e   : > { %s4312_s13 = scalar_lea.vmem %s5190_s1, %s3810_s19  ;;  %v3818_v16 = vld [vmem:[%s5191_s2 + $0x38] sm:$0xff]  ;;  %v3825_v27 = vld [vmem:[%s5192_s3 + $0x30] sm:$0xff]  ;;  %v3827_v52 = vld [vmem:[%s5192_s3 + $0x40] sm:$0xff]  ;;  %s3461_s19 = sshll.u32 %s4870_s7, 4  ;;  %s3462_s19 = int_to_ptr.vmem [resolvable:$true] %s3461_s19 }
  0x2f   : > { %v3845_v1 = vld [vmem:[%s4312_s13 + $0x8] sm:$0xff]  ;;  %v3844_v3 = vld [vmem:[%s4312_s13] sm:$0xff]  ;;  %v3826_v47 = vld [vmem:[%s5192_s3 + $0x38] sm:$0xff]  ;;  %s3463_s25 = sshll.u32 %s3460_s17, 4  ;;  %s4125_s15 = scalar_lea.hbm %s5195_s6, 64  ;;  %s3464_s25 = int_to_ptr.hbm [resolvable:$true] %s3463_s25 }
  0x30   : > { %v634_v2 = vsel %vm581_vm0, %v3845_v1, 0  ;;  %v631_v5 = vsel %vm581_vm0, %v3844_v3, 0  ;;  %v3828_v1 = vld [vmem:[%s5192_s3 + $0x48] sm:$0xff]  ;;  %s4119_s26 = sshra.s32 %s3464_s25, 4  ;;  %s4120_s26 = int_to_ptr.hbm [resolvable:$true] %s4119_s26 }
  0x31   : > { %642 = vmatpush.bf16.xpose.msra.mxu1 %v634_v2  ;;  %434 = vmatmul.bf16.vlgmr.msra.gmra.mxu0 %v3811_v4  ;;  %p4126_p1 = scmp.lt.s32.totalorder %s4120_s26, %s5195_s6 }
  0x39   : > { %643 = vmatpush.bf16.xpose.msra.mxu1 %v631_v5  ;;  %v3829_v5 = vld [vmem:[%s5192_s3 + $0x50] sm:$0xff] }
  0x40   : > { %3670 = vmatmul.msk.bf16.vlgmr.msra.gmra.mxu1 %vm581_vm0, %v3819_v6 }
  0x41   : > { %439 = vmatmul.bf16.gmra.mxu0 %v3812_v7 }
  0x50   : > { %3671 = vmatmul.msk.bf16.gmra.mxu1 %vm581_vm0, %v3820_v8 }
  0x51   : > { %444 = vmatmul.bf16.gmra.mxu0 %v3813_v9 }
  0x60   : > { %3672 = vmatmul.msk.bf16.gmra.mxu1 %vm581_vm0, %v3821_v12 }
  0x61   : > { %449 = vmatmul.bf16.gmra.mxu0 %v3814_v10 }
  0x70   : > { %3673 = vmatmul.msk.bf16.gmra.mxu1 %vm581_vm0, %v3822_v15 }
  0x71   : > { %454 = vmatmul.bf16.gmra.mxu0 %v3815_v11 }
  0x80   : > { %3674 = vmatmul.msk.bf16.gmra.mxu1 %vm581_vm0, %v3823_v17 }
  0x81   : > { %459 = vmatmul.bf16.gmra.mxu0 %v3816_v13 }
  0x90   : > { %3675 = vmatmul.msk.bf16.gmra.mxu1 %vm581_vm0, %v3824_v19  ;;  %v3830_v19 = vld [vmem:[%s5192_s3 + $0x58] sm:$0xff] }
  0x91   : > { %464 = vmatmul.bf16.gmra.mxu0 %v3817_v14 }
  0xa0   : > { %3676 = vmatmul.msk.bf16.gmra.mxu1 %vm581_vm0, %v3825_v27 }
  0xa1   : > { %469 = vmatmul.bf16.gmra.mxu0 %v3818_v16 }
  0xae   : > { %v435_v18 = vpop.f32.mrf.mxu0 }
  0xaf   : > { %v475_v31 = vpack.c.bf16 %v435_v18, %v435_v18 }
  0xb0   : > { %3677 = vmatmul.msk.bf16.gmra.mxu1 %vm581_vm0, %v3826_v47 }
  0xb1   : > { %v759_v37 = vunpack.c.l.b16 %v475_v31 }
  0xb6   : > { %v437_v20 = vpop.f32.mrf.mxu0 }
  0xb7   : > { %v476_v29 = vpack.c.bf16 %v437_v20, %v437_v20 }
  0xb9   : > { %v760_v34 = vunpack.c.l.b16 %v476_v29 }
  0xbb   : > { %v761_v40 = vpack.c.b16 %v760_v34, %v759_v37 }
  0xbd   : > { %v645_v21 = vpop.f32.mrf.mxu1 }
  0xbe   : > { %v725_v22 = vpack.c.bf16 %v645_v21, %v645_v21  ;;  %v440_v23 = vpop.f32.mrf.mxu0 }
  0xbf   : > { %v477_v32 = vpack.c.bf16 %v440_v23, %v440_v23 }
  0xc0   : > { %v781_v25 = vunpack.c.l.b16 %v725_v22  ;;  %3678 = vmatmul.msk.bf16.gmra.mxu1 %vm581_vm0, %v3827_v52 }
  0xc1   : > { %v805_v38 = vunpack.c.l.b16 %v477_v32 }
  0xc5   : > { %v647_v24 = vpop.f32.mrf.mxu1 }
  0xc6   : > { %v726_v26 = vpack.c.bf16 %v647_v24, %v647_v24  ;;  %v442_v33 = vpop.f32.mrf.mxu0 }
  0xc7   : > { %v478_v35 = vpack.c.bf16 %v442_v33, %v442_v33 }
  0xc8   : > { %v782_v28 = vunpack.c.l.b16 %v726_v26 }
  0xc9   : > { %v806_v39 = vunpack.c.l.b16 %v478_v35 }
  0xca   : > { %v783_v30 = vpack.c.b16 %v782_v28, %v781_v25  ;;  %v3831_v28 = vld [vmem:[%s5192_s3 + $0x60] sm:$0xff] }
  0xcb   : > { %v807_v41 = vpack.c.b16 %v806_v39, %v805_v38 }
  0xcc   : > { %796 = vmatpush.bf16.msrb.mxu0 %v783_v30 }
  0xcd   : > { %v650_v36 = vpop.f32.mrf.mxu1  ;;  %3904 = vxpose.binary.xlu0.c.b16.start.end [1/2] (short) (narrow) %v807_v41, %v761_v40, 16 }
  0xce   : > { %v727_v42 = vpack.c.bf16 %v650_v36, %v650_v36  ;;  %v445_v43 = vpop.f32.mrf.mxu0 }
  0xcf   : > { %v479_v54 = vpack.c.bf16 %v445_v43, %v445_v43  ;;  %v3832_v43 = vld [vmem:[%s5192_s3 + $0x68] sm:$0xff] }
  0xd0   : > { %v827_v45 = vunpack.c.l.b16 %v727_v42  ;;  %3679 = vmatmul.msk.bf16.gmra.mxu1 %vm581_vm0, %v3828_v1 }
  0xd1   : > { %v850_v59 = vunpack.c.l.b16 %v479_v54 }
  0xd5   : > { %v652_v44 = vpop.f32.mrf.mxu1 }
  0xd6   : > { %v728_v46 = vpack.c.bf16 %v652_v44, %v652_v44  ;;  %v447_v50 = vpop.f32.mrf.mxu0 }
  0xd7   : > { %v480_v53 = vpack.c.bf16 %v447_v50, %v447_v50 }
  0xd8   : > { %v828_v48 = vunpack.c.l.b16 %v728_v46 }
  0xd9   : > { %v851_v57 = vunpack.c.l.b16 %v480_v53 }
  0xda   : > { %v829_v49 = vpack.c.b16 %v828_v48, %v827_v45 }
  0xdb   : > { %v852_v62 = vpack.c.b16 %v851_v57, %v850_v59  ;;  %v3834_v59 = vld [vmem:[%s5192_s3 + $0x78] sm:$0xff] }
  0xdc   : > { %841 = vmatpush.bf16.msrb.mxu1 %v829_v49 }
  0xdd   : > { %v655_v3 = vpop.f32.mrf.mxu1 }
  0xde   : > { %v450_v51 = vpop.f32.mrf.mxu0  ;;  %v729_v31 = vpack.c.bf16 %v655_v3, %v655_v3 }
  0xdf   : > { %v481_v55 = vpack.c.bf16 %v450_v51, %v450_v51  ;;  %v3833_v51 = vld [vmem:[%s5192_s3 + $0x70] sm:$0xff] }
  0xe0   : > { %3680 = vmatmul.msk.bf16.gmra.mxu1 %vm581_vm0, %v3829_v5  ;;  %v872_v34 = vunpack.c.l.b16 %v729_v31 }
  0xe1   : > { %v895_v60 = vunpack.c.l.b16 %v481_v55 }
  0xe5   : > { %v657_v9 = vpop.f32.mrf.mxu1 }
  0xe6   : > { %v452_v56 = vpop.f32.mrf.mxu0  ;;  %v730_v33 = vpack.c.bf16 %v657_v9, %v657_v9 }
  0xe7   : > { %v482_v58 = vpack.c.bf16 %v452_v56, %v452_v56 }
  0xe8   : > { %v873_v39 = vunpack.c.l.b16 %v730_v33 }
  0xe9   : > { %v896_v61 = vunpack.c.l.b16 %v482_v58 }
  0xea   : > { %v874_v41 = vpack.c.b16 %v873_v39, %v872_v34 }
  0xeb   : > { %v897_v63 = vpack.c.b16 %v896_v61, %v895_v60 }
  0xec   : > { %886 = vmatpush.bf16.msra.mxu2 %v874_v41 }
  0xed   : > { %3907 = vxpose.binary.xlu0.c.b16.start.end [1/2] (short) (narrow) %v897_v63, %v852_v62, 16  ;;  %v660_v20 = vpop.f32.mrf.mxu1 }
  0xee   : > { %v455_v0 = vpop.f32.mrf.mxu0  ;;  %v731_v45 = vpack.c.bf16 %v660_v20, %v660_v20 }
  0xef   : > { %v483_v7 = vpack.c.bf16 %v455_v0, %v455_v0 }
  0xf0   : > { %3681 = vmatmul.msk.bf16.gmra.mxu1 %vm581_vm0, %v3830_v19  ;;  %v917_v47 = vunpack.c.l.b16 %v731_v45 }
  0xf1   : > { %v940_v13 = vunpack.c.l.b16 %v483_v7 }
  0xf5   : > { %v662_v25 = vpop.f32.mrf.mxu1 }
  0xf6   : > { %v457_v2 = vpop.f32.mrf.mxu0  ;;  %v732_v46 = vpack.c.bf16 %v662_v25, %v662_v25 }
  0xf7   : > { %v484_v6 = vpack.c.bf16 %v457_v2, %v457_v2 }
  0xf8   : > { %v918_v49 = vunpack.c.l.b16 %v732_v46 }
  0xf9   : > { %v941_v11 = vunpack.c.l.b16 %v484_v6 }
  0xfa   : > { %v919_v50 = vpack.c.b16 %v918_v49, %v917_v47 }
  0xfb   : > { %v942_v16 = vpack.c.b16 %v941_v11, %v940_v13 }
  0xfc   : > { %931 = vmatpush.bf16.msra.mxu3 %v919_v50 }
  0xfd   : > { %v665_v30 = vpop.f32.mrf.mxu1 }
  0xfe   : > { %v460_v4 = vpop.f32.mrf.mxu0  ;;  %v733_v53 = vpack.c.bf16 %v665_v30, %v665_v30 }
  0xff   : > { %v485_v8 = vpack.c.bf16 %v460_v4, %v460_v4 }
 0x100   : > { %3682 = vmatmul.msk.bf16.gmra.mxu1 %vm581_vm0, %v3831_v28  ;;  %v962_v55 = vunpack.c.l.b16 %v733_v53 }
 0x101   : > { %v985_v14 = vunpack.c.l.b16 %v485_v8 }
 0x105   : > { %v667_v37 = vpop.f32.mrf.mxu1 }
 0x106   : > { %v462_v10 = vpop.f32.mrf.mxu0  ;;  %v734_v54 = vpack.c.bf16 %v667_v37, %v667_v37 }
 0x107   : > { %v486_v12 = vpack.c.bf16 %v462_v10, %v462_v10 }
 0x108   : > { %v963_v56 = vunpack.c.l.b16 %v734_v54 }
 0x109   : > { %v986_v15 = vunpack.c.l.b16 %v486_v12 }
 0x10a   : > { %v964_v58 = vpack.c.b16 %v963_v56, %v962_v55 }
 0x10b   : > { %v987_v17 = vpack.c.b16 %v986_v15, %v985_v14 }
 0x10c   : > { %976 = vmatpush.bf16.msrb.mxu2 %v964_v58 }
 0x10d   : > { %3910 = vxpose.binary.xlu1.c.b16.start.end [1/2] (short) (narrow) %v987_v17, %v942_v16, 16  ;;  %v670_v44 = vpop.f32.mrf.mxu1 }
 0x10e   : > { %v465_v18 = vpop.f32.mrf.mxu0  ;;  %v735_v61 = vpack.c.bf16 %v670_v44, %v670_v44 }
 0x10f   : > { %v487_v21 = vpack.c.bf16 %v465_v18, %v465_v18 }
 0x110   : > { %3683 = vmatmul.msk.bf16.gmra.mxu1 %vm581_vm0, %v3832_v43  ;;  %v1007_v63 = vunpack.c.l.b16 %v735_v61 }
 0x111   : > { %v1030_v23 = vunpack.c.l.b16 %v487_v21 }
 0x115   : > { %v672_v48 = vpop.f32.mrf.mxu1 }
 0x116   : > { %v467_v22 = vpop.f32.mrf.mxu0  ;;  %v736_v62 = vpack.c.bf16 %v672_v48, %v672_v48 }
 0x117   : > { %v488_v24 = vpack.c.bf16 %v467_v22, %v467_v22 }
 0x118   : > { %v1008_v0 = vunpack.c.l.b16 %v736_v62 }
 0x119   : > { %v1031_v26 = vunpack.c.l.b16 %v488_v24 }
 0x11a   : > { %v1009_v2 = vpack.c.b16 %v1008_v0, %v1007_v63 }
 0x11b   : > { %v1032_v27 = vpack.c.b16 %v1031_v26, %v1030_v23 }
 0x11c   : > { %1021 = vmatpush.bf16.msrb.mxu3 %v1009_v2 }
 0x11d   : > { %1034 = vxpose.xlu1.c.b16.start.end [1/1] (short) (narrow) %v1032_v27, 16  ;;  %v675_v52 = vpop.f32.mrf.mxu1 }
 0x11e   : > { %v470_v29 = vpop.f32.mrf.mxu0  ;;  %v737_v12 = vpack.c.bf16 %v675_v52, %v675_v52 }
 0x11f   : > { %v489_v32 = vpack.c.bf16 %v470_v29, %v470_v29 }
 0x120   : > { %3684 = vmatmul.msk.bf16.gmra.mxu1 %vm581_vm0, %v3833_v51  ;;  %v1052_v14 = vunpack.c.l.b16 %v737_v12 }
 0x121   : > { %v1075_v36 = vunpack.c.l.b16 %v489_v32 }
 0x125   : > { %v677_v57 = vpop.f32.mrf.mxu1 }
 0x126   : > { %v472_v35 = vpop.f32.mrf.mxu0  ;;  %v738_v13 = vpack.c.bf16 %v677_v57, %v677_v57 }
 0x127   : > { %v490_v38 = vpack.c.bf16 %v472_v35, %v472_v35 }
 0x128   : > { %v1053_v15 = vunpack.c.l.b16 %v738_v13 }
 0x129   : > { %v1076_v40 = vunpack.c.l.b16 %v490_v38 }
 0x12a   : > { %v1054_v17 = vpack.c.b16 %v1053_v15, %v1052_v14 }
 0x12b   : > { %v1077_v42 = vpack.c.b16 %v1076_v40, %v1075_v36 }
 0x12d   : > { %1079 = vxpose.xlu2.c.b16.start.end [1/1] (short) (narrow) %v1077_v42, 16  ;;  %v680_v60 = vpop.f32.mrf.mxu1 }
 0x12e   : > { %v739_v18 = vpack.c.bf16 %v680_v60, %v680_v60 }
 0x130   : > { %3685 = vmatmul.msk.bf16.gmra.mxu1 %vm581_vm0, %v3834_v59  ;;  %v1097_v21 = vunpack.c.l.b16 %v739_v18 }
 0x135   : > { %v682_v1 = vpop.f32.mrf.mxu1 }
 0x136   : > { %v740_v19 = vpack.c.bf16 %v682_v1, %v682_v1 }
 0x138   : > { %v1098_v22 = vunpack.c.l.b16 %v740_v19 }
 0x13a   : > { %v1099_v24 = vpack.c.b16 %v1098_v22, %v1097_v21 }
 0x13d   : > { %v685_v3 = vpop.f32.mrf.mxu1 }
 0x13e   : > { %v741_v32 = vpack.c.bf16 %v685_v3, %v685_v3 }
 0x140   : > { %v1286_v35 = vunpack.c.l.b16 %v741_v32 }
 0x145   : > { %v687_v4 = vpop.f32.mrf.mxu1 }
 0x146   : > { %v742_v33 = vpack.c.bf16 %v687_v4, %v687_v4 }
 0x148   : > { %v1287_v36 = vunpack.c.l.b16 %v742_v33 }
 0x14a   : > { %v1288_v38 = vpack.c.b16 %v1287_v36, %v1286_v35 }
 0x14c   : > { %v1293_v48 = vsel %vm1118_vm2, %v1288_v38, 0 }
 0x14d   : > { %v690_v5 = vpop.f32.mrf.mxu1 }
 0x14e   : > { %v743_v39 = vpack.c.bf16 %v690_v5, %v690_v5 }
 0x150   : > { %v1316_v45 = vunpack.c.l.b16 %v743_v39 }
 0x155   : > { %v692_v6 = vpop.f32.mrf.mxu1 }
 0x156   : > { %v744_v40 = vpack.c.bf16 %v692_v6, %v692_v6 }
 0x158   : > { %v1317_v46 = vunpack.c.l.b16 %v744_v40 }
 0x15a   : > { %v1318_v52 = vpack.c.b16 %v1317_v46, %v1316_v45 }
 0x15c   : > { %v1323_v57 = vsel %vm1118_vm2, %v1318_v52, 0 }
 0x15d   : > { %v695_v8 = vpop.f32.mrf.mxu1 }
 0x15e   : > { %v745_v49 = vpack.c.bf16 %v695_v8, %v695_v8 }
 0x160   : > { %v1346_v54 = vunpack.c.l.b16 %v745_v49 }
 0x165   : > { %v697_v10 = vpop.f32.mrf.mxu1 }
 0x166   : > { %v746_v50 = vpack.c.bf16 %v697_v10, %v697_v10 }
 0x168   : > { %v1347_v55 = vunpack.c.l.b16 %v746_v50 }
 0x16a   : > { %v1348_v59 = vpack.c.b16 %v1347_v55, %v1346_v54 }
 0x16c   : > { %v1353_v3 = vsel %vm1118_vm2, %v1348_v59, 0 }
 0x16d   : > { %v700_v11 = vpop.f32.mrf.mxu1 }
 0x16e   : > { %v747_v58 = vpack.c.bf16 %v700_v11, %v700_v11 }
 0x170   : > { %v1376_v62 = vunpack.c.l.b16 %v747_v58 }
 0x175   : > { %v702_v16 = vpop.f32.mrf.mxu1 }
 0x176   : > { %v748_v60 = vpack.c.bf16 %v702_v16, %v702_v16 }
 0x178   : > { %v1377_v0 = vunpack.c.l.b16 %v748_v60 }
 0x179   : > { %v3905_v7 = vpop.trf.xlu0 }
 0x17a   : > { %3686 = vmatmul.msk.bf16.vlgmr.msrb.gmra.mxu0 %vm785_vm1, %v3905_v7  ;;  %v1378_v6 = vpack.c.b16 %v1377_v0, %v1376_v62 }
 0x17c   : > { %v1383_v10 = vsel %vm1118_vm2, %v1378_v6, 0 }
 0x17d   : > { %v705_v23 = vpop.f32.mrf.mxu1 }
 0x17e   : > { %v749_v26 = vpack.c.bf16 %v705_v23, %v705_v23 }
 0x180   : > { %v4411_v28 = vunpack.c.l.b16 %v749_v26 }
 0x181   : > { %v3906_v9 = vpop.trf.xlu0 }
 0x182   : > { %3687 = vmatmul.msk.bf16.vlgmr.msrb.gmra.mxu1 %vm785_vm1, %v3906_v9 }
 0x185   : > { %v707_v27 = vpop.f32.mrf.mxu1 }
 0x186   : > { %v750_v29 = vpack.c.bf16 %v707_v27, %v707_v27 }
 0x188   : > { %v4413_v30 = vunpack.c.l.b16 %v750_v29 }
 0x18a   : > { %v1408_v31 = vpack.c.b16 %v4413_v30, %v4411_v28 }
 0x18d   : > { %v710_v34 = vpop.f32.mrf.mxu1 }
 0x18e   : > { %v751_v37 = vpack.c.bf16 %v710_v34, %v710_v34 }
 0x190   : > { %v4417_v42 = vunpack.c.l.b16 %v751_v37 }
 0x195   : > { %v712_v41 = vpop.f32.mrf.mxu1 }
 0x196   : > { %v752_v43 = vpack.c.bf16 %v712_v41, %v712_v41 }
 0x198   : > { %v4420_v47 = vunpack.c.l.b16 %v752_v43 }
 0x199   : > { %v3908_v20 = vpop.trf.xlu0 }
 0x19a   : > { %3688 = vmatmul.msk.bf16.vlgmr.msra.gmra.mxu2 %vm785_vm1, %v3908_v20  ;;  %v1438_v51 = vpack.c.b16 %v4420_v47, %v4417_v42 }
 0x19b   : > { %1066 = vmatpush.bf16.msra.mxu2 %v1054_v17 }
 0x19c   : > { %v1443_v28 = vsel %vm1118_vm2, %v1438_v51, 0 }
 0x19d   : > { %v715_v53 = vpop.f32.mrf.mxu1 }
 0x19e   : > { %v753_v61 = vpack.c.bf16 %v715_v53, %v715_v53 }
 0x1a0   : > { %v4427_v1 = vunpack.c.l.b16 %v753_v61 }
 0x1a1   : > { %v3909_v25 = vpop.trf.xlu0 }
 0x1a2   : > { %3689 = vmatmul.msk.bf16.vlgmr.msra.gmra.mxu3 %vm785_vm1, %v3909_v25 }
 0x1a3   : > { %1111 = vmatpush.bf16.msra.mxu3 %v1099_v24 }
 0x1a5   : > { %v717_v63 = vpop.f32.mrf.mxu1 }
 0x1a6   : > { %v754_v2 = vpack.c.bf16 %v717_v63, %v717_v63 }
 0x1a8   : > { %v4431_v5 = vunpack.c.l.b16 %v754_v2 }
 0x1aa   : > { %v1468_v7 = vpack.c.b16 %v4431_v5, %v4427_v1 }
 0x1ad   : > { %v720_v8 = vpop.f32.mrf.mxu1 }
 0x1ae   : > { %v755_v11 = vpack.c.bf16 %v720_v8, %v720_v8 }
 0x1b0   : > { %v4437_v13 = vunpack.c.l.b16 %v755_v11 }
 0x1b5   : > { %v722_v12 = vpop.f32.mrf.mxu1 }
 0x1b6   : > { %v756_v14 = vpack.c.bf16 %v722_v12, %v722_v12 }
 0x1b8   : > { %v4439_v15 = vunpack.c.l.b16 %v756_v14 }
 0x1b9   : > { %v3911_v44 = vpop.trf.xlu1 }
 0x1ba   : > { %3690 = vmatmul.msk.bf16.vlgmr.msrb.gmra.mxu2 %vm785_vm1, %v3911_v44  ;;  %v1498_v16 = vpack.c.b16 %v4439_v15, %v4437_v13 }
 0x1bb   : > { %1302 = vmatpush.bf16.xpose.msrb.mxu2 %v1293_v48 }
 0x1bc   : > { %v1503_v1 = vsel %vm1118_vm2, %v1498_v16, 0 }
 0x1c1   : > { %v3912_v56 = vpop.trf.xlu1 }
 0x1c2   : > { %3691 = vmatmul.msk.bf16.vlgmr.msrb.gmra.mxu3 %vm785_vm1, %v3912_v56 }
 0x1c3   : > { %1332 = vmatpush.bf16.xpose.msrb.mxu3 %v1323_v57 }
 0x1c9   : > { %v1042_v4 = vpop.trf.xlu1 }
 0x1ca   : > { %3692 = vmatmul.msk.bf16.vlgmr.msra.gmra.mxu2 %vm785_vm1, %v1042_v4 }
 0x1cb   : > { %1362 = vmatpush.bf16.xpose.msra.mxu2 %v1353_v3 }
 0x1ce   : > { %v1087_v9 = vpop.trf.xlu2 }
 0x1d2   : > { %3693 = vmatmul.msk.bf16.vlgmr.msra.gmra.mxu3 %vm785_vm1, %v1087_v9 }
 0x1d3   : > { %1392 = vmatpush.bf16.xpose.msra.mxu3 %v1383_v10 }
 0x1f7   : > { %v798_v17 = vpop.f32.mrf.mxu0 }
 0x1f8   : > { %v1119_v18 = vsel %vm1118_vm2, %v798_v17, -inf }
 0x1f9   : > { %1120 = vmax.xlane.f32.xlu2 %v1119_v18 }
 0x1ff   : > { %v800_v19 = vpop.f32.mrf.mxu0  ;;  %v843_v20 = vpop.f32.mrf.mxu1 }
 0x200   : > { %v1122_v21 = vsel %vm1118_vm2, %v800_v19, -inf  ;;  %v1125_v22 = vsel %vm1118_vm2, %v843_v20, -inf }
 0x201   : > { %1123 = vmax.xlane.f32.xlu2 %v1122_v21 }
 0x207   : > { %v845_v23 = vpop.f32.mrf.mxu1 }
 0x208   : > { %v1128_v24 = vsel %vm1118_vm2, %v845_v23, -inf }
 0x209   : > { %1129 = vmax.xlane.f32.xlu0 %v1128_v24  ;;  %1126 = vmax.xlane.f32.xlu2 %v1125_v22 }
 0x21d   : > { %v4447_v25 = vpop.f32.mrf.mxu2 }
 0x21e   : > { %v1131_v26 = vsel %vm1118_vm2, %v4447_v25, -inf }
 0x21f   : > { %1132 = vmax.xlane.f32.xlu1 %v1131_v26 }
 0x225   : > { %v4451_v27 = vpop.f32.mrf.mxu2  ;;  %v4453_v29 = vpop.f32.mrf.mxu3 }
 0x226   : > { %v1134_v32 = vsel %vm1118_vm2, %v4451_v27, -inf  ;;  %v1137_v33 = vsel %vm1118_vm2, %v4453_v29, -inf }
 0x227   : > { %1135 = vmax.xlane.f32.xlu2 %v1134_v32 }
 0x22d   : > { %v4459_v34 = vpop.f32.mrf.mxu3 }
 0x22e   : > { %v1140_v35 = vsel %vm1118_vm2, %v4459_v34, -inf }
 0x22f   : > { %1141 = vmax.xlane.f32.xlu1 %v1140_v35  ;;  %1138 = vmax.xlane.f32.xlu2 %v1137_v33 }
 0x23d   : > { %v4463_v36 = vpop.f32.mrf.mxu2 }
 0x23e   : > { %v1143_v37 = vsel %vm1118_vm2, %v4463_v36, -inf }
 0x23f   : > { %1144 = vmax.xlane.f32.xlu1 %v1143_v37 }
 0x245   : > { %v4467_v38 = vpop.f32.mrf.mxu2  ;;  %v4469_v39 = vpop.f32.mrf.mxu3 }
 0x246   : > { %v1149_v40 = vsel %vm1118_vm2, %v4469_v39, -inf  ;;  %v1146_v41 = vsel %vm1118_vm2, %v4467_v38, -inf }
 0x247   : > { %1150 = vmax.xlane.f32.xlu0 %v1149_v40  ;;  %1147 = vmax.xlane.f32.xlu1 %v1146_v41 }
 0x24d   : > { %v4475_v43 = vpop.f32.mrf.mxu3  ;;  %v4477_v44 = vpop.f32.mrf.mxu2 }
 0x24e   : > { %v1152_v45 = vsel %vm1118_vm2, %v4475_v43, -inf  ;;  %v1155_v46 = vsel %vm1118_vm2, %v4477_v44, -inf }
 0x24f   : > { %1153 = vmax.xlane.f32.xlu1 %v1152_v45  ;;  %1156 = vmax.xlane.f32.xlu0 %v1155_v46 }
 0x255   : > { %v4483_v48 = vpop.f32.mrf.mxu2  ;;  %v4487_v50 = vpop.f32.mrf.mxu3 }
 0x256   : > { %v1158_v49 = vsel %vm1118_vm2, %v4483_v48, -inf }
 0x257   : > { %1159 = vmax.xlane.f32.xlu1 %v1158_v49 }
 0x25d   : > { %v4489_v52 = vpop.f32.mrf.mxu3 }
 0x25e   : > { %v1164_v53 = vsel %vm1118_vm2, %v4489_v52, -inf }
 0x25f   : > { %1165 = vmax.xlane.f32.xlu2 %v1164_v53 }
 0x26c   : > { %v1121_v54 = vpop.xlane.xlu2 %1120 }
 0x26d   : > { %v1167_v55 = vsub.f32 %v798_v17, %v1121_v54  ;;  %v1413_v17 = vsel %vm1118_vm2, %v1408_v31, 0 }
 0x26f   : > { %v1183_v56 = vmul.f32 1.442695, %v1167_v55 }
 0x271   : > { %3914 = vpow2.f32 %v1183_v56 }
 0x274   : > { %v1124_v57 = vpop.xlane.xlu2 %1123 }
 0x275   : > { %v1168_v58 = vsub.f32 %v800_v19, %v1124_v57 }
 0x277   : > { %v3915_v59 = vpop.eup %3914  ;;  %v1185_v60 = vmul.f32 1.442695, %v1168_v58 }
 0x278   : > { %v1215_v61 = vsel %vm1118_vm2, %v3915_v59, 0.0  ;;  %v1263_v3 = vpack.c.bf16 %v3915_v59, %v3915_v59 }
 0x279   : > { %3916 = vpow2.f32 %v1185_v60  ;;  %1216 = vadd.xlane.f32.xlu0 %v1215_v61 }
 0x27a   : > { %v1281_v11 = vunpack.c.l.b16 %v1263_v3 }
 0x27c   : > { %v1130_v62 = vpop.xlane.xlu0 %1129  ;;  %v1127_v63 = vpop.xlane.xlu2 %1126 }
 0x27d   : > { %v1170_v0 = vsub.f32 %v845_v23, %v1130_v62  ;;  %v1169_v2 = vsub.f32 %v843_v20, %v1127_v63 }
 0x27f   : > { %v3917_v4 = vpop.eup %3916  ;;  %v1189_v6 = vmul.f32 1.442695, %v1170_v0  ;;  %v1187_v8 = vmul.f32 1.442695, %v1169_v2 }
 0x280   : > { %v1264_v9 = vpack.c.bf16 %v3917_v4, %v3917_v4  ;;  %v1218_v10 = vsel %vm1118_vm2, %v3917_v4, 0.0 }
 0x281   : > { %3918 = vpow2.f32 %v1189_v6  ;;  %1219 = vadd.xlane.f32.xlu1 %v1218_v10 }
 0x282   : > { %v1282_v12 = vunpack.c.l.b16 %v1264_v9  ;;  %3920 = vpow2.f32 %v1187_v8 }
 0x284   : > { %v1283_v14 = vpack.c.b16 %v1282_v12, %v1281_v11 }
 0x286   : > { %3694 = vmatmul.msk.bf16.vlgmr.msrb.gmra.mxu2 %vm1118_vm2, %v1283_v14 }
 0x287   : > { %v4500_v18 = vpop.eup %3918  ;;  %1422 = vmatpush.bf16.xpose.msrb.mxu2 %v1413_v17 }
 0x288   : > { %v3921_v19 = vpop.eup %3920  ;;  %v1266_v20 = vpack.c.bf16 %v4500_v18, %v4500_v18 }
 0x289   : > { %v1265_v21 = vpack.c.bf16 %v3921_v19, %v3921_v19  ;;  %v1221_v22 = vsel %vm1118_vm2, %v3921_v19, 0.0 }
 0x28a   : > { %v1312_v23 = vunpack.c.l.b16 %v1266_v20  ;;  %1222 = vadd.xlane.f32.xlu2 %v1221_v22 }
 0x28b   : > { %v1311_v24 = vunpack.c.l.b16 %v1265_v21 }
 0x28d   : > { %v1313_v26 = vpack.c.b16 %v1312_v23, %v1311_v24 }
 0x28f   : > { %3695 = vmatmul.msk.bf16.vlgmr.msrb.gmra.mxu3 %vm1118_vm2, %v1313_v26 }
 0x290   : > { %1452 = vmatpush.bf16.xpose.msrb.mxu3 %v1443_v28 }
 0x292   : > { %v1133_v30 = vpop.xlane.xlu1 %1132 }
 0x293   : > { %v1171_v31 = vsub.f32 %v4447_v25, %v1133_v30  ;;  %v1161_v30 = vsel %vm1118_vm2, %v4487_v50, -inf }
 0x295   : > { %v1191_v32 = vmul.f32 1.442695, %v1171_v31 }
 0x297   : > { %3922 = vpow2.f32 %v1191_v32 }
 0x29a   : > { %v1136_v33 = vpop.xlane.xlu2 %1135 }
 0x29b   : > { %v1172_v35 = vsub.f32 %v4451_v27, %v1136_v33 }
 0x29d   : > { %v3923_v37 = vpop.eup %3922  ;;  %v1193_v40 = vmul.f32 1.442695, %v1172_v35 }
 0x29e   : > { %v1227_v41 = vsel %vm1118_vm2, %v3923_v37, 0.0  ;;  %v1267_v51 = vpack.c.bf16 %v3923_v37, %v3923_v37 }
 0x29f   : > { %3924 = vpow2.f32 %v1193_v40  ;;  %1228 = vadd.xlane.f32.xlu0 %v1227_v41 }
 0x2a0   : > { %v1341_v27 = vunpack.c.l.b16 %v1267_v51 }
 0x2a2   : > { %v1142_v45 = vpop.xlane.xlu1 %1141  ;;  %v1139_v46 = vpop.xlane.xlu2 %1138 }
 0x2a3   : > { %v1174_v42 = vsub.f32 %v4459_v34, %v1142_v45  ;;  %v1173_v47 = vsub.f32 %v4453_v29, %v1139_v46  ;;  %v1473_v29 = vsel %vm1118_vm2, %v1468_v7, 0 }
 0x2a5   : > { %v3925_v49 = vpop.eup %3924  ;;  %v1197_v25 = vmul.f32 1.442695, %v1174_v42  ;;  %v1195_v53 = vmul.f32 1.442695, %v1173_v47 }
 0x2a6   : > { %v1268_v54 = vpack.c.bf16 %v3925_v49, %v3925_v49  ;;  %v1230_v55 = vsel %vm1118_vm2, %v3925_v49, 0.0 }
 0x2a7   : > { %3926 = vpow2.f32 %v1197_v25  ;;  %1231 = vadd.xlane.f32.xlu1 %v1230_v55 }
 0x2a8   : > { %v1342_v56 = vunpack.c.l.b16 %v1268_v54  ;;  %3928 = vpow2.f32 %v1195_v53  ;;  %v1224_v54 = vsel %vm1118_vm2, %v4500_v18, 0.0 }
 0x2aa   : > { %v1343_v57 = vpack.c.b16 %v1342_v56, %v1341_v27 }
 0x2ac   : > { %3696 = vmatmul.msk.bf16.vlgmr.msra.gmra.mxu2 %vm1118_vm2, %v1343_v57 }
 0x2ad   : > { %v3927_v34 = vpop.eup %3926  ;;  %1482 = vmatpush.bf16.xpose.msra.mxu2 %v1473_v29 }
 0x2ae   : > { %v3929_v58 = vpop.eup %3928  ;;  %v1270_v59 = vpack.c.bf16 %v3927_v34, %v3927_v34  ;;  %v1236_v60 = vsel %vm1118_vm2, %v3927_v34, 0.0 }
 0x2af   : > { %v1269_v61 = vpack.c.bf16 %v3929_v58, %v3929_v58  ;;  %1237 = vadd.xlane.f32.xlu1 %v1236_v60  ;;  %v1233_v62 = vsel %vm1118_vm2, %v3929_v58, 0.0  ;;  %v3835_v60 = vld [vmem:[%s5193_s4] sm:$0xff] }
 0x2b0   : > { %v1372_v63 = vunpack.c.l.b16 %v1270_v59  ;;  %1234 = vadd.xlane.f32.xlu0 %v1233_v62 }
 0x2b1   : > { %v1371_v0 = vunpack.c.l.b16 %v1269_v61 }
 0x2b2   : > { %v1145_v2 = vpop.xlane.xlu1 %1144 }
 0x2b3   : > { %v1373_v3 = vpack.c.b16 %v1372_v63, %v1371_v0  ;;  %v1175_v4 = vsub.f32 %v4463_v36, %v1145_v2 }
 0x2b5   : > { %3697 = vmatmul.msk.bf16.vlgmr.msra.gmra.mxu3 %vm1118_vm2, %v1373_v3  ;;  %v1199_v5 = vmul.f32 1.442695, %v1175_v4 }
 0x2b6   : > { %1512 = vmatpush.bf16.xpose.msra.mxu3 %v1503_v1 }
 0x2b7   : > { %3930 = vpow2.f32 %v1199_v5 }
 0x2ba   : > { %v1151_v7 = vpop.xlane.xlu0 %1150  ;;  %v1148_v6 = vpop.xlane.xlu1 %1147 }
 0x2bb   : > { %v1177_v8 = vsub.f32 %v4469_v39, %v1151_v7  ;;  %v1176_v9 = vsub.f32 %v4467_v38, %v1148_v6 }
 0x2bd   : > { %v1203_v10 = vmul.f32 1.442695, %v1177_v8  ;;  %v1201_v11 = vmul.f32 1.442695, %v1176_v9  ;;  %v3931_v36 = vpop.eup %3930 }
 0x2be   : > { %v1271_v17 = vpack.c.bf16 %v3931_v36, %v3931_v36  ;;  %v1239_v55 = vsel %vm1118_vm2, %v3931_v36, 0.0 }
 0x2bf   : > { %3932 = vpow2.f32 %v1203_v10 }
 0x2c0   : > { %3934 = vpow2.f32 %v1201_v11  ;;  %v1401_v23 = vunpack.c.l.b16 %v1271_v17 }
 0x2c2   : > { %v1154_v12 = vpop.xlane.xlu1 %1153  ;;  %v1157_v14 = vpop.xlane.xlu0 %1156 }
 0x2c3   : > { %v1178_v13 = vsub.f32 %v4475_v43, %v1154_v12  ;;  %v1179_v15 = vsub.f32 %v4477_v44, %v1157_v14 }
 0x2c5   : > { %v3933_v16 = vpop.eup %3932  ;;  %v1205_v19 = vmul.f32 1.442695, %v1178_v13  ;;  %v1207_v22 = vmul.f32 1.442695, %v1179_v15 }
 0x2c6   : > { %v3935_v20 = vpop.eup %3934  ;;  %v1245_v39 = vsel %vm1118_vm2, %v3933_v16, 0.0  ;;  %v1273_v44 = vpack.c.bf16 %v3933_v16, %v3933_v16 }
 0x2c7   : > { %v1272_v21 = vpack.c.bf16 %v3935_v20, %v3935_v20  ;;  %3936 = vpow2.f32 %v1205_v19  ;;  %v1242_v38 = vsel %vm1118_vm2, %v3935_v20, 0.0  ;;  %1246 = vadd.xlane.f32.xlu0 %v1245_v39 }
 0x2c8   : > { %1243 = vadd.xlane.f32.xlu2 %v1242_v38  ;;  %3938 = vpow2.f32 %v1207_v22  ;;  %v1431_v37 = vunpack.c.l.b16 %v1273_v44 }
 0x2c9   : > { %v1402_v24 = vunpack.c.l.b16 %v1272_v21 }
 0x2ca   : > { %v1160_v26 = vpop.xlane.xlu1 %1159 }
 0x2cb   : > { %v1403_v28 = vpack.c.b16 %v1402_v24, %v1401_v23  ;;  %v1180_v43 = vsub.f32 %v4483_v48, %v1160_v26  ;;  %v3837_v26 = vld [vmem:[%s5193_s4 + $0x10] sm:$0xff] }
 0x2cc   : > { %1852 = vmatpush.bf16.msra.mxu0 %v3837_v26 }
 0x2cd   : > { %v3937_v31 = vpop.eup %3936  ;;  %v1209_v32 = vmul.f32 1.442695, %v1180_v43  ;;  %3698 = vmatmul.msk.bf16.vlgmr.msrb.gmra.mxu2 %vm1118_vm2, %v1403_v28 }
 0x2ce   : > { %v1274_v33 = vpack.c.bf16 %v3937_v31, %v3937_v31  ;;  %v1248_v35 = vsel %vm1118_vm2, %v3937_v31, 0.0  ;;  %v3939_v41 = vpop.eup %3938  ;;  %1796 = vmatpush.bf16.msrb.mxu2 %v3835_v60 }
 0x2cf   : > { %3940 = vpow2.f32 %v1209_v32  ;;  %1249 = vadd.xlane.f32.xlu1 %v1248_v35  ;;  %1162 = vmax.xlane.f32.xlu0 %v1161_v30  ;;  %v1275_v46 = vpack.c.bf16 %v3939_v41, %v3939_v41  ;;  %v1251_v47 = vsel %vm1118_vm2, %v3939_v41, 0.0 }
 0x2d0   : > { %v1432_v40 = vunpack.c.l.b16 %v1274_v33  ;;  %v3838_v33 = vld [vmem:[%s5193_s4 + $0x18] sm:$0xff] }
 0x2d1   : > { %v1461_v49 = vunpack.c.l.b16 %v1275_v46 }
 0x2d2   : > { %v1433_v45 = vpack.c.b16 %v1432_v40, %v1431_v37  ;;  %v1166_v27 = vpop.xlane.xlu2 %1165 }
 0x2d3   : > { %v1182_v56 = vsub.f32 %v4489_v52, %v1166_v27 }
 0x2d4   : > { %3699 = vmatmul.msk.bf16.vlgmr.msrb.gmra.mxu3 %vm1118_vm2, %v1433_v45 }
 0x2d5   : > { %v3941_v48 = vpop.eup %3940  ;;  %v1213_v57 = vmul.f32 1.442695, %v1182_v56 }
 0x2d6   : > { %v1276_v42 = vpack.c.bf16 %v3941_v48, %v3941_v48  ;;  %v1254_v51 = vsel %vm1118_vm2, %v3941_v48, 0.0 }
 0x2d7   : > { %1252 = vadd.xlane.f32.xlu1 %v1251_v47  ;;  %1255 = vadd.xlane.f32.xlu0 %v1254_v51  ;;  %3942 = vpow2.f32 %v1213_v57 }
 0x2d8   : > { %v1462_v25 = vunpack.c.l.b16 %v1276_v42 }
 0x2da   : > { %v1463_v53 = vpack.c.b16 %v1462_v25, %v1461_v49 }
 0x2dd   : > { %3700 = vmatmul.msk.bf16.vlgmr.msra.gmra.mxu2 %vm1118_vm2, %v1463_v53  ;;  %v4548_v29 = vpop.eup %3942 }
 0x2de   : > { %v1260_v58 = vsel %vm1118_vm2, %v4548_v29, 0.0  ;;  %1880 = vmatpush.bf16.msra.mxu2 %v3838_v33 }
 0x2df   : > { %1225 = vadd.xlane.f32.xlu1 %v1224_v54  ;;  %1240 = vadd.xlane.f32.xlu0 %v1239_v55 }
 0x2e7   : > { %1261 = vadd.xlane.f32.xlu0 %v1260_v58 }
 0x2ec   : > { %v1217_v34 = vpop.xlane.xlu0 %1216 }
 0x2ed   : > { %3944 = vrcp.f32 %v1217_v34  ;;  %v1530_v1 = vand.u32 2147483648, %v1217_v34  ;;  %vm1524_vm4 = vweird.f32 %v1217_v34  ;;  %v1528_v5 = vand.u32 2147483647, %v1217_v34 }
 0x2ef   : > { %v1531_v9 = vor.u32 1.1754944e-38, %v1530_v1  ;;  %vm1529_vm7 = vcmp.eq.f32.partialorder %v1528_v5, 8.507059e+37 }
 0x2f3   : > { %v3945_v18 = vpop.eup %3944 }
 0x2f4   : > { %v1220_v59 = vpop.xlane.xlu1 %1219  ;;  %v1520_v61 = vmul.f32 %v3945_v18, %v1217_v34  ;;  %vm1525_vm3 = vweird.f32 %v3945_v18 }
 0x2f5   : > { %3946 = vrcp.f32 %v1220_v59  ;;  %vm1526_vm5 = vmor %vm1524_vm4, %vm1525_vm3  ;;  %v1544_v10 = vand.u32 2147483648, %v1220_v59  ;;  %vm1538_vm8 = vweird.f32 %v1220_v59  ;;  %v1542_v11 = vand.u32 2147483647, %v1220_v59 }
 0x2f6   : > { %v1521_v62 = vsub.f32 1.0, %v1520_v61 }
 0x2f7   : > { %v1545_v13 = vor.u32 1.1754944e-38, %v1544_v10  ;;  %vm1543_vm10 = vcmp.eq.f32.partialorder %v1542_v11, 8.507059e+37 }
 0x2f8   : > { %v1522_v2 = vmul.f32 %v3945_v18, %v1521_v62 }
 0x2fa   : > { %v1523_v4 = vadd.f32 %v3945_v18, %v1522_v2 }
 0x2fb   : > { %v3947_v52 = vpop.eup %3946 }
 0x2fc   : > { %v1534_v63 = vmul.f32 %v3947_v52, %v1220_v59  ;;  %v1527_v6 = vsel %vm1526_vm5, %v3945_v18, %v1523_v4  ;;  %vm1539_vm6 = vweird.f32 %v3947_v52 }
 0x2fd   : > { %v1532_v36 = vsel %vm1529_vm7, %v1531_v9, %v1527_v6  ;;  %vm1540_vm9 = vmor %vm1538_vm8, %vm1539_vm6  ;;  %v4573_v18 = vpop.xlane.xlu2 %1222 }
 0x2fe   : > { %v1535_v0 = vsub.f32 1.0, %v1534_v63 }
 0x300   : > { %v1536_v3 = vmul.f32 %v3947_v52, %v1535_v0 }
 0x302   : > { %v1537_v8 = vadd.f32 %v3947_v52, %v1536_v3 }
 0x304   : > { %v1541_v14 = vsel %vm1540_vm9, %v3947_v52, %v1537_v8 }
 0x305   : > { %v1546_v16 = vsel %vm1543_vm10, %v1545_v13, %v1541_v14 }
 0x309   : > { %v1304_v7 = vpop.f32.mrf.mxu2 }
 0x30a   : > { %v1743_v12 = vmul.f32 %v1532_v36, %v1304_v7 }
 0x30c   : > { %v1759_v17 = vpack.c.bf16 %v1743_v12, %v1743_v12 }
 0x30e   : > { %v1777_v21 = vunpack.c.l.b16 %v1759_v17 }
 0x311   : > { %v1306_v15 = vpop.f32.mrf.mxu2 }
 0x312   : > { %v1744_v19 = vmul.f32 %v1546_v16, %v1306_v15  ;;  %v1229_v39 = vpop.xlane.xlu0 %1228  ;;  %v4565_v35 = vpop.f32.mrf.mxu3 }
 0x313   : > { %3948 = vrcp.f32 %v1229_v39  ;;  %v1586_v49 = vand.u32 2147483648, %v1229_v39  ;;  %vm1580_vm12 = vweird.f32 %v1229_v39  ;;  %v1584_v25 = vand.u32 2147483647, %v1229_v39 }
 0x314   : > { %v1760_v20 = vpack.c.bf16 %v1744_v19, %v1744_v19 }
 0x315   : > { %v1587_v57 = vor.u32 1.1754944e-38, %v1586_v49  ;;  %vm1585_vm15 = vcmp.eq.f32.partialorder %v1584_v25, 8.507059e+37 }
 0x316   : > { %v1778_v38 = vunpack.c.l.b16 %v1760_v20 }
 0x318   : > { %v1779_v22 = vpack.c.b16 %v1778_v38, %v1777_v21 }
 0x319   : > { %v3949_v24 = vpop.eup %3948 }
 0x31a   : > { %3706 = vmatmul.msk.bf16.vlgmr.msrb.gmra.mxu2 %vm785_vm1, %v1779_v22  ;;  %v1232_v23 = vpop.xlane.xlu1 %1231  ;;  %v1576_v28 = vmul.f32 %v3949_v24, %v1229_v39  ;;  %vm1581_vm11 = vweird.f32 %v3949_v24  ;;  %v4571_v54 = vpop.f32.mrf.mxu3 }
 0x31b   : > { %3950 = vrcp.f32 %v1232_v23  ;;  %vm1582_vm13 = vmor %vm1580_vm12, %vm1581_vm11  ;;  %v1600_v34 = vand.u32 2147483648, %v1232_v23  ;;  %vm1594_vm3 = vweird.f32 %v1232_v23  ;;  %v1598_v59 = vand.u32 2147483647, %v1232_v23 }
 0x31c   : > { %v1577_v31 = vsub.f32 1.0, %v1576_v28 }
 0x31d   : > { %v1601_v63 = vor.u32 1.1754944e-38, %v1600_v34  ;;  %vm1599_vm6 = vcmp.eq.f32.partialorder %v1598_v59, 8.507059e+37  ;;  %v1556_v34 = vand.u32 2147483647, %v4573_v18 }
 0x31e   : > { %v1578_v40 = vmul.f32 %v3949_v24, %v1577_v31 }
 0x320   : > { %v1579_v42 = vadd.f32 %v3949_v24, %v1578_v40 }
 0x321   : > { %v3951_v43 = vpop.eup %3950 }
 0x322   : > { %v4559_v44 = vpop.xlane.xlu1 %1237  ;;  %v1590_v32 = vmul.f32 %v3951_v43, %v1232_v23  ;;  %v1583_v55 = vsel %vm1582_vm13, %v3949_v24, %v1579_v42  ;;  %vm1595_vm14 = vweird.f32 %v3951_v43 }
 0x323   : > { %3952 = vrcp.f32 %v4559_v44  ;;  %v1235_v30 = vpop.xlane.xlu0 %1234  ;;  %v1588_v60 = vsel %vm1585_vm15, %v1587_v57, %v1583_v55  ;;  %vm1596_vm4 = vmor %vm1594_vm3, %vm1595_vm14  ;;  %v1628_v12 = vand.u32 2147483648, %v4559_v44  ;;  %vm1622_vm11 = vweird.f32 %v4559_v44 }
 0x324   : > { %3954 = vrcp.f32 %v1235_v30  ;;  %v1591_v37 = vsub.f32 1.0, %v1590_v32  ;;  %v1614_v2 = vand.u32 2147483648, %v1235_v30  ;;  %vm1608_vm7 = vweird.f32 %v1235_v30 }
 0x325   : > { %3956 = vrcp.f32 %v4573_v18  ;;  %v1612_v1 = vand.u32 2147483647, %v1235_v30  ;;  %v1626_v14 = vand.u32 2147483647, %v4559_v44  ;;  %v1629_v21 = vor.u32 1.1754944e-38, %v1628_v12 }
 0x326   : > { %v1592_v48 = vmul.f32 %v3951_v43, %v1591_v37  ;;  %v1615_v11 = vor.u32 1.1754944e-38, %v1614_v2  ;;  %v1278_v55 = vpack.c.bf16 %v4548_v29, %v4548_v29  ;;  %vm1552_vm15 = vweird.f32 %v4573_v18 }
 0x327   : > { %vm1613_vm10 = vcmp.eq.f32.partialorder %v1612_v1, 8.507059e+37  ;;  %vm1627_vm13 = vcmp.eq.f32.partialorder %v1626_v14, 8.507059e+37  ;;  %v3846_v1 = vld [vmem:[%s4302_s12 + $0x8] sm:$0xff]  ;;  %s4121_s12 = scalar_lea.hbm %s4120_s26, 32 }
 0x328   : > { %v1593_v27 = vadd.f32 %v3951_v43, %v1592_v48  ;;  %p4122_p6 = scmp.ne.s32.totalorder %s4120_s26, %s4121_s12  ;;  %p4127_p3 = scmp.lt.s32.totalorder %s4125_s15, %s4121_s12 }
 0x329   : > { %v4567_v41 = vpop.eup %3952 }
 0x32a   : > { %v3955_v45 = vpop.eup %3954  ;;  %v1618_v47 = vmul.f32 %v4567_v41, %v4559_v44  ;;  %v1597_v52 = vsel %vm1596_vm4, %v3951_v43, %v1593_v27  ;;  %vm1623_vm9 = vweird.f32 %v4567_v41  ;;  %v1558_v27 = vand.u32 2147483648, %v4573_v18  ;;  %p4123_p13 = pnand %p4122_p6, %p4262_p11  ;;  %p4128_p4 = por %p4127_p3, %p4126_p1 }
 0x32b   : > { %v1604_v46 = vmul.f32 %v3955_v45, %v1235_v30  ;;  %vm1609_vm5 = vweird.f32 %v3955_v45  ;;  %v1602_v4 = vsel %vm1599_vm6, %v1601_v63, %v1597_v52  ;;  %v4584_v13 = vpop.eup %3956  ;;  %vm1624_vm12 = vmor %vm1622_vm11, %vm1623_vm9  ;;  %vm1557_vm4 = vcmp.eq.f32.partialorder %v1556_v34, 8.507059e+37 }
 0x32c   : > { %v1619_v56 = vsub.f32 1.0, %v1618_v47  ;;  %vm1610_vm8 = vmor %vm1608_vm7, %vm1609_vm5  ;;  %v1548_v38 = vmul.f32 %v4584_v13, %v4573_v18  ;;  %vm1553_vm14 = vweird.f32 %v4584_v13  ;;  %v3841_v18 = vld [vmem:[%s5193_s4 + $0x30] sm:$0xff]  ;;  %v1559_v63 = vor.u32 1.1754944e-38, %v1558_v27  ;;  %p4124_p0 = pneg %p4123_p13 }
 0x32d   : > { %v1605_v51 = vsub.f32 1.0, %v1604_v46  ;;  %vm4627_vm3 = vmor %vm1552_vm15, %vm1553_vm14  ;;  %1964 = vmatpush.bf16.msrb.mxu2 %v3841_v18 }
 0x32e   : > { %v1620_v62 = vmul.f32 %v4567_v41, %v1619_v56  ;;  %v1549_v44 = vsub.f32 1.0, %v1548_v38  ;;  %p4129_p7 = pnand %p4128_p4, %p4124_p0 }
 0x32f   : > { %v1364_v53 = vpop.f32.mrf.mxu2  ;;  %v1606_v58 = vmul.f32 %v3955_v45, %v1605_v51 }
 0x330   : > { %v1747_v61 = vmul.f32 %v1588_v60, %v1364_v53  ;;  %v1621_v9 = vadd.f32 %v4567_v41, %v1620_v62  ;;  %v1550_v46 = vmul.f32 %v4584_v13, %v1549_v44  ;;  %v3836_v53 = vld [vmem:[%s5193_s4 + $0x8] sm:$0xff]  ;;  %v1492_v62 = vunpack.c.l.b16 %v1278_v55  ;;  %v3839_v44 = vld [vmem:[%s5193_s4 + $0x20] sm:$0xff] }
 0x331   : > { %v1607_v0 = vadd.f32 %v3955_v45, %v1606_v58  ;;  %1824 = vmatpush.bf16.msrb.mxu3 %v3836_v53 }
 0x332   : > { %v1763_v5 = vpack.c.bf16 %v1747_v61, %v1747_v61  ;;  %v1625_v20 = vsel %vm1624_vm12, %v4567_v41, %v1621_v9  ;;  %v1551_v49 = vadd.f32 %v4584_v13, %v1550_v46 }
 0x333   : > { %v1611_v8 = vsel %vm1610_vm8, %v3955_v45, %v1607_v0  ;;  %v1630_v23 = vsel %vm1627_vm13, %v1629_v21, %v1625_v20  ;;  %v3840_v45 = vld [vmem:[%s5193_s4 + $0x28] sm:$0xff] }
 0x334   : > { %v1833_v15 = vunpack.c.l.b16 %v1763_v5  ;;  %v1616_v17 = vsel %vm1613_vm10, %v1615_v11, %v1611_v8  ;;  %1936 = vmatpush.bf16.msrb.mxu0 %v3840_v45  ;;  %v1555_v61 = vsel %vm4627_vm3, %v4584_v13, %v1551_v49 }
 0x337   : > { %v1366_v3 = vpop.f32.mrf.mxu2 }
 0x338   : > { %v1748_v7 = vmul.f32 %v1602_v4, %v1366_v3  ;;  %v1394_v6 = vpop.f32.mrf.mxu3 }
 0x339   : > { %v1749_v19 = vmul.f32 %v1616_v17, %v1394_v6 }
 0x33a   : > { %v1764_v10 = vpack.c.bf16 %v1748_v7, %v1748_v7  ;;  %v4579_v36 = vpop.xlane.xlu0 %1246  ;;  %v1560_v7 = vsel %vm1557_vm4, %v1559_v63, %v1555_v61 }
 0x33b   : > { %3958 = vrcp.f32 %v4579_v36  ;;  %v1765_v24 = vpack.c.bf16 %v1749_v19, %v1749_v19  ;;  %v4597_v41 = vpop.xlane.xlu2 %1243  ;;  %v4657_v12 = vmul.f32 %v1560_v7, %v4565_v35  ;;  %vm1664_vm6 = vweird.f32 %v4579_v36 }
 0x33c   : > { %v1834_v16 = vunpack.c.l.b16 %v1764_v10  ;;  %v1668_v17 = vand.u32 2147483647, %v4579_v36 }
 0x33d   : > { %v1861_v33 = vunpack.c.l.b16 %v1765_v24  ;;  %v1761_v38 = vpack.c.bf16 %v4657_v12, %v4657_v12 }
 0x33e   : > { %v1835_v39 = vpack.c.b16 %v1834_v16, %v1833_v15  ;;  %v1670_v16 = vand.u32 2147483648, %v4579_v36  ;;  %vm1669_vm9 = vcmp.eq.f32.partialorder %v1668_v17, 8.507059e+37 }
 0x340   : > { %v1396_v22 = vpop.f32.mrf.mxu3  ;;  %3716 = vmatmul.msk.bf16.vlgmr.msra.gmra.mxu0 %vm785_vm1, %v1835_v39 }
 0x341   : > { %v1750_v26 = vmul.f32 %v1630_v23, %v1396_v22  ;;  %v4595_v32 = vpop.eup %3958  ;;  %2041 = vmatpush.bf16.xpose.msra.mxu0 %v3846_v1 }
 0x342   : > { %v4591_v28 = vpop.xlane.xlu1 %1249  ;;  %v1163_v43 = vpop.xlane.xlu0 %1162  ;;  %v1660_v48 = vmul.f32 %v4595_v32, %v4579_v36  ;;  %vm1665_vm5 = vweird.f32 %v4595_v32  ;;  %v1671_v36 = vor.u32 1.1754944e-38, %v1670_v16 }
 0x343   : > { %v1766_v30 = vpack.c.bf16 %v1750_v26, %v1750_v26  ;;  %3960 = vrcp.f32 %v4591_v28  ;;  %v1181_v31 = vsub.f32 %v4487_v50, %v1163_v43  ;;  %v1682_v19 = vand.u32 2147483647, %v4591_v28  ;;  %vm4671_vm7 = vmor %vm1664_vm6, %vm1665_vm5 }
 0x344   : > { %v1661_v25 = vsub.f32 1.0, %v1660_v48  ;;  %v1684_v21 = vand.u32 2147483648, %v4591_v28  ;;  %vm1678_vm10 = vweird.f32 %v4591_v28 }
 0x345   : > { %v1862_v37 = vunpack.c.l.b16 %v1766_v30  ;;  %v1211_v40 = vmul.f32 1.442695, %v1181_v31  ;;  %vm4690_vm11 = vcmp.eq.f32.partialorder %v1682_v19, 8.507059e+37 }
 0x346   : > { %v1662_v52 = vmul.f32 %v4595_v32, %v1661_v25  ;;  %v1685_v46 = vor.u32 1.1754944e-38, %v1684_v21 }
 0x347   : > { %v1863_v42 = vpack.c.b16 %v1862_v37, %v1861_v33  ;;  %3962 = vpow2.f32 %v1211_v40 }
 0x348   : > { %3964 = vrcp.f32 %v4597_v41  ;;  %v1663_v14 = vadd.f32 %v4595_v32, %v1662_v52  ;;  %v4047_v52 = vld [vmem:[%s5191_s2 + $0x28] sm:$0xff] }
 0x349   : > { %v4605_v50 = vpop.eup %3960  ;;  %3721 = vmatmul.msk.bf16.vlgmr.msra.gmra.mxu2 %vm785_vm1, %v1863_v42 }
 0x34a   : > { %v4609_v47 = vpop.xlane.xlu1 %1252  ;;  %v4611_v51 = vpop.xlane.xlu0 %1255  ;;  %v1674_v56 = vmul.f32 %v4605_v50, %v4591_v28  ;;  %v1667_v23 = vsel %vm4671_vm7, %v4595_v32, %v1663_v14  ;;  %vm1679_vm8 = vweird.f32 %v4605_v50  ;;  %v1654_v32 = vand.u32 2147483647, %v4597_v41 }
 0x34b   : > { %3966 = vrcp.f32 %v4609_v47  ;;  %v1672_v45 = vsel %vm1669_vm9, %v1671_v36, %v1667_v23  ;;  %vm4704_vm12 = vmor %vm1678_vm10, %vm1679_vm8  ;;  %vm1692_vm13 = vweird.f32 %v4609_v47  ;;  %v1696_v49 = vand.u32 2147483647, %v4609_v47 }
 0x34c   : > { %3968 = vrcp.f32 %v4611_v51  ;;  %v1675_v0 = vsub.f32 1.0, %v1674_v56  ;;  %v1698_v34 = vand.u32 2147483648, %v4609_v47  ;;  %vm1706_vm3 = vweird.f32 %v4611_v51 }
 0x34d   : > { %v3963_v57 = vpop.eup %3962  ;;  %v1712_v18 = vand.u32 2147483648, %v4611_v51  ;;  %vm1697_vm9 = vcmp.eq.f32.partialorder %v1696_v49, 8.507059e+37 }
 0x34e   : > { %v1277_v59 = vpack.c.bf16 %v3963_v57, %v3963_v57  ;;  %v1257_v29 = vsel %vm1118_vm2, %v3963_v57, 0.0  ;;  %v4632_v60 = vpop.eup %3964  ;;  %v1676_v13 = vmul.f32 %v4605_v50, %v1675_v0 }
 0x34f   : > { %1258 = vadd.xlane.f32.xlu1 %v1257_v29  ;;  %v1646_v6 = vmul.f32 %v4632_v60, %v4597_v41  ;;  %v1713_v21 = vor.u32 1.1754944e-38, %v1712_v18 }
 0x350   : > { %v1491_v2 = vunpack.c.l.b16 %v1277_v59  ;;  %v4641_v3 = vpop.f32.mrf.mxu2  ;;  %v1677_v26 = vadd.f32 %v4605_v50, %v1676_v13  ;;  %v1710_v13 = vand.u32 2147483647, %v4611_v51 }
 0x351   : > { %v4643_v4 = vpop.eup %3966  ;;  %v1647_v20 = vsub.f32 1.0, %v1646_v6  ;;  %v1699_v6 = vor.u32 1.1754944e-38, %v1698_v34  ;;  %v4045_v34 = vld [vmem:[%s5191_s2 + $0x18] sm:$0xff] }
 0x352   : > { %v4646_v5 = vpop.eup %3968  ;;  %v1493_v8 = vpack.c.b16 %v1492_v62, %v1491_v2  ;;  %v1688_v9 = vmul.f32 %v4643_v4, %v4609_v47  ;;  %v4652_v10 = vpop.xlane.xlu1 %1225  ;;  %v1681_v53 = vsel %vm4704_vm12, %v4605_v50, %v1677_v26  ;;  %vm1693_vm14 = vweird.f32 %v4643_v4 }
 0x353   : > { %v4654_v11 = vpop.xlane.xlu0 %1240  ;;  %3970 = vrcp.f32 %v4652_v10  ;;  %v1702_v35 = vmul.f32 %v4646_v5, %v4611_v51  ;;  %v4697_v37 = vmul.f32 %v4632_v60, %v1647_v20  ;;  %v1572_v56 = vand.u32 2147483648, %v4652_v10  ;;  %vm4725_vm5 = vmor %vm1692_vm13, %vm1693_vm14 }
 0x354   : > { %v1689_v15 = vsub.f32 1.0, %v1688_v9  ;;  %3972 = vrcp.f32 %v4654_v11  ;;  %3701 = vmatmul.msk.bf16.vlgmr.msra.gmra.mxu3 %vm1118_vm2, %v1493_v8  ;;  %v1570_v59 = vand.u32 2147483647, %v4652_v10  ;;  %vm1566_vm4 = vweird.f32 %v4652_v10 }
 0x355   : > { %v1703_v31 = vsub.f32 1.0, %v1702_v35  ;;  %1908 = vmatpush.bf16.msra.mxu3 %v3839_v44  ;;  %v1686_v61 = vsel %vm4690_vm11, %v1685_v46, %v1681_v53  ;;  %v1573_v7 = vor.u32 1.1754944e-38, %v1572_v56  ;;  %vm1707_vm7 = vweird.f32 %v4646_v5 }
 0x356   : > { %v1690_v43 = vmul.f32 %v4643_v4, %v1689_v15  ;;  %vm1571_vm8 = vcmp.eq.f32.partialorder %v1570_v59, 8.507059e+37  ;;  %vm4742_vm11 = vmor %vm1706_vm3, %vm1707_vm7  ;;  %v1642_v19 = vand.u32 2147483648, %v4654_v11  ;;  %vm1636_vm12 = vweird.f32 %v4654_v11 }
 0x357   : > { %v1454_v22 = vpop.f32.mrf.mxu3  ;;  %v1704_v27 = vmul.f32 %v4646_v5, %v1703_v31  ;;  %v1805_v51 = vunpack.c.l.b16 %v1761_v38  ;;  %vm1651_vm14 = vweird.f32 %v4632_v60  ;;  %v1656_v44 = vand.u32 2147483648, %v4597_v41 }
 0x358   : > { %v4681_v24 = vpop.f32.mrf.mxu2  ;;  %v1753_v42 = vmul.f32 %v1672_v45, %v1454_v22  ;;  %v1691_v55 = vadd.f32 %v4643_v4, %v1690_v43  ;;  %v1643_v38 = vor.u32 1.1754944e-38, %v1642_v19 }
 0x359   : > { %v3971_v30 = vpop.eup %3970  ;;  %v1705_v47 = vadd.f32 %v4646_v5, %v1704_v27  ;;  %v1657_v46 = vor.u32 1.1754944e-38, %v1656_v44  ;;  %v4049_v44 = vld [vmem:[%s5191_s2 + $0x38] sm:$0xff] }
 0x35a   : > { %v4694_v33 = vpop.eup %3972  ;;  %v1562_v40 = vmul.f32 %v3971_v30, %v4652_v10  ;;  %vm1567_vm15 = vweird.f32 %v3971_v30  ;;  %v1769_v50 = vpack.c.bf16 %v1753_v42, %v1753_v42  ;;  %v1695_v1 = vsel %vm4725_vm5, %v4643_v4, %v1691_v55 }
 0x35b   : > { %v1632_v48 = vmul.f32 %v4694_v33, %v4654_v11  ;;  %vm1568_vm6 = vmor %vm1566_vm4, %vm1567_vm15  ;;  %vm1637_vm10 = vweird.f32 %v4694_v33  ;;  %v1700_v14 = vsel %vm1697_vm9, %v1699_v6, %v1695_v1  ;;  %v1709_v39 = vsel %vm4742_vm11, %v4646_v5, %v1705_v47  ;;  %v1262_v59 = vpop.xlane.xlu0 %1261 }
 0x35c   : > { %v1563_v25 = vsub.f32 1.0, %v1562_v40  ;;  %v1917_v16 = vunpack.c.l.b16 %v1769_v50  ;;  %vm4757_vm13 = vmor %vm1636_vm12, %vm1637_vm10  ;;  %vm1711_vm15 = vcmp.eq.f32.partialorder %v1710_v13, 8.507059e+37  ;;  %vm1650_vm4 = vweird.f32 %v4597_v41 }
 0x35d   : > { %v1633_v57 = vsub.f32 1.0, %v1632_v48  ;;  %v1714_v12 = vsel %vm1711_vm15, %v1713_v21, %v1709_v39  ;;  %vm1652_vm5 = vmor %vm1650_vm4, %vm1651_vm14  ;;  %3974 = vrcp.f32 %v1262_v59  ;;  %vm1734_vm9 = vweird.f32 %v1262_v59 }
 0x35e   : > { %v1564_v58 = vmul.f32 %v3971_v30, %v1563_v25 }
 0x35f   : > { %v1456_v29 = vpop.f32.mrf.mxu3  ;;  %v1634_v63 = vmul.f32 %v4694_v33, %v1633_v57 }
 0x360   : > { %v1565_v62 = vadd.f32 %v3971_v30, %v1564_v58  ;;  %v1754_v0 = vmul.f32 %v1686_v61, %v1456_v29  ;;  %v1484_v2 = vpop.f32.mrf.mxu2  ;;  %v4046_v58 = vld [vmem:[%s5191_s2 + $0x20] sm:$0xff]  ;;  %v3842_v29 = vld [vmem:[%s5193_s4 + $0x38] sm:$0xff] }
 0x361   : > { %v1635_v4 = vadd.f32 %v4694_v33, %v1634_v63  ;;  %v1755_v20 = vmul.f32 %v1700_v14, %v1484_v2  ;;  %v1740_v14 = vand.u32 2147483648, %v1262_v59 }
 0x362   : > { %v1569_v8 = vsel %vm1568_vm6, %v3971_v30, %v1565_v62  ;;  %v1770_v9 = vpack.c.bf16 %v1754_v0, %v1754_v0  ;;  %vm1655_vm6 = vcmp.eq.f32.partialorder %v1654_v32, 8.507059e+37 }
 0x363   : > { %v1574_v10 = vsel %vm1571_vm8, %v1573_v7, %v1569_v8  ;;  %v1639_v26 = vsel %vm4757_vm13, %v4694_v33, %v1635_v4  ;;  %v1771_v30 = vpack.c.bf16 %v1755_v20, %v1755_v20  ;;  %v3975_v61 = vpop.eup %3974  ;;  %v1741_v19 = vor.u32 1.1754944e-38, %v1740_v14 }
 0x364   : > { %v1746_v15 = vmul.f32 %v1574_v10, %v4571_v54  ;;  %v1918_v35 = vunpack.c.l.b16 %v1770_v9  ;;  %v1640_v54 = vand.u32 2147483647, %v4654_v11  ;;  %v1649_v11 = vadd.f32 %v4632_v60, %v4697_v37 }
 0x365   : > { %v1945_v48 = vunpack.c.l.b16 %v1771_v30  ;;  %v1730_v63 = vmul.f32 %v3975_v61, %v1262_v59  ;;  %vm1735_vm10 = vweird.f32 %v3975_v61  ;;  %v3847_v30 = vld [vmem:[%s4312_s13 + $0x10] sm:$0xff] }
 0x366   : > { %v1762_v22 = vpack.c.bf16 %v1746_v15, %v1746_v15  ;;  %v1919_v23 = vpack.c.b16 %v1918_v35, %v1917_v16  ;;  %vm1641_vm3 = vcmp.eq.f32.partialorder %v1640_v54, 8.507059e+37  ;;  %v1653_v37 = vsel %vm1652_vm5, %v4632_v60, %v1649_v11  ;;  %v4042_v60 = vld [vmem:[%s5191_s2] sm:$0xff]  ;;  %v4048_v15 = vld [vmem:[%s5191_s2 + $0x30] sm:$0xff]  ;;  %vm1736_vm12 = vmor %vm1734_vm9, %vm1735_vm10 }
 0x367   : > { %v1644_v45 = vsel %vm1641_vm3, %v1643_v38, %v1639_v26  ;;  %v1658_v49 = vsel %vm1655_vm6, %v1657_v46, %v1653_v37  ;;  %v1731_v2 = vsub.f32 1.0, %v1730_v63  ;;  %v1738_v16 = vand.u32 2147483647, %v1262_v59 }
 0x368   : > { %v1806_v5 = vunpack.c.l.b16 %v1762_v22  ;;  %v1486_v43 = vpop.f32.mrf.mxu2  ;;  %3731 = vmatmul.msk.bf16.vlgmr.msrb.gmra.mxu0 %vm785_vm1, %v1919_v23  ;;  %v1751_v28 = vmul.f32 %v1644_v45, %v4641_v3  ;;  %v1752_v41 = vmul.f32 %v1658_v49, %v4681_v24  ;;  %v4043_v3 = vld [vmem:[%s5191_s2 + $0x8] sm:$0xff]  ;;  %v4044_v24 = vld [vmem:[%s5191_s2 + $0x10] sm:$0xff]  ;;  %v2110_v32 = vsel %vm581_vm0, %v3847_v30, 0 }
 0x369   : > { %v1756_v31 = vmul.f32 %v1714_v12, %v1486_v43  ;;  %v1732_v6 = vmul.f32 %v3975_v61, %v1731_v2  ;;  %vm1739_vm14 = vcmp.eq.f32.partialorder %v1738_v16, 8.507059e+37 }
 0x36a   : > { %v1807_v40 = vpack.c.b16 %v1806_v5, %v1805_v51  ;;  %v1767_v53 = vpack.c.bf16 %v1751_v28, %v1751_v28  ;;  %v1768_v55 = vpack.c.bf16 %v1752_v41, %v1752_v41  ;;  %v3848_v5 = vld [vmem:[%s4312_s13 + $0x18] sm:$0xff]  ;;  %v4051_v28 = vld [vmem:[%s5192_s3 + $0x70] sm:$0xff] }
 0x36b   : > { %v1772_v33 = vpack.c.bf16 %v1756_v31, %v1756_v31  ;;  %v1733_v4 = vadd.f32 %v3975_v61, %v1732_v6  ;;  %v2113_v43 = vsel %vm581_vm0, %v3848_v5, 0  ;;  %v4057_v5 = vld [vmem:[%s5192_s3 + $0x28] sm:$0xff] }
 0x36c   : > { %3711 = vmatmul.msk.bf16.vlgmr.msrb.gmra.mxu3 %vm785_vm1, %v1807_v40  ;;  %v1889_v27 = vunpack.c.l.b16 %v1767_v53  ;;  %v1890_v56 = vunpack.c.l.b16 %v1768_v55  ;;  %2121 = vmatpush.bf16.xpose.msra.mxu2 %v2113_v43 }
 0x36d   : > { %v1946_v42 = vunpack.c.l.b16 %v1772_v33  ;;  %1992 = vmatpush.bf16.msrb.mxu3 %v3842_v29  ;;  %v1737_v39 = vsel %vm1736_vm12, %v3975_v61, %v1733_v4  ;;  %v4050_v33 = vld [vmem:[%s5192_s3] sm:$0xff] }
 0x36e   : > { %v1891_v57 = vpack.c.b16 %v1890_v56, %v1889_v27  ;;  %v1742_v54 = vsel %vm1739_vm14, %v1741_v19, %v1737_v39  ;;  %v4056_v19 = vld [vmem:[%s5192_s3 + $0x20] sm:$0xff] }
 0x36f   : > { %v1947_v25 = vpack.c.b16 %v1946_v42, %v1945_v48 }
 0x371   : > { %3736 = vmatmul.msk.bf16.vlgmr.msrb.gmra.mxu2 %vm785_vm1, %v1947_v25 }
 0x374   : > { %2122 = vmatpush.bf16.xpose.msra.mxu2 %v2110_v32 }
 0x378   : > { %2042 = vmatmul.bf16.vlgmr.msra.gmra.mxu0 %v4042_v60 }
 0x37c   : > { %3726 = vmatmul.msk.bf16.vlgmr.msra.gmra.mxu3 %vm785_vm1, %v1891_v57 }
 0x37d   : > { %3851 = vmatpush.bf16.xpose.msra.mxu3 %v2113_v43 }
 0x381   : > { %3760 = vmatmul.msk.bf16.vlgmr.msra.gmra.mxu2 %vm581_vm0, %v4050_v33 }
 0x385   : > { %3852 = vmatpush.bf16.xpose.msra.mxu3 %v2110_v32 }
 0x388   : > { %2047 = vmatmul.bf16.gmra.mxu0 %v4043_v3 }
 0x398   : > { %2052 = vmatmul.bf16.gmra.mxu0 %v4044_v24 }
 0x39d   : > { %v1798_v31 = vpop.f32.mrf.mxu2 }
 0x3a5   : > { %v4819_v37 = vpop.f32.mrf.mxu2 }
 0x3a8   : > { %2057 = vmatmul.bf16.gmra.mxu0 %v4045_v34 }
 0x3b8   : > { %2062 = vmatmul.bf16.gmra.mxu0 %v4046_v58  ;;  %v4052_v58 = vld [vmem:[%s5192_s3 + $0x8] sm:$0xff] }
 0x3b9   : > { %3761 = vmatmul.msk.bf16.gmra.mxu2 %vm581_vm0, %v4052_v58 }
 0x3bd   : > { %v1854_v7 = vpop.f32.mrf.mxu0 }
 0x3c2   : > { %v1259_v50 = vpop.xlane.xlu1 %1258 }
 0x3c3   : > { %3976 = vrcp.f32 %v1259_v50  ;;  %v1726_v8 = vand.u32 2147483648, %v1259_v50  ;;  %vm1720_vm8 = vweird.f32 %v1259_v50  ;;  %v1724_v9 = vand.u32 2147483647, %v1259_v50 }
 0x3c5   : > { %v1727_v35 = vor.u32 1.1754944e-38, %v1726_v8  ;;  %vm1725_vm13 = vcmp.eq.f32.partialorder %v1724_v9, 8.507059e+37  ;;  %v4803_v21 = vpop.f32.mrf.mxu0 }
 0x3c8   : > { %2067 = vmatmul.bf16.gmra.mxu0 %v4047_v52 }
 0x3c9   : > { %v3977_v18 = vpop.eup %3976 }
 0x3ca   : > { %v1716_v62 = vmul.f32 %v3977_v18, %v1259_v50  ;;  %vm1721_vm7 = vweird.f32 %v3977_v18  ;;  %v4053_v50 = vld [vmem:[%s5192_s3 + $0x78] sm:$0xff] }
 0x3cb   : > { %vm1722_vm11 = vmor %vm1720_vm8, %vm1721_vm7 }
 0x3cc   : > { %v1717_v0 = vsub.f32 1.0, %v1716_v62  ;;  %v1882_v41 = vpop.f32.mrf.mxu2 }
 0x3ce   : > { %v1718_v1 = vmul.f32 %v3977_v18, %v1717_v0  ;;  %v4054_v0 = vld [vmem:[%s5192_s3 + $0x10] sm:$0xff] }
 0x3cf   : > { %3762 = vmatmul.msk.bf16.gmra.mxu2 %vm581_vm0, %v4054_v0 }
 0x3d0   : > { %v1719_v47 = vadd.f32 %v3977_v18, %v1718_v1 }
 0x3d2   : > { %v1723_v13 = vsel %vm1722_vm11, %v3977_v18, %v1719_v47 }
 0x3d3   : > { %v1728_v17 = vsel %vm1725_vm13, %v1727_v35, %v1723_v13 }
 0x3d4   : > { %v1884_v33 = vpop.f32.mrf.mxu2 }
 0x3d7   : > { %v1514_v10 = vpop.f32.mrf.mxu3 }
 0x3d8   : > { %2072 = vmatmul.bf16.gmra.mxu0 %v4048_v15  ;;  %v1757_v20 = vmul.f32 %v1728_v17, %v1514_v10  ;;  %v4055_v10 = vld [vmem:[%s5192_s3 + $0x18] sm:$0xff] }
 0x3da   : > { %v1773_v23 = vpack.c.bf16 %v1757_v20, %v1757_v20 }
 0x3dc   : > { %v1973_v26 = vunpack.c.l.b16 %v1773_v23 }
 0x3df   : > { %v1516_v22 = vpop.f32.mrf.mxu3  ;;  %3763 = vmatmul.msk.bf16.gmra.mxu2 %vm581_vm0, %v4055_v10 }
 0x3e0   : > { %v1758_v51 = vmul.f32 %v1742_v54, %v1516_v22 }
 0x3e2   : > { %v1774_v36 = vpack.c.bf16 %v1758_v51, %v1758_v51 }
 0x3e4   : > { %v1974_v11 = vunpack.c.l.b16 %v1774_v36 }
 0x3e5   : > { %v1938_v12 = vpop.f32.mrf.mxu0 }
 0x3e6   : > { %v1975_v38 = vpack.c.b16 %v1974_v11, %v1973_v26 }
 0x3e8   : > { %3741 = vmatmul.msk.bf16.vlgmr.msrb.gmra.mxu3 %vm785_vm1, %v1975_v38  ;;  %2077 = vmatmul.bf16.gmra.mxu0 %v4049_v44 }
 0x3ed   : > { %v4813_v40 = vpop.f32.mrf.mxu0 }
 0x3ef   : > { %v1826_v45 = vpop.f32.mrf.mxu3  ;;  %3764 = vmatmul.msk.bf16.gmra.mxu2 %vm581_vm0, %v4056_v19 }
 0x3f0   : > { %v1999_v48 = vadd.f32 %v1826_v45, %v1798_v31  ;;  %v4058_v31 = vld [vmem:[%s5192_s3 + $0x30] sm:$0xff] }
 0x3f2   : > { %v2000_v49 = vadd.f32 %v1999_v48, %v1854_v7 }
 0x3f4   : > { %v2001_v27 = vadd.f32 %v2000_v49, %v1882_v41 }
 0x3f5   : > { %v2043_v46 = vpop.f32.mrf.mxu0 }
 0x3f6   : > { %v2083_v25 = vpack.c.bf16 %v2043_v46, %v2043_v46 }
 0x3f7   : > { %v4821_v42 = vpop.f32.mrf.mxu3 }
 0x3f8   : > { %3774 = vmatmul.msk.bf16.vlgmr.msra.gmra.mxu3 %vm581_vm0, %v4051_v28  ;;  %v2238_v60 = vunpack.c.l.b16 %v2083_v25  ;;  %v2006_v28 = vadd.f32 %v4821_v42, %v4819_v37  ;;  %v3913_v42 = vld [vmem:[%s5194_s5] ss:$0 sm:$0xff] }
 0x3fd   : > { %v2045_v53 = vpop.f32.mrf.mxu0 }
 0x3fe   : > { %v2084_v55 = vpack.c.bf16 %v2045_v53, %v2045_v53 }
 0x3ff   : > { %v1910_v56 = vpop.f32.mrf.mxu3  ;;  %3765 = vmatmul.msk.bf16.gmra.mxu2 %vm581_vm0, %v4057_v5 }
 0x400   : > { %v2239_v57 = vunpack.c.l.b16 %v2084_v55  ;;  %v2002_v3 = vadd.f32 %v2001_v27, %v1910_v56  ;;  %v2007_v55 = vadd.f32 %v2006_v28, %v4803_v21  ;;  %v4059_v27 = vld [vmem:[%s5192_s3 + $0x38] sm:$0xff]  ;;  %v1966_v56 = vpop.f32.mrf.mxu2 }
 0x402   : > { %v4827_v24 = vadd.f32 %v2002_v3, %v1938_v12  ;;  %v2240_v34 = vpack.c.b16 %v2239_v57, %v2238_v60  ;;  %v2008_v57 = vadd.f32 %v2007_v55, %v1884_v33 }
 0x404   : > { %2242 = vxpose.xlu2.c.b16.start.end [1/1] (short) (narrow) %v2240_v34, 16  ;;  %v2004_v37 = vadd.f32 %v4827_v24, %v1966_v56 }
 0x405   : > { %v2048_v59 = vpop.f32.mrf.mxu0 }
 0x406   : > { %v2085_v29 = vpack.c.bf16 %v2048_v59, %v2048_v59 }
 0x407   : > { %v1912_v53 = vpop.f32.mrf.mxu3 }
 0x408   : > { %3775 = vmatmul.msk.bf16.gmra.mxu3 %vm581_vm0, %v4053_v50  ;;  %v2283_v18 = vunpack.c.l.b16 %v2085_v29  ;;  %v2009_v3 = vadd.f32 %v2008_v57, %v1912_v53 }
 0x40a   : > { %v2010_v50 = vadd.f32 %v2009_v3, %v4813_v40 }
 0x40d   : > { %v2050_v61 = vpop.f32.mrf.mxu0 }
 0x40e   : > { %v2086_v52 = vpack.c.bf16 %v2050_v61, %v2050_v61 }
 0x40f   : > { %3766 = vmatmul.msk.bf16.gmra.mxu2 %vm581_vm0, %v4058_v31 }
 0x410   : > { %v2284_v62 = vunpack.c.l.b16 %v2086_v52  ;;  %v1968_v52 = vpop.f32.mrf.mxu2 }
 0x412   : > { %v2285_v63 = vpack.c.b16 %v2284_v62, %v2283_v18  ;;  %v2011_v62 = vadd.f32 %v2010_v50, %v1968_v52 }
 0x414   : > { %2287 = vxpose.xlu1.c.b16.start.end [1/1] (short) (narrow) %v2285_v63, 16 }
 0x415   : > { %v2053_v2 = vpop.f32.mrf.mxu0 }
 0x416   : > { %v2087_v1 = vpack.c.bf16 %v2053_v2, %v2053_v2 }
 0x418   : > { %v2328_v47 = vunpack.c.l.b16 %v2087_v1  ;;  %v4060_v1 = vld [vmem:[%s5192_s3 + $0x40] sm:$0xff] }
 0x41d   : > { %v2055_v7 = vpop.f32.mrf.mxu0 }
 0x41e   : > { %v2088_v6 = vpack.c.bf16 %v2055_v7, %v2055_v7  ;;  %v2124_v7 = vpop.f32.mrf.mxu2 }
 0x41f   : > { %3767 = vmatmul.msk.bf16.gmra.mxu2 %vm581_vm0, %v4059_v27 }
 0x420   : > { %v2329_v8 = vunpack.c.l.b16 %v2088_v6  ;;  %v2204_v6 = vpack.c.bf16 %v2124_v7, %v2124_v7 }
 0x422   : > { %v2330_v9 = vpack.c.b16 %v2329_v8, %v2328_v47  ;;  %v2260_v8 = vunpack.c.l.b16 %v2204_v6 }
 0x424   : > { %2332 = vxpose.xlu0.c.b16.start.end [1/1] (short) (narrow) %v2330_v9, 16 }
 0x425   : > { %v2058_v14 = vpop.f32.mrf.mxu0 }
 0x426   : > { %v2089_v13 = vpack.c.bf16 %v2058_v14, %v2058_v14  ;;  %v2126_v47 = vpop.f32.mrf.mxu2 }
 0x427   : > { %v2205_v9 = vpack.c.bf16 %v2126_v47, %v2126_v47 }
 0x428   : > { %v2373_v16 = vunpack.c.l.b16 %v2089_v13  ;;  %v4061_v13 = vld [vmem:[%s5192_s3 + $0x48] sm:$0xff] }
 0x429   : > { %v2261_v10 = vunpack.c.l.b16 %v2205_v9 }
 0x42b   : > { %v2262_v14 = vpack.c.b16 %v2261_v10, %v2260_v8 }
 0x42d   : > { %v2060_v15 = vpop.f32.mrf.mxu0  ;;  %2274 = vmatpush.bf16.msrb.mxu3 %v2262_v14 }
 0x42e   : > { %v2090_v4 = vpack.c.bf16 %v2060_v15, %v2060_v15 }
 0x42f   : > { %3768 = vmatmul.msk.bf16.gmra.mxu2 %vm581_vm0, %v4060_v1 }
 0x430   : > { %v2374_v35 = vunpack.c.l.b16 %v2090_v4 }
 0x432   : > { %v2375_v17 = vpack.c.b16 %v2374_v35, %v2373_v16 }
 0x434   : > { %2377 = vxpose.xlu2.c.b16.start.end [1/1] (short) (narrow) %v2375_v17, 16 }
 0x435   : > { %v2063_v20 = vpop.f32.mrf.mxu0 }
 0x436   : > { %v2091_v39 = vpack.c.bf16 %v2063_v20, %v2063_v20 }
 0x438   : > { %v2418_v23 = vunpack.c.l.b16 %v2091_v39  ;;  %v4062_v39 = vld [vmem:[%s5192_s3 + $0x50] sm:$0xff] }
 0x43c   : > { %v2129_v15 = vpop.f32.mrf.mxu2 }
 0x43d   : > { %v2065_v22 = vpop.f32.mrf.mxu0  ;;  %v2206_v4 = vpack.c.bf16 %v2129_v15, %v2129_v15 }
 0x43e   : > { %v2092_v54 = vpack.c.bf16 %v2065_v22, %v2065_v22 }
 0x43f   : > { %3769 = vmatmul.msk.bf16.gmra.mxu2 %vm581_vm0, %v4061_v13  ;;  %v2305_v35 = vunpack.c.l.b16 %v2206_v4 }
 0x440   : > { %v2419_v51 = vunpack.c.l.b16 %v2092_v54 }
 0x442   : > { %v2420_v36 = vpack.c.b16 %v2419_v51, %v2418_v23 }
 0x444   : > { %2422 = vxpose.xlu0.c.b16.start.end [1/1] (short) (narrow) %v2420_v36, 16  ;;  %v2131_v16 = vpop.f32.mrf.mxu2 }
 0x445   : > { %v2068_v26 = vpop.f32.mrf.mxu0  ;;  %v2207_v17 = vpack.c.bf16 %v2131_v16, %v2131_v16 }
 0x446   : > { %v2093_v11 = vpack.c.bf16 %v2068_v26, %v2068_v26  ;;  %v4063_v26 = vld [vmem:[%s5192_s3 + $0x58] sm:$0xff] }
 0x447   : > { %v2306_v19 = vunpack.c.l.b16 %v2207_v17 }
 0x448   : > { %v2463_v38 = vunpack.c.l.b16 %v2093_v11 }
 0x449   : > { %v2307_v20 = vpack.c.b16 %v2306_v19, %v2305_v35 }
 0x44b   : > { %2319 = vmatpush.bf16.msra.mxu3 %v2307_v20 }
 0x44d   : > { %v2070_v43 = vpop.f32.mrf.mxu0 }
 0x44e   : > { %v2094_v12 = vpack.c.bf16 %v2070_v43, %v2070_v43 }
 0x44f   : > { %3770 = vmatmul.msk.bf16.gmra.mxu2 %vm581_vm0, %v4062_v39 }
 0x450   : > { %v2464_v44 = vunpack.c.l.b16 %v2094_v12 }
 0x452   : > { %v2465_v30 = vpack.c.b16 %v2464_v44, %v2463_v38  ;;  %v2134_v22 = vpop.f32.mrf.mxu2  ;;  %v4064_v44 = vld [vmem:[%s5192_s3 + $0x60] sm:$0xff] }
 0x453   : > { %v2208_v54 = vpack.c.bf16 %v2134_v22, %v2134_v22 }
 0x454   : > { %2467 = vxpose.xlu2.c.b16.start.end [1/1] (short) (narrow) %v2465_v30, 16 }
 0x455   : > { %v2073_v32 = vpop.f32.mrf.mxu0  ;;  %v2350_v51 = vunpack.c.l.b16 %v2208_v54 }
 0x456   : > { %v2095_v45 = vpack.c.bf16 %v2073_v32, %v2073_v32 }
 0x458   : > { %v2508_v49 = vunpack.c.l.b16 %v2095_v45 }
 0x45a   : > { %v2136_v23 = vpop.f32.mrf.mxu2 }
 0x45b   : > { %v2209_v36 = vpack.c.bf16 %v2136_v23, %v2136_v23 }
 0x45d   : > { %v2075_v46 = vpop.f32.mrf.mxu0  ;;  %v2351_v5 = vunpack.c.l.b16 %v2209_v36 }
 0x45e   : > { %v2096_v48 = vpack.c.bf16 %v2075_v46, %v2075_v46 }
 0x45f   : > { %3771 = vmatmul.msk.bf16.gmra.mxu2 %vm581_vm0, %v4063_v26  ;;  %v2352_v43 = vpack.c.b16 %v2351_v5, %v2350_v51 }
 0x460   : > { %v2509_v25 = vunpack.c.l.b16 %v2096_v48 }
 0x462   : > { %v2510_v41 = vpack.c.b16 %v2509_v25, %v2508_v49  ;;  %v2139_v12 = vpop.f32.mrf.mxu2  ;;  %v4065_v49 = vld [vmem:[%s5192_s3 + $0x68] sm:$0xff] }
 0x463   : > { %v2210_v30 = vpack.c.bf16 %v2139_v12, %v2139_v12 }
 0x464   : > { %2512 = vxpose.xlu1.c.b16.start.end [1/1] (short) (narrow) %v2510_v41, 16 }
 0x465   : > { %v2078_v60 = vpop.f32.mrf.mxu0  ;;  %v2395_v45 = vunpack.c.l.b16 %v2210_v30 }
 0x466   : > { %v2097_v21 = vpack.c.bf16 %v2078_v60, %v2078_v60 }
 0x468   : > { %v2553_v18 = vunpack.c.l.b16 %v2097_v21 }
 0x46a   : > { %v2141_v38 = vpop.f32.mrf.mxu2 }
 0x46b   : > { %v1994_v34 = vpop.f32.mrf.mxu3  ;;  %v2211_v31 = vpack.c.bf16 %v2141_v38, %v2141_v38 }
 0x46c   : > { %v2005_v58 = vadd.f32 %v2004_v37, %v1994_v34 }
 0x46d   : > { %v2080_v59 = vpop.f32.mrf.mxu0  ;;  %v2396_v33 = vunpack.c.l.b16 %v2211_v31 }
 0x46e   : > { %v2016_v29 = vadd.f32 %v3913_v42, %v2005_v58  ;;  %v2098_v61 = vpack.c.bf16 %v2080_v59, %v2080_v59 }
 0x46f   : > { %3772 = vmatmul.msk.bf16.gmra.mxu2 %vm581_vm0, %v4064_v44  ;;  %v2397_v46 = vpack.c.b16 %v2396_v33, %v2395_v45 }
 0x470   : > { %2018 = vst [vmem:[%s4870_s7] sm:$0xff] %v2016_v29  ;;  %v2554_v24 = vunpack.c.l.b16 %v2098_v61 }
 0x472   : > { %v2555_v63 = vpack.c.b16 %v2554_v24, %v2553_v18  ;;  %v2144_v32 = vpop.f32.mrf.mxu2 }
 0x473   : > { %v1996_v0 = vpop.f32.mrf.mxu3  ;;  %v2212_v25 = vpack.c.bf16 %v2144_v32, %v2144_v32 }
 0x474   : > { %v2012_v2 = vadd.f32 %v2011_v62, %v1996_v0  ;;  %2557 = vxpose.xlu0.c.b16.start.end [1/1] (short) (narrow) %v2555_v63, 16 }
 0x475   : > { %v2440_v55 = vunpack.c.l.b16 %v2212_v25 }
 0x476   : > { %v2017_v40 = vadd.f32 %v3913_v42, %v2012_v2 }
 0x478   : > { %2019 = vst [vmem:[%s4870_s7 + $0x8] sm:$0xff] %v2017_v40 }
 0x47a   : > { %v2146_v28 = vpop.f32.mrf.mxu2 }
 0x47b   : > { %v2213_v41 = vpack.c.bf16 %v2146_v28, %v2146_v28  ;;  %v4904_v8 = vpop.f32.mrf.mxu3 }
 0x47d   : > { %v2441_v27 = vunpack.c.l.b16 %v2213_v41 }
 0x47f   : > { %3773 = vmatmul.msk.bf16.gmra.mxu2 %vm581_vm0, %v4065_v49  ;;  %v2442_v56 = vpack.c.b16 %v2441_v27, %v2440_v55 }
 0x482   : > { %v2149_v53 = vpop.f32.mrf.mxu2 }
 0x483   : > { %v2214_v3 = vpack.c.bf16 %v2149_v53, %v2149_v53  ;;  %v4906_v9 = vpop.f32.mrf.mxu3 }
 0x485   : > { %v2485_v34 = vunpack.c.l.b16 %v2214_v3 }
 0x48a   : > { %v2151_v57 = vpop.f32.mrf.mxu2 }
 0x48b   : > { %v2215_v37 = vpack.c.bf16 %v2151_v57, %v2151_v57  ;;  %v4909_v14 = vpop.f32.mrf.mxu3 }
 0x48d   : > { %v2486_v21 = vunpack.c.l.b16 %v2215_v37 }
 0x48f   : > { %v2487_v59 = vpack.c.b16 %v2486_v21, %v2485_v34 }
 0x492   : > { %v2154_v42 = vpop.f32.mrf.mxu2 }
 0x493   : > { %v2216_v50 = vpack.c.bf16 %v2154_v42, %v2154_v42  ;;  %v4911_v13 = vpop.f32.mrf.mxu3 }
 0x495   : > { %v2530_v61 = vunpack.c.l.b16 %v2216_v50 }
 0x49a   : > { %v2156_v29 = vpop.f32.mrf.mxu2 }
 0x49b   : > { %v2217_v52 = vpack.c.bf16 %v2156_v29, %v2156_v29 }
 0x49d   : > { %v2531_v18 = vunpack.c.l.b16 %v2217_v52 }
 0x49f   : > { %v2532_v24 = vpack.c.b16 %v2531_v18, %v2530_v61 }
 0x4a1   : > { %2544 = vmatpush.bf16.msra.mxu1 %v2532_v24 }
 0x4a2   : > { %v2159_v62 = vpop.f32.mrf.mxu2 }
 0x4a3   : > { %v2218_v63 = vpack.c.bf16 %v2159_v62, %v2159_v62 }
 0x4a5   : > { %v2250_v11 = vpop.trf.xlu2  ;;  %v2575_v1 = vunpack.c.l.b16 %v2218_v63 }
 0x4a6   : > { %3776 = vmatmul.msk.bf16.vlgmr.msrb.gmra.mxu3 %vm785_vm1, %v2250_v11 }
 0x4a7   : > { %2364 = vmatpush.bf16.msrb.mxu3 %v2352_v43 }
 0x4aa   : > { %v2161_v2 = vpop.f32.mrf.mxu2 }
 0x4ab   : > { %v2219_v40 = vpack.c.bf16 %v2161_v2, %v2161_v2 }
 0x4ad   : > { %v2576_v7 = vunpack.c.l.b16 %v2219_v40 }
 0x4af   : > { %v2577_v6 = vpack.c.b16 %v2576_v7, %v2575_v1 }
 0x4b2   : > { %v2164_v51 = vpop.f32.mrf.mxu2 }
 0x4ba   : > { %v2166_v26 = vpop.f32.mrf.mxu2 }
 0x4bb   : > { %v2221_v28 = vpack.c.bf16 %v2166_v26, %v2166_v26 }
 0x4bd   : > { %v2764_v41 = vunpack.c.l.b16 %v2221_v28 }
 0x4c0   : > { %v2295_v48 = vpop.trf.xlu1 }
 0x4c1   : > { %3777 = vmatmul.msk.bf16.vlgmr.msra.gmra.mxu3 %vm785_vm1, %v2295_v48  ;;  %v2220_v48 = vpack.c.bf16 %v2164_v51, %v2164_v51 }
 0x4c2   : > { %2409 = vmatpush.bf16.msra.mxu3 %v2397_v46  ;;  %v2169_v12 = vpop.f32.mrf.mxu2 }
 0x4c3   : > { %v2763_v25 = vunpack.c.l.b16 %v2220_v48 }
 0x4c5   : > { %v2765_v27 = vpack.c.b16 %v2764_v41, %v2763_v25 }
 0x4c7   : > { %v2770_v37 = vsel %vm1118_vm2, %v2765_v27, 0 }
 0x4c8   : > { %2779 = vmatpush.bf16.xpose.msrb.mxu1 %v2770_v37 }
 0x4ca   : > { %v2171_v44 = vpop.f32.mrf.mxu2 }
 0x4d0   : > { %v2340_v60 = vpop.trf.xlu0 }
 0x4d1   : > { %3778 = vmatmul.msk.bf16.vlgmr.msrb.gmra.mxu3 %vm785_vm1, %v2340_v60  ;;  %v2223_v60 = vpack.c.bf16 %v2171_v44, %v2171_v44 }
 0x4d2   : > { %2454 = vmatpush.bf16.msrb.mxu3 %v2442_v56  ;;  %v2174_v32 = vpop.f32.mrf.mxu2  ;;  %v2222_v56 = vpack.c.bf16 %v2169_v12, %v2169_v12 }
 0x4d3   : > { %v2794_v21 = vunpack.c.l.b16 %v2223_v60 }
 0x4d4   : > { %v2793_v34 = vunpack.c.l.b16 %v2222_v56 }
 0x4d5   : > { %v2385_v58 = vpop.trf.xlu2 }
 0x4da   : > { %v2176_v49 = vpop.f32.mrf.mxu2 }
 0x4e1   : > { %3779 = vmatmul.msk.bf16.vlgmr.msra.gmra.mxu3 %vm785_vm1, %v2385_v58 }
 0x4e2   : > { %2499 = vmatpush.bf16.msra.mxu3 %v2487_v59  ;;  %v2179_v57 = vpop.f32.mrf.mxu2  ;;  %v2795_v59 = vpack.c.b16 %v2794_v21, %v2793_v34 }
 0x4e3   : > { %v2226_v61 = vpack.c.bf16 %v2179_v57, %v2179_v57 }
 0x4e4   : > { %v2800_v62 = vsel %vm1118_vm2, %v2795_v59, 0 }
 0x4e5   : > { %v2853_v18 = vunpack.c.l.b16 %v2226_v61 }
 0x4ea   : > { %v2181_v29 = vpop.f32.mrf.mxu2 }
 0x4eb   : > { %v2227_v52 = vpack.c.bf16 %v2181_v29, %v2181_v29 }
 0x4ed   : > { %v2854_v24 = vunpack.c.l.b16 %v2227_v52 }
 0x4ef   : > { %v2855_v63 = vpack.c.b16 %v2854_v24, %v2853_v18 }
 0x4f0   : > { %v2430_v0 = vpop.trf.xlu0 }
 0x4f1   : > { %3780 = vmatmul.msk.bf16.vlgmr.msrb.gmra.mxu3 %vm785_vm1, %v2430_v0  ;;  %v2860_v0 = vsel %vm1118_vm2, %v2855_v63, 0  ;;  %v2234_v63 = vpack.c.bf16 %v4909_v14, %v4909_v14 }
 0x4f2   : > { %2589 = vmatpush.bf16.msrb.mxu3 %v2577_v6  ;;  %v2224_v6 = vpack.c.bf16 %v2174_v32, %v2174_v32 }
 0x4f5   : > { %v2475_v47 = vpop.trf.xlu2 }
 0x501   : > { %3781 = vmatmul.msk.bf16.vlgmr.msra.gmra.mxu3 %vm785_vm1, %v2475_v47  ;;  %v2225_v47 = vpack.c.bf16 %v2176_v49, %v2176_v49 }
 0x502   : > { %2809 = vmatpush.bf16.xpose.msra.mxu3 %v2800_v62 }
 0x510   : > { %v2520_v10 = vpop.trf.xlu1 }
 0x511   : > { %3782 = vmatmul.msk.bf16.vlgmr.msra.gmra.mxu1 %vm785_vm1, %v2520_v10 }
 0x512   : > { %2869 = vmatpush.bf16.xpose.msra.mxu1 %v2860_v0  ;;  %v2235_v0 = vpack.c.bf16 %v4911_v13, %v4911_v13 }
 0x520   : > { %v2565_v15 = vpop.trf.xlu0 }
 0x521   : > { %3783 = vmatmul.msk.bf16.vlgmr.msrb.gmra.mxu3 %vm785_vm1, %v2565_v15 }
 0x529   : > { %v4914_v4 = vpop.f32.mrf.mxu3 }
 0x52a   : > { %v2596_v16 = vsel %vm1118_vm2, %v4914_v4, -inf }
 0x52b   : > { %2597 = vmax.xlane.f32.xlu1 %v2596_v16  ;;  %v2184_v16 = vpop.f32.mrf.mxu2 }
 0x52c   : > { %v2228_v32 = vpack.c.bf16 %v2184_v16, %v2184_v16 }
 0x531   : > { %v4918_v35 = vpop.f32.mrf.mxu3 }
 0x532   : > { %v2599_v17 = vsel %vm1118_vm2, %v4918_v35, -inf }
 0x533   : > { %2600 = vmax.xlane.f32.xlu1 %v2599_v17 }
 0x544   : > { %v4922_v19 = vpop.f32.mrf.mxu3 }
 0x545   : > { %v2602_v20 = vsel %vm1118_vm2, %v4922_v19, -inf }
 0x546   : > { %2603 = vmax.xlane.f32.xlu2 %v2602_v20  ;;  %v2823_v20 = vunpack.c.l.b16 %v2224_v6 }
 0x54c   : > { %v4926_v39 = vpop.f32.mrf.mxu3 }
 0x54d   : > { %v2605_v22 = vsel %vm1118_vm2, %v4926_v39, -inf }
 0x54e   : > { %2606 = vmax.xlane.f32.xlu0 %v2605_v22  ;;  %v2824_v22 = vunpack.c.l.b16 %v2225_v47 }
 0x550   : > { %v2825_v12 = vpack.c.b16 %v2824_v22, %v2823_v20 }
 0x552   : > { %v2830_v49 = vsel %vm1118_vm2, %v2825_v12, 0 }
 0x553   : > { %2839 = vmatpush.bf16.xpose.msrb.mxu0 %v2830_v49 }
 0x554   : > { %v4930_v54 = vpop.f32.mrf.mxu3 }
 0x555   : > { %v2608_v23 = vsel %vm1118_vm2, %v4930_v54, -inf }
 0x556   : > { %2609 = vmax.xlane.f32.xlu1 %v2608_v23 }
 0x55c   : > { %v4934_v36 = vpop.f32.mrf.mxu3 }
 0x55d   : > { %v2611_v5 = vsel %vm1118_vm2, %v4934_v36, -inf }
 0x55e   : > { %2612 = vmax.xlane.f32.xlu2 %v2611_v5  ;;  %v2233_v5 = vpack.c.bf16 %v4906_v9, %v4906_v9  ;;  %v2883_v9 = vunpack.c.l.b16 %v2228_v32 }
 0x564   : > { %v4938_v11 = vpop.f32.mrf.mxu3 }
 0x565   : > { %v2614_v43 = vsel %vm1118_vm2, %v4938_v11, -inf }
 0x566   : > { %2615 = vmax.xlane.f32.xlu2 %v2614_v43 }
 0x56c   : > { %v4942_v38 = vpop.f32.mrf.mxu3 }
 0x56d   : > { %v2617_v33 = vsel %vm1118_vm2, %v4942_v38, -inf }
 0x574   : > { %v4944_v30 = vpop.f32.mrf.mxu3 }
 0x575   : > { %v2620_v31 = vsel %vm1118_vm2, %v4944_v30, -inf }
 0x576   : > { %2621 = vmax.xlane.f32.xlu1 %v2620_v31  ;;  %v2186_v31 = vpop.f32.mrf.mxu2 }
 0x57c   : > { %v4948_v45 = vpop.f32.mrf.mxu3 }
 0x57d   : > { %v2623_v46 = vsel %vm1118_vm2, %v4948_v45, -inf }
 0x57e   : > { %2618 = vmax.xlane.f32.xlu1 %v2617_v33  ;;  %2624 = vmax.xlane.f32.xlu0 %v2623_v46  ;;  %v2229_v33 = vpack.c.bf16 %v2186_v31, %v2186_v31 }
 0x580   : > { %v2884_v25 = vunpack.c.l.b16 %v2229_v33 }
 0x582   : > { %v2885_v27 = vpack.c.b16 %v2884_v25, %v2883_v9 }
 0x584   : > { %v4954_v53 = vpop.f32.mrf.mxu3 }
 0x585   : > { %v2626_v55 = vsel %vm1118_vm2, %v4954_v53, -inf }
 0x586   : > { %2627 = vmax.xlane.f32.xlu0 %v2626_v55 }
 0x58c   : > { %v4958_v3 = vpop.f32.mrf.mxu3 }
 0x58d   : > { %v2629_v42 = vsel %vm1118_vm2, %v4958_v3, -inf }
 0x58e   : > { %2630 = vmax.xlane.f32.xlu2 %v2629_v42  ;;  %v4963_v58 = vpop.f32.mrf.mxu1  ;;  %v2890_v42 = vsel %vm1118_vm2, %v2885_v27, 0 }
 0x58f   : > { %v2632_v50 = vsel %vm1118_vm2, %v4963_v58, -inf  ;;  %2899 = vmatpush.bf16.xpose.msrb.mxu3 %v2890_v42 }
 0x596   : > { %2633 = vmax.xlane.f32.xlu2 %v2632_v50  ;;  %v4975_v51 = vpop.f32.mrf.mxu1 }
 0x597   : > { %v2635_v44 = vsel %vm1118_vm2, %v4975_v51, -inf }
 0x59e   : > { %v2598_v2 = vpop.xlane.xlu1 %2597 }
 0x59f   : > { %v2644_v1 = vsub.f32 %v4914_v4, %v2598_v2  ;;  %v2232_v4 = vpack.c.bf16 %v4904_v8, %v4904_v8  ;;  %v2944_v8 = vunpack.c.l.b16 %v2233_v5 }
 0x5a1   : > { %v2660_v40 = vmul.f32 1.442695, %v2644_v1  ;;  %v2943_v46 = vunpack.c.l.b16 %v2232_v4  ;;  %v2973_v1 = vunpack.c.l.b16 %v2234_v63 }
 0x5a3   : > { %3978 = vpow2.f32 %v2660_v40  ;;  %v2945_v56 = vpack.c.b16 %v2944_v8, %v2943_v46  ;;  %v2974_v40 = vunpack.c.l.b16 %v2235_v0  ;;  %v2189_v8 = vpop.f32.mrf.mxu2 }
 0x5a4   : > { %v4970_v7 = vpop.f32.mrf.mxu3  ;;  %v2230_v49 = vpack.c.bf16 %v2189_v8, %v2189_v8 }
 0x5a5   : > { %v2638_v10 = vsel %vm1118_vm2, %v4970_v7, -inf  ;;  %v2950_v21 = vsel %vm1118_vm2, %v2945_v56, 0  ;;  %v2975_v16 = vpack.c.b16 %v2974_v40, %v2973_v1 }
 0x5a6   : > { %v2601_v15 = vpop.xlane.xlu1 %2600  ;;  %2639 = vmax.xlane.f32.xlu1 %v2638_v10 }
 0x5a7   : > { %v2645_v17 = vsub.f32 %v4918_v35, %v2601_v15 }
 0x5a9   : > { %v2662_v23 = vmul.f32 1.442695, %v2645_v17  ;;  %v3979_v43 = vpop.eup %3978 }
 0x5aa   : > { %v2740_v48 = vpack.c.bf16 %v3979_v43, %v3979_v43  ;;  %v2692_v37 = vsel %vm1118_vm2, %v3979_v43, 0.0 }
 0x5ab   : > { %3980 = vpow2.f32 %v2662_v23 }
 0x5ac   : > { %v4981_v26 = vpop.f32.mrf.mxu3  ;;  %v2758_v60 = vunpack.c.l.b16 %v2740_v48 }
 0x5ad   : > { %v2641_v35 = vsel %vm1118_vm2, %v4981_v26, -inf }
 0x5ae   : > { %2636 = vmax.xlane.f32.xlu1 %v2635_v44  ;;  %2642 = vmax.xlane.f32.xlu0 %v2641_v35 }
 0x5b1   : > { %v3981_v28 = vpop.eup %3980 }
 0x5b2   : > { %v2741_v41 = vpack.c.bf16 %v3981_v28, %v3981_v28  ;;  %v2695_v55 = vsel %vm1118_vm2, %v3981_v28, 0.0 }
 0x5b3   : > { %2696 = vadd.xlane.f32.xlu2 %v2695_v55 }
 0x5b4   : > { %v2759_v57 = vunpack.c.l.b16 %v2741_v41  ;;  %v2913_v41 = vunpack.c.l.b16 %v2230_v49 }
 0x5b6   : > { %v2760_v34 = vpack.c.b16 %v2759_v57, %v2758_v60  ;;  %2693 = vadd.xlane.f32.xlu0 %v2692_v37 }
 0x5b8   : > { %3784 = vmatmul.msk.bf16.vlgmr.msrb.gmra.mxu1 %vm1118_vm2, %v2760_v34 }
 0x5b9   : > { %2959 = vmatpush.bf16.xpose.msrb.mxu1 %v2950_v21  ;;  %v2604_v59 = vpop.xlane.xlu2 %2603  ;;  %v4066_v21 = vld [vmem:[%s5193_s4] sm:$0xff] }
 0x5ba   : > { %v2646_v50 = vsub.f32 %v4922_v19, %v2604_v59 }
 0x5bc   : > { %v2664_v29 = vmul.f32 1.442695, %v2646_v50 }
 0x5be   : > { %3982 = vpow2.f32 %v2664_v29 }
 0x5c1   : > { %v2607_v61 = vpop.xlane.xlu0 %2606 }
 0x5c2   : > { %v2647_v52 = vsub.f32 %v4926_v39, %v2607_v61 }
 0x5c4   : > { %v3983_v18 = vpop.eup %3982  ;;  %v2666_v24 = vmul.f32 1.442695, %v2647_v52 }
 0x5c5   : > { %v2698_v62 = vsel %vm1118_vm2, %v3983_v18, 0.0  ;;  %v2742_v6 = vpack.c.bf16 %v3983_v18, %v3983_v18 }
 0x5c6   : > { %3984 = vpow2.f32 %v2666_v24  ;;  %2699 = vadd.xlane.f32.xlu1 %v2698_v62 }
 0x5c7   : > { %v2788_v17 = vunpack.c.l.b16 %v2742_v6 }
 0x5c9   : > { %v2610_v2 = vpop.xlane.xlu1 %2609 }
 0x5ca   : > { %v2648_v19 = vsub.f32 %v4930_v54, %v2610_v2  ;;  %v2980_v54 = vsel %vm1118_vm2, %v2975_v16, 0 }
 0x5cc   : > { %v3985_v47 = vpop.eup %3984  ;;  %v2668_v39 = vmul.f32 1.442695, %v2648_v19 }
 0x5cd   : > { %v2743_v10 = vpack.c.bf16 %v3985_v47, %v3985_v47  ;;  %v2701_v15 = vsel %vm1118_vm2, %v3985_v47, 0.0 }
 0x5ce   : > { %3986 = vpow2.f32 %v2668_v39  ;;  %2702 = vadd.xlane.f32.xlu0 %v2701_v15 }
 0x5cf   : > { %v2789_v20 = vunpack.c.l.b16 %v2743_v10 }
 0x5d1   : > { %v2790_v14 = vpack.c.b16 %v2789_v20, %v2788_v17  ;;  %v2613_v22 = vpop.xlane.xlu2 %2612 }
 0x5d2   : > { %v2649_v13 = vsub.f32 %v4934_v36, %v2613_v22  ;;  %v4067_v22 = vld [vmem:[%s5193_s4 + $0x8] sm:$0xff] }
 0x5d3   : > { %3785 = vmatmul.msk.bf16.vlgmr.msra.gmra.mxu3 %vm1118_vm2, %v2790_v14 }
 0x5d4   : > { %v3987_v23 = vpop.eup %3986  ;;  %v2670_v4 = vmul.f32 1.442695, %v2649_v13  ;;  %2989 = vmatpush.bf16.xpose.msra.mxu3 %v2980_v54  ;;  %v4068_v54 = vld [vmem:[%s5193_s4 + $0x10] sm:$0xff] }
 0x5d5   : > { %v2704_v5 = vsel %vm1118_vm2, %v3987_v23, 0.0  ;;  %v2744_v44 = vpack.c.bf16 %v3987_v23, %v3987_v23 }
 0x5d6   : > { %3988 = vpow2.f32 %v2670_v4  ;;  %2705 = vadd.xlane.f32.xlu2 %v2704_v5 }
 0x5d7   : > { %v2818_v33 = vunpack.c.l.b16 %v2744_v44 }
 0x5d9   : > { %v2616_v43 = vpop.xlane.xlu2 %2615 }
 0x5da   : > { %v2650_v12 = vsub.f32 %v4938_v11, %v2616_v43  ;;  %v2191_v11 = vpop.f32.mrf.mxu2 }
 0x5db   : > { %v2231_v55 = vpack.c.bf16 %v2191_v11, %v2191_v11 }
 0x5dc   : > { %v3989_v35 = vpop.eup %3988  ;;  %v2672_v31 = vmul.f32 1.442695, %v2650_v12 }
 0x5dd   : > { %v2745_v32 = vpack.c.bf16 %v3989_v35, %v3989_v35  ;;  %v2707_v36 = vsel %vm1118_vm2, %v3989_v35, 0.0  ;;  %v2914_v56 = vunpack.c.l.b16 %v2231_v55 }
 0x5de   : > { %3990 = vpow2.f32 %v2672_v31  ;;  %2708 = vadd.xlane.f32.xlu1 %v2707_v36 }
 0x5df   : > { %v2819_v46 = vunpack.c.l.b16 %v2745_v32  ;;  %v2915_v57 = vpack.c.b16 %v2914_v56, %v2913_v41 }
 0x5e1   : > { %v2820_v48 = vpack.c.b16 %v2819_v46, %v2818_v33  ;;  %v2920_v37 = vsel %vm1118_vm2, %v2915_v57, 0  ;;  %v4069_v33 = vld [vmem:[%s5193_s4 + $0x18] sm:$0xff] }
 0x5e2   : > { %2929 = vmatpush.bf16.xpose.msra.mxu0 %v2920_v37 }
 0x5e3   : > { %3786 = vmatmul.msk.bf16.vlgmr.msrb.gmra.mxu0 %vm1118_vm2, %v2820_v48 }
 0x5e4   : > { %v3991_v28 = vpop.eup %3990 }
 0x5e5   : > { %v2710_v9 = vsel %vm1118_vm2, %v3991_v28, 0.0  ;;  %v2746_v62 = vpack.c.bf16 %v3991_v28, %v3991_v28 }
 0x5e6   : > { %2711 = vadd.xlane.f32.xlu0 %v2710_v9 }
 0x5e7   : > { %v2848_v6 = vunpack.c.l.b16 %v2746_v62 }
 0x5e9   : > { %v2622_v25 = vpop.xlane.xlu1 %2621 }
 0x5ea   : > { %v2652_v27 = vsub.f32 %v4944_v30, %v2622_v25  ;;  %3267 = vmatpush.bf16.msrb.mxu0 %v4066_v21 }
 0x5ec   : > { %v2676_v60 = vmul.f32 1.442695, %v2652_v27 }
 0x5ee   : > { %3992 = vpow2.f32 %v2676_v60 }
 0x5f1   : > { %v2619_v42 = vpop.xlane.xlu1 %2618  ;;  %v2625_v34 = vpop.xlane.xlu0 %2624 }
 0x5f2   : > { %v2651_v59 = vsub.f32 %v4942_v38, %v2619_v42  ;;  %v2653_v50 = vsub.f32 %v4948_v45, %v2625_v34 }
 0x5f4   : > { %v3993_v29 = vpop.eup %3992  ;;  %v2674_v30 = vmul.f32 1.442695, %v2651_v59  ;;  %v2678_v61 = vmul.f32 1.442695, %v2653_v50 }
 0x5f5   : > { %v2716_v52 = vsel %vm1118_vm2, %v3993_v29, 0.0  ;;  %v2748_v0 = vpack.c.bf16 %v3993_v29, %v3993_v29 }
 0x5f6   : > { %3994 = vpow2.f32 %v2674_v30  ;;  %2717 = vadd.xlane.f32.xlu1 %v2716_v52 }
 0x5f7   : > { %3996 = vpow2.f32 %v2678_v61  ;;  %v2878_v39 = vunpack.c.l.b16 %v2748_v0 }
 0x5f9   : > { %v2628_v18 = vpop.xlane.xlu0 %2627 }
 0x5fa   : > { %v2654_v24 = vsub.f32 %v4954_v53, %v2628_v18 }
 0x5fc   : > { %v3995_v63 = vpop.eup %3994  ;;  %v2680_v2 = vmul.f32 1.442695, %v2654_v24 }
 0x5fd   : > { %v3997_v19 = vpop.eup %3996  ;;  %v2747_v1 = vpack.c.bf16 %v3995_v63, %v3995_v63  ;;  %v2713_v38 = vsel %vm1118_vm2, %v3995_v63, 0.0 }
 0x5fe   : > { %v2749_v45 = vpack.c.bf16 %v3997_v19, %v3997_v19  ;;  %3998 = vpow2.f32 %v2680_v2  ;;  %2714 = vadd.xlane.f32.xlu2 %v2713_v38  ;;  %v2719_v40 = vsel %vm1118_vm2, %v3997_v19, 0.0  ;;  %v4070_v38 = vld [vmem:[%s5193_s4 + $0x20] sm:$0xff] }
 0x5ff   : > { %v2849_v47 = vunpack.c.l.b16 %v2747_v1  ;;  %2720 = vadd.xlane.f32.xlu0 %v2719_v40 }
 0x600   : > { %v2879_v10 = vunpack.c.l.b16 %v2749_v45 }
 0x601   : > { %v2850_v15 = vpack.c.b16 %v2849_v47, %v2848_v6  ;;  %v2631_v53 = vpop.xlane.xlu2 %2630  ;;  %v4071_v47 = vld [vmem:[%s5193_s4 + $0x28] sm:$0xff] }
 0x602   : > { %v2880_v16 = vpack.c.b16 %v2879_v10, %v2878_v39  ;;  %v2655_v17 = vsub.f32 %v4958_v3, %v2631_v53 }
 0x603   : > { %3787 = vmatmul.msk.bf16.vlgmr.msra.gmra.mxu1 %vm1118_vm2, %v2850_v15 }
 0x604   : > { %v3999_v20 = vpop.eup %3998  ;;  %v2682_v14 = vmul.f32 1.442695, %v2655_v17  ;;  %3788 = vmatmul.msk.bf16.vlgmr.msrb.gmra.mxu3 %vm1118_vm2, %v2880_v16  ;;  %3289 = vmatpush.bf16.msra.mxu1 %v4067_v22 }
 0x605   : > { %v2722_v13 = vsel %vm1118_vm2, %v3999_v20, 0.0  ;;  %3311 = vmatpush.bf16.msrb.mxu3 %v4068_v54  ;;  %v2750_v4 = vpack.c.bf16 %v3999_v20, %v3999_v20 }
 0x606   : > { %4000 = vpow2.f32 %v2682_v14  ;;  %2723 = vadd.xlane.f32.xlu2 %v2722_v13 }
 0x607   : > { %v2908_v35 = vunpack.c.l.b16 %v2750_v4 }
 0x609   : > { %v2634_v3 = vpop.xlane.xlu2 %2633 }
 0x60a   : > { %v2656_v23 = vsub.f32 %v4963_v58, %v2634_v3 }
 0x60c   : > { %v4001_v5 = vpop.eup %4000  ;;  %v2684_v43 = vmul.f32 1.442695, %v2656_v23 }
 0x60d   : > { %v2751_v12 = vpack.c.bf16 %v4001_v5, %v4001_v5  ;;  %v2725_v44 = vsel %vm1118_vm2, %v4001_v5, 0.0 }
 0x60e   : > { %4002 = vpow2.f32 %v2684_v43  ;;  %2726 = vadd.xlane.f32.xlu1 %v2725_v44 }
 0x60f   : > { %v2909_v31 = vunpack.c.l.b16 %v2751_v12 }
 0x611   : > { %v2910_v32 = vpack.c.b16 %v2909_v31, %v2908_v35 }
 0x613   : > { %3789 = vmatmul.msk.bf16.vlgmr.msra.gmra.mxu0 %vm1118_vm2, %v2910_v32 }
 0x614   : > { %v4003_v36 = vpop.eup %4002  ;;  %3333 = vmatpush.bf16.msra.mxu0 %v4069_v33  ;;  %v4072_v33 = vld [vmem:[%s5193_s4 + $0x30] sm:$0xff] }
 0x615   : > { %v2728_v58 = vsel %vm1118_vm2, %v4003_v36, 0.0 }
 0x616   : > { %2729 = vadd.xlane.f32.xlu0 %v2728_v58 }
 0x619   : > { %v2640_v46 = vpop.xlane.xlu1 %2639 }
 0x61a   : > { %v2658_v8 = vsub.f32 %v4970_v7, %v2640_v46  ;;  %v2752_v7 = vpack.c.bf16 %v4003_v36, %v4003_v36 }
 0x61c   : > { %v2688_v48 = vmul.f32 1.442695, %v2658_v8  ;;  %v2938_v50 = vunpack.c.l.b16 %v2752_v7 }
 0x61e   : > { %4004 = vpow2.f32 %v2688_v48 }
 0x621   : > { %v2637_v28 = vpop.xlane.xlu1 %2636  ;;  %v2643_v9 = vpop.xlane.xlu0 %2642 }
 0x622   : > { %v2657_v49 = vsub.f32 %v4975_v51, %v2637_v28  ;;  %v2659_v11 = vsub.f32 %v4981_v26, %v2643_v9 }
 0x624   : > { %v4005_v25 = vpop.eup %4004  ;;  %v2686_v41 = vmul.f32 1.442695, %v2657_v49  ;;  %v2690_v55 = vmul.f32 1.442695, %v2659_v11 }
 0x625   : > { %v2734_v27 = vsel %vm1118_vm2, %v4005_v25, 0.0  ;;  %v2754_v37 = vpack.c.bf16 %v4005_v25, %v4005_v25 }
 0x626   : > { %4006 = vpow2.f32 %v2686_v41  ;;  %2735 = vadd.xlane.f32.xlu1 %v2734_v27  ;;  %v2697_v56 = vpop.xlane.xlu2 %2696 }
 0x627   : > { %4008 = vpow2.f32 %v2690_v55  ;;  %v2968_v52 = vunpack.c.l.b16 %v2754_v37  ;;  %v3021_v15 = vand.u32 2147483648, %v2697_v56  ;;  %vm3015_vm4 = vweird.f32 %v2697_v56 }
 0x628   : > { %4010 = vrcp.f32 %v2697_v56  ;;  %v3019_v16 = vand.u32 2147483647, %v2697_v56 }
 0x629   : > { %v2694_v60 = vpop.xlane.xlu0 %2693  ;;  %v3022_v54 = vor.u32 1.1754944e-38, %v3021_v15 }
 0x62a   : > { %4012 = vrcp.f32 %v2694_v60  ;;  %v3007_v1 = vand.u32 2147483648, %v2694_v60  ;;  %v3005_v6 = vand.u32 2147483647, %v2694_v60  ;;  %vm3001_vm3 = vweird.f32 %v2694_v60 }
 0x62b   : > { %vm3020_vm7 = vcmp.eq.f32.partialorder %v3019_v16, 8.507059e+37 }
 0x62c   : > { %v4007_v57 = vpop.eup %4006  ;;  %v3008_v53 = vor.u32 1.1754944e-38, %v3007_v1  ;;  %vm3006_vm5 = vcmp.eq.f32.partialorder %v3005_v6, 8.507059e+37 }
 0x62d   : > { %v4009_v42 = vpop.eup %4008  ;;  %v2753_v34 = vpack.c.bf16 %v4007_v57, %v4007_v57  ;;  %v2731_v51 = vsel %vm1118_vm2, %v4007_v57, 0.0 }
 0x62e   : > { %v4011_v26 = vpop.eup %4010  ;;  %v2755_v21 = vpack.c.bf16 %v4009_v42, %v4009_v42  ;;  %2732 = vadd.xlane.f32.xlu2 %v2731_v51  ;;  %v2737_v59 = vsel %vm1118_vm2, %v4009_v42, 0.0 }
 0x62f   : > { %v2939_v29 = vunpack.c.l.b16 %v2753_v34  ;;  %v3011_v30 = vmul.f32 %v4011_v26, %v2697_v56  ;;  %2738 = vadd.xlane.f32.xlu0 %v2737_v59  ;;  %vm3016_vm15 = vweird.f32 %v4011_v26 }
 0x630   : > { %v4013_v61 = vpop.eup %4012  ;;  %v2969_v18 = vunpack.c.l.b16 %v2755_v21  ;;  %vm3017_vm6 = vmor %vm3015_vm4, %vm3016_vm15 }
 0x631   : > { %v2940_v24 = vpack.c.b16 %v2939_v29, %v2938_v50  ;;  %v3012_v62 = vsub.f32 1.0, %v3011_v30  ;;  %v2997_v63 = vmul.f32 %v4013_v61, %v2694_v60  ;;  %vm3002_vm0 = vweird.f32 %v4013_v61 }
 0x632   : > { %v2970_v0 = vpack.c.b16 %v2969_v18, %v2968_v52 }
 0x633   : > { %v2998_v2 = vsub.f32 1.0, %v2997_v63  ;;  %3790 = vmatmul.msk.bf16.vlgmr.msrb.gmra.mxu1 %vm1118_vm2, %v2940_v24  ;;  %v3013_v19 = vmul.f32 %v4011_v26, %v3012_v62 }
 0x634   : > { %3791 = vmatmul.msk.bf16.vlgmr.msra.gmra.mxu3 %vm1118_vm2, %v2970_v0  ;;  %3355 = vmatpush.bf16.msrb.mxu1 %v4070_v38  ;;  %vm3003_vm2 = vmor %vm3001_vm3, %vm3002_vm0 }
 0x635   : > { %v2781_v45 = vpop.f32.mrf.mxu1  ;;  %v2999_v40 = vmul.f32 %v4013_v61, %v2998_v2  ;;  %3377 = vmatpush.bf16.msra.mxu3 %v4071_v47  ;;  %v3014_v39 = vadd.f32 %v4011_v26, %v3013_v19 }
 0x637   : > { %v3000_v10 = vadd.f32 %v4013_v61, %v2999_v40  ;;  %v3018_v14 = vsel %vm3017_vm6, %v4011_v26, %v3014_v39 }
 0x638   : > { %v3023_v23 = vsel %vm3020_vm7, %v3022_v54, %v3018_v14 }
 0x639   : > { %v3004_v17 = vsel %vm3003_vm2, %v4013_v61, %v3000_v10  ;;  %v2700_v13 = vpop.xlane.xlu1 %2699 }
 0x63a   : > { %v3009_v20 = vsel %vm3006_vm5, %v3008_v53, %v3004_v17  ;;  %4014 = vrcp.f32 %v2700_v13  ;;  %v3033_v27 = vand.u32 2147483647, %v2700_v13  ;;  %v3035_v56 = vand.u32 2147483648, %v2700_v13 }
 0x63b   : > { %v3220_v22 = vmul.f32 %v3009_v20, %v2781_v45  ;;  %vm3029_vm9 = vweird.f32 %v2700_v13 }
 0x63c   : > { %vm3034_vm12 = vcmp.eq.f32.partialorder %v3033_v27, 8.507059e+37  ;;  %v3036_v34 = vor.u32 1.1754944e-38, %v3035_v56 }
 0x63d   : > { %v2783_v3 = vpop.f32.mrf.mxu1  ;;  %v3236_v4 = vpack.c.bf16 %v3220_v22, %v3220_v22 }
 0x63e   : > { %v3221_v5 = vmul.f32 %v3023_v23, %v2783_v3  ;;  %v4073_v23 = vld [vmem:[%s5193_s4 + $0x38] sm:$0xff] }
 0x63f   : > { %v3254_v44 = vunpack.c.l.b16 %v3236_v4 }
 0x640   : > { %v3237_v43 = vpack.c.bf16 %v3221_v5, %v3221_v5  ;;  %v4015_v31 = vpop.eup %4014 }
 0x641   : > { %v2703_v12 = vpop.xlane.xlu0 %2702  ;;  %v3025_v36 = vmul.f32 %v4015_v31, %v2700_v13  ;;  %vm3030_vm8 = vweird.f32 %v4015_v31 }
 0x642   : > { %v3255_v35 = vunpack.c.l.b16 %v3237_v43  ;;  %4016 = vrcp.f32 %v2703_v12  ;;  %vm3031_vm10 = vmor %vm3029_vm9, %vm3030_vm8  ;;  %v3049_v51 = vand.u32 2147483648, %v2703_v12  ;;  %vm3043_vm13 = vweird.f32 %v2703_v12 }
 0x643   : > { %v3026_v8 = vsub.f32 1.0, %v3025_v36  ;;  %v3047_v21 = vand.u32 2147483647, %v2703_v12 }
 0x644   : > { %v3256_v32 = vpack.c.b16 %v3255_v35, %v3254_v44  ;;  %v3050_v52 = vor.u32 1.1754944e-38, %v3049_v51 }
 0x645   : > { %v3027_v9 = vmul.f32 %v4015_v31, %v3026_v8  ;;  %vm3048_vm0 = vcmp.eq.f32.partialorder %v3047_v21, 8.507059e+37 }
 0x646   : > { %3792 = vmatmul.msk.bf16.vlgmr.msrb.gmra.mxu0 %vm785_vm1, %v3256_v32 }
 0x647   : > { %3399 = vmatpush.bf16.msrb.mxu0 %v4072_v33  ;;  %v3028_v41 = vadd.f32 %v4015_v31, %v3027_v9 }
 0x648   : > { %v4017_v58 = vpop.eup %4016 }
 0x649   : > { %v2706_v46 = vpop.xlane.xlu2 %2705  ;;  %v3039_v48 = vmul.f32 %v4017_v58, %v2703_v12  ;;  %v3032_v57 = vsel %vm3031_vm10, %v4015_v31, %v3028_v41  ;;  %vm3044_vm11 = vweird.f32 %v4017_v58 }
 0x64a   : > { %4018 = vrcp.f32 %v2706_v46  ;;  %v3037_v50 = vsel %vm3034_vm12, %v3036_v34, %v3032_v57  ;;  %vm3045_vm14 = vmor %vm3043_vm13, %vm3044_vm11  ;;  %v3061_v0 = vand.u32 2147483647, %v2706_v46  ;;  %v3063_v2 = vand.u32 2147483648, %v2706_v46 }
 0x64b   : > { %v3040_v28 = vsub.f32 1.0, %v3039_v48  ;;  %vm3057_vm3 = vweird.f32 %v2706_v46 }
 0x64c   : > { %vm3062_vm5 = vcmp.eq.f32.partialorder %v3061_v0, 8.507059e+37  ;;  %v3064_v47 = vor.u32 1.1754944e-38, %v3063_v2 }
 0x64d   : > { %v3041_v55 = vmul.f32 %v4017_v58, %v3040_v28 }
 0x64f   : > { %v3042_v37 = vadd.f32 %v4017_v58, %v3041_v55 }
 0x650   : > { %v4019_v49 = vpop.eup %4018 }
 0x651   : > { %v3053_v11 = vmul.f32 %v4019_v49, %v2706_v46  ;;  %v2709_v25 = vpop.xlane.xlu1 %2708  ;;  %v3046_v61 = vsel %vm3045_vm14, %v4017_v58, %v3042_v37  ;;  %vm3058_vm15 = vweird.f32 %v4019_v49 }
 0x652   : > { %4020 = vrcp.f32 %v2709_v25  ;;  %v3051_v63 = vsel %vm3048_vm0, %v3050_v52, %v3046_v61  ;;  %vm3059_vm2 = vmor %vm3057_vm3, %vm3058_vm15  ;;  %v3077_v39 = vand.u32 2147483648, %v2709_v25  ;;  %vm3071_vm6 = vweird.f32 %v2709_v25 }
 0x653   : > { %v3054_v60 = vsub.f32 1.0, %v3053_v11  ;;  %v3075_v53 = vand.u32 2147483647, %v2709_v25 }
 0x654   : > { %v3078_v13 = vor.u32 1.1754944e-38, %v3077_v39 }
 0x655   : > { %v3055_v59 = vmul.f32 %v4019_v49, %v3054_v60  ;;  %vm3076_vm8 = vcmp.eq.f32.partialorder %v3075_v53, 8.507059e+37 }
 0x656   : > { %v2811_v7 = vpop.f32.mrf.mxu3 }
 0x657   : > { %v3222_v30 = vmul.f32 %v3037_v50, %v2811_v7  ;;  %v3056_v18 = vadd.f32 %v4019_v49, %v3055_v59 }
 0x658   : > { %v4021_v42 = vpop.eup %4020 }
 0x659   : > { %v3067_v26 = vmul.f32 %v4021_v42, %v2709_v25  ;;  %v3238_v19 = vpack.c.bf16 %v3222_v30, %v3222_v30  ;;  %v3060_v40 = vsel %vm3059_vm2, %v4019_v49, %v3056_v18  ;;  %vm3072_vm4 = vweird.f32 %v4021_v42  ;;  %v2712_v17 = vpop.xlane.xlu0 %2711 }
 0x65a   : > { %v3065_v16 = vsel %vm3062_vm5, %v3064_v47, %v3060_v40  ;;  %vm3073_vm7 = vmor %vm3071_vm6, %vm3072_vm4  ;;  %4022 = vrcp.f32 %v2712_v17  ;;  %v3091_v7 = vand.u32 2147483648, %v2712_v17  ;;  %vm3085_vm10 = vweird.f32 %v2712_v17 }
 0x65b   : > { %v3068_v29 = vsub.f32 1.0, %v3067_v26  ;;  %v3276_v10 = vunpack.c.l.b16 %v3238_v19  ;;  %v3089_v57 = vand.u32 2147483647, %v2712_v17 }
 0x65d   : > { %v3069_v24 = vmul.f32 %v4021_v42, %v3068_v29  ;;  %v3092_v29 = vor.u32 1.1754944e-38, %v3091_v7  ;;  %vm3090_vm13 = vcmp.eq.f32.partialorder %v3089_v57, 8.507059e+37 }
 0x65e   : > { %v2813_v62 = vpop.f32.mrf.mxu3 }
 0x65f   : > { %v3223_v1 = vmul.f32 %v3051_v63, %v2813_v62  ;;  %v3070_v6 = vadd.f32 %v4021_v42, %v3069_v24 }
 0x660   : > { %v2841_v38 = vpop.f32.mrf.mxu0  ;;  %v4023_v31 = vpop.eup %4022 }
 0x661   : > { %v3239_v45 = vpack.c.bf16 %v3223_v1, %v3223_v1  ;;  %v3224_v14 = vmul.f32 %v3065_v16, %v2841_v38  ;;  %v3074_v22 = vsel %vm3073_vm7, %v4021_v42, %v3070_v6  ;;  %v3081_v36 = vmul.f32 %v4023_v31, %v2712_v17 }
 0x662   : > { %v3079_v3 = vsel %vm3076_vm8, %v3078_v13, %v3074_v22  ;;  %vm3086_vm9 = vweird.f32 %v4023_v31 }
 0x663   : > { %v3277_v15 = vunpack.c.l.b16 %v3239_v45  ;;  %v3240_v4 = vpack.c.bf16 %v3224_v14, %v3224_v14  ;;  %v3082_v8 = vsub.f32 1.0, %v3081_v36  ;;  %vm3087_vm11 = vmor %vm3085_vm10, %vm3086_vm9 }
 0x665   : > { %v3278_v20 = vpack.c.b16 %v3277_v15, %v3276_v10  ;;  %v3298_v44 = vunpack.c.l.b16 %v3240_v4  ;;  %v3083_v25 = vmul.f32 %v4023_v31, %v3082_v8 }
 0x667   : > { %3793 = vmatmul.msk.bf16.vlgmr.msra.gmra.mxu1 %vm785_vm1, %v3278_v20  ;;  %v3084_v56 = vadd.f32 %v4023_v31, %v3083_v25 }
 0x668   : > { %v2843_v54 = vpop.f32.mrf.mxu0  ;;  %3421 = vmatpush.bf16.msra.mxu1 %v4073_v23 }
 0x669   : > { %v3225_v5 = vmul.f32 %v3079_v3, %v2843_v54  ;;  %v5060_v12 = vpop.xlane.xlu1 %2717  ;;  %v3088_v21 = vsel %vm3087_vm11, %v4023_v31, %v3084_v56 }
 0x66a   : > { %4024 = vrcp.f32 %v5060_v12  ;;  %v3119_v61 = vand.u32 2147483648, %v5060_v12  ;;  %v3093_v18 = vsel %vm3090_vm13, %v3092_v29, %v3088_v21  ;;  %vm3113_vm3 = vweird.f32 %v5060_v12 }
 0x66b   : > { %v3241_v43 = vpack.c.bf16 %v3225_v5, %v3225_v5  ;;  %v3117_v1 = vand.u32 2147483647, %v5060_v12 }
 0x66c   : > { %v3120_v6 = vor.u32 1.1754944e-38, %v3119_v61 }
 0x66d   : > { %v3299_v35 = vunpack.c.l.b16 %v3241_v43  ;;  %vm3118_vm6 = vcmp.eq.f32.partialorder %v3117_v1, 8.507059e+37 }
 0x66f   : > { %v3300_v32 = vpack.c.b16 %v3299_v35, %v3298_v44 }
 0x670   : > { %v5067_v46 = vpop.eup %4024 }
 0x671   : > { %3794 = vmatmul.msk.bf16.vlgmr.msrb.gmra.mxu3 %vm785_vm1, %v3300_v32  ;;  %v2715_v33 = vpop.xlane.xlu2 %2714  ;;  %v3109_v28 = vmul.f32 %v5067_v46, %v5060_v12  ;;  %vm3114_vm0 = vweird.f32 %v5067_v46 }
 0x672   : > { %v5064_v58 = vpop.xlane.xlu0 %2720  ;;  %4026 = vrcp.f32 %v2715_v33  ;;  %v3105_v30 = vand.u32 2147483648, %v2715_v33  ;;  %vm3099_vm14 = vweird.f32 %v2715_v33  ;;  %v3103_v52 = vand.u32 2147483647, %v2715_v33  ;;  %vm5098_vm2 = vmor %vm3113_vm3, %vm3114_vm0 }
 0x673   : > { %4028 = vrcp.f32 %v5064_v58  ;;  %v3110_v55 = vsub.f32 1.0, %v3109_v28  ;;  %v3133_v47 = vand.u32 2147483648, %v5064_v58  ;;  %vm3127_vm7 = vweird.f32 %v5064_v58 }
 0x674   : > { %v3106_v38 = vor.u32 1.1754944e-38, %v3105_v30  ;;  %vm3104_vm4 = vcmp.eq.f32.partialorder %v3103_v52, 8.507059e+37  ;;  %v3131_v13 = vand.u32 2147483647, %v5064_v58 }
 0x675   : > { %v3111_v51 = vmul.f32 %v5067_v46, %v3110_v55  ;;  %v3134_v43 = vor.u32 1.1754944e-38, %v3133_v47 }
 0x676   : > { %vm3132_vm10 = vcmp.eq.f32.partialorder %v3131_v13, 8.507059e+37 }
 0x677   : > { %v3112_v24 = vadd.f32 %v5067_v46, %v3111_v51 }
 0x678   : > { %v4027_v48 = vpop.eup %4026 }
 0x679   : > { %v5071_v9 = vpop.eup %4028  ;;  %v3095_v49 = vmul.f32 %v4027_v48, %v2715_v33  ;;  %v5073_v11 = vpop.xlane.xlu2 %2723  ;;  %vm3100_vm12 = vweird.f32 %v4027_v48  ;;  %v3116_v10 = vsel %vm5098_vm2, %v5067_v46, %v3112_v24 }
 0x67a   : > { %4030 = vrcp.f32 %v5073_v11  ;;  %v3123_v27 = vmul.f32 %v5071_v9, %v5064_v58  ;;  %vm5089_vm15 = vmor %vm3099_vm14, %vm3100_vm12  ;;  %vm3128_vm5 = vweird.f32 %v5071_v9  ;;  %v3121_v3 = vsel %vm3118_vm6, %v3120_v6, %v3116_v10 }
 0x67b   : > { %v3096_v41 = vsub.f32 1.0, %v3095_v49  ;;  %vm3129_vm8 = vmor %vm3127_vm7, %vm3128_vm5  ;;  %v3147_v32 = vand.u32 2147483648, %v5073_v11  ;;  %vm3141_vm11 = vweird.f32 %v5073_v11  ;;  %v3145_v46 = vand.u32 2147483647, %v5073_v11 }
 0x67c   : > { %v3124_v42 = vsub.f32 1.0, %v3123_v27 }
 0x67d   : > { %v3097_v60 = vmul.f32 %v4027_v48, %v3096_v41  ;;  %v3148_v41 = vor.u32 1.1754944e-38, %v3147_v32  ;;  %vm3146_vm14 = vcmp.eq.f32.partialorder %v3145_v46, 8.507059e+37 }
 0x67e   : > { %v3125_v63 = vmul.f32 %v5071_v9, %v3124_v42 }
 0x67f   : > { %v3098_v50 = vadd.f32 %v4027_v48, %v3097_v60 }
 0x680   : > { %v5078_v37 = vpop.eup %4030  ;;  %v2871_v34 = vpop.f32.mrf.mxu1  ;;  %v3126_v16 = vadd.f32 %v5071_v9, %v3125_v63 }
 0x681   : > { %v3137_v26 = vmul.f32 %v5078_v37, %v5073_v11  ;;  %v5083_v59 = vpop.xlane.xlu1 %2726  ;;  %v3226_v2 = vmul.f32 %v3093_v18, %v2871_v34  ;;  %v3102_v19 = vsel %vm5089_vm15, %v4027_v48, %v3098_v50  ;;  %vm3142_vm9 = vweird.f32 %v5078_v37 }
 0x682   : > { %4032 = vrcp.f32 %v5083_v59  ;;  %v3107_v53 = vsel %vm3104_vm4, %v3106_v38, %v3102_v19  ;;  %v3130_v5 = vsel %vm3129_vm8, %v5071_v9, %v3126_v16  ;;  %vm3143_vm12 = vmor %vm3141_vm11, %vm3142_vm9  ;;  %v3161_v55 = vand.u32 2147483648, %v5083_v59 }
 0x683   : > { %v3138_v0 = vsub.f32 1.0, %v3137_v26  ;;  %v3242_v17 = vpack.c.bf16 %v3226_v2, %v3226_v2  ;;  %v3135_v58 = vsel %vm3132_vm10, %v3134_v43, %v3130_v5  ;;  %vm3155_vm0 = vweird.f32 %v5083_v59 }
 0x684   : > { %v3159_v11 = vand.u32 2147483647, %v5083_v59  ;;  %v3162_v34 = vor.u32 1.1754944e-38, %v3161_v55 }
 0x685   : > { %v3139_v22 = vmul.f32 %v5078_v37, %v3138_v0  ;;  %v3320_v12 = vunpack.c.l.b16 %v3242_v17 }
 0x686   : > { %vm3160_vm3 = vcmp.eq.f32.partialorder %v3159_v11, 8.507059e+37 }
 0x687   : > { %v2901_v45 = vpop.f32.mrf.mxu3  ;;  %v3140_v35 = vadd.f32 %v5078_v37, %v3139_v22 }
 0x688   : > { %v4033_v39 = vpop.eup %4032  ;;  %v2873_v15 = vpop.f32.mrf.mxu1  ;;  %v3228_v4 = vmul.f32 %v3121_v3, %v2901_v45 }
 0x689   : > { %v3151_v20 = vmul.f32 %v4033_v39, %v5083_v59  ;;  %v3227_v14 = vmul.f32 %v3107_v53, %v2873_v15  ;;  %v3144_v9 = vsel %vm3143_vm12, %v5078_v37, %v3140_v35  ;;  %vm3156_vm13 = vweird.f32 %v4033_v39  ;;  %v2730_v7 = vpop.xlane.xlu0 %2729 }
 0x68a   : > { %v3244_v8 = vpack.c.bf16 %v3228_v4, %v3228_v4  ;;  %v3149_v60 = vsel %vm3146_vm14, %v3148_v41, %v3144_v9  ;;  %vm3157_vm15 = vmor %vm3155_vm0, %vm3156_vm13  ;;  %4034 = vrcp.f32 %v2730_v7  ;;  %v3175_v53 = vand.u32 2147483648, %v2730_v7 }
 0x68b   : > { %v3152_v54 = vsub.f32 1.0, %v3151_v20  ;;  %v3243_v23 = vpack.c.bf16 %v3227_v14, %v3227_v14  ;;  %vm3169_vm4 = vweird.f32 %v2730_v7  ;;  %v3173_v16 = vand.u32 2147483647, %v2730_v7 }
 0x68c   : > { %v3342_v27 = vunpack.c.l.b16 %v3244_v8  ;;  %v3176_v3 = vor.u32 1.1754944e-38, %v3175_v53 }
 0x68d   : > { %v3321_v44 = vunpack.c.l.b16 %v3243_v23  ;;  %v3153_v31 = vmul.f32 %v4033_v39, %v3152_v54  ;;  %vm3174_vm8 = vcmp.eq.f32.partialorder %v3173_v16, 8.507059e+37 }
 0x68f   : > { %v3322_v36 = vpack.c.b16 %v3321_v44, %v3320_v12  ;;  %v2903_v33 = vpop.f32.mrf.mxu3  ;;  %v3154_v49 = vadd.f32 %v4033_v39, %v3153_v31 }
 0x690   : > { %v3229_v48 = vmul.f32 %v3135_v58, %v2903_v33  ;;  %v2931_v28 = vpop.f32.mrf.mxu0  ;;  %v4035_v52 = vpop.eup %4034 }
 0x691   : > { %3795 = vmatmul.msk.bf16.vlgmr.msra.gmra.mxu0 %vm785_vm1, %v3322_v36  ;;  %v3230_v57 = vmul.f32 %v3149_v60, %v2931_v28  ;;  %v3158_v37 = vsel %vm3157_vm15, %v4033_v39, %v3154_v49  ;;  %v3165_v24 = vmul.f32 %v4035_v52, %v2730_v7  ;;  %vm3170_vm2 = vweird.f32 %v4035_v52 }
 0x692   : > { %v3245_v25 = vpack.c.bf16 %v3229_v48, %v3229_v48  ;;  %v3163_v26 = vsel %vm3160_vm3, %v3162_v34, %v3158_v37  ;;  %vm3171_vm5 = vmor %vm3169_vm4, %vm3170_vm2 }
 0x693   : > { %v3246_v21 = vpack.c.bf16 %v3230_v57, %v3230_v57  ;;  %v3166_v2 = vsub.f32 1.0, %v3165_v24 }
 0x694   : > { %v3343_v56 = vunpack.c.l.b16 %v3245_v25 }
 0x695   : > { %v3364_v59 = vunpack.c.l.b16 %v3246_v21  ;;  %v3167_v40 = vmul.f32 %v4035_v52, %v3166_v2 }
 0x696   : > { %v3344_v42 = vpack.c.b16 %v3343_v56, %v3342_v27 }
 0x697   : > { %v3168_v15 = vadd.f32 %v4035_v52, %v3167_v40 }
 0x698   : > { %3796 = vmatmul.msk.bf16.vlgmr.msrb.gmra.mxu1 %vm785_vm1, %v3344_v42  ;;  %v2933_v51 = vpop.f32.mrf.mxu0 }
 0x699   : > { %v3231_v50 = vmul.f32 %v3163_v26, %v2933_v51  ;;  %v5126_v30 = vpop.xlane.xlu1 %2735  ;;  %v3172_v22 = vsel %vm3171_vm5, %v4035_v52, %v3168_v15 }
 0x69a   : > { %4036 = vrcp.f32 %v5126_v30  ;;  %v3177_v5 = vsel %vm3174_vm8, %v3176_v3, %v3172_v22  ;;  %v3203_v12 = vand.u32 2147483648, %v5126_v30  ;;  %vm3197_vm11 = vweird.f32 %v5126_v30  ;;  %v4074_v22 = vld [vmem:[%s5194_s5] ss:$0 sm:$0xff] }
 0x69b   : > { %v3247_v29 = vpack.c.bf16 %v3231_v50, %v3231_v50  ;;  %v3201_v31 = vand.u32 2147483647, %v5126_v30 }
 0x69c   : > { %v3204_v9 = vor.u32 1.1754944e-38, %v3203_v12 }
 0x69d   : > { %v3365_v61 = vunpack.c.l.b16 %v3247_v29  ;;  %vm3202_vm15 = vcmp.eq.f32.partialorder %v3201_v31, 8.507059e+37 }
 0x69f   : > { %v3366_v18 = vpack.c.b16 %v3365_v61, %v3364_v59 }
 0x6a0   : > { %v4037_v0 = vpop.eup %4036 }
 0x6a1   : > { %3797 = vmatmul.msk.bf16.vlgmr.msra.gmra.mxu3 %vm785_vm1, %v3366_v18  ;;  %v2733_v62 = vpop.xlane.xlu2 %2732  ;;  %v3193_v1 = vmul.f32 %v4037_v0, %v5126_v30  ;;  %vm3198_vm9 = vweird.f32 %v4037_v0 }
 0x6a2   : > { %v5130_v63 = vpop.xlane.xlu0 %2738  ;;  %4038 = vrcp.f32 %v2733_v62  ;;  %v3189_v54 = vand.u32 2147483648, %v2733_v62  ;;  %vm3183_vm7 = vweird.f32 %v2733_v62  ;;  %v3187_v23 = vand.u32 2147483647, %v2733_v62  ;;  %vm3199_vm12 = vmor %vm3197_vm11, %vm3198_vm9 }
 0x6a3   : > { %4040 = vrcp.f32 %v5130_v63  ;;  %v3194_v47 = vsub.f32 1.0, %v3193_v1  ;;  %v3217_v48 = vand.u32 2147483648, %v5130_v63  ;;  %vm3211_vm0 = vweird.f32 %v5130_v63 }
 0x6a4   : > { %v3190_v32 = vor.u32 1.1754944e-38, %v3189_v54  ;;  %vm3188_vm13 = vcmp.eq.f32.partialorder %v3187_v23, 8.507059e+37  ;;  %v3215_v25 = vand.u32 2147483647, %v5130_v63 }
 0x6a5   : > { %v3195_v17 = vmul.f32 %v4037_v0, %v3194_v47  ;;  %v3218_v7 = vor.u32 1.1754944e-38, %v3217_v48 }
 0x6a6   : > { %vm3216_vm2 = vcmp.eq.f32.partialorder %v3215_v25, 8.507059e+37 }
 0x6a7   : > { %v3196_v43 = vadd.f32 %v4037_v0, %v3195_v17 }
 0x6a8   : > { %v4039_v19 = vpop.eup %4038 }
 0x6a9   : > { %v5134_v38 = vpop.eup %4040  ;;  %v3179_v45 = vmul.f32 %v4039_v19, %v2733_v62  ;;  %vm3184_vm6 = vweird.f32 %v4039_v19  ;;  %v3200_v33 = vsel %vm3199_vm12, %v4037_v0, %v3196_v43 }
 0x6aa   : > { %v3207_v39 = vmul.f32 %v5134_v38, %v5130_v63  ;;  %vm3185_vm10 = vmor %vm3183_vm7, %vm3184_vm6  ;;  %vm3212_vm14 = vweird.f32 %v5134_v38  ;;  %v3205_v41 = vsel %vm3202_vm15, %v3204_v9, %v3200_v33 }
 0x6ab   : > { %v3180_v6 = vsub.f32 1.0, %v3179_v45  ;;  %vm3213_vm3 = vmor %vm3211_vm0, %vm3212_vm14 }
 0x6ac   : > { %v3208_v20 = vsub.f32 1.0, %v3207_v39 }
 0x6ad   : > { %v3181_v10 = vmul.f32 %v4039_v19, %v3180_v6 }
 0x6ae   : > { %v3209_v4 = vmul.f32 %v5134_v38, %v3208_v20 }
 0x6af   : > { %v3182_v13 = vadd.f32 %v4039_v19, %v3181_v10 }
 0x6b0   : > { %v2961_v14 = vpop.f32.mrf.mxu1  ;;  %v3210_v8 = vadd.f32 %v5134_v38, %v3209_v4 }
 0x6b1   : > { %v3232_v44 = vmul.f32 %v3177_v5, %v2961_v14  ;;  %v3186_v35 = vsel %vm3185_vm10, %v4039_v19, %v3182_v13 }
 0x6b2   : > { %v3191_v46 = vsel %vm3188_vm13, %v3190_v32, %v3186_v35  ;;  %v3214_v27 = vsel %vm3213_vm3, %v5134_v38, %v3210_v8 }
 0x6b3   : > { %v3248_v28 = vpack.c.bf16 %v3232_v44, %v3232_v44  ;;  %v3219_v42 = vsel %vm3216_vm2, %v3218_v7, %v3214_v27 }
 0x6b5   : > { %v3386_v56 = vunpack.c.l.b16 %v3248_v28 }
 0x6b7   : > { %v2991_v36 = vpop.f32.mrf.mxu3 }
 0x6b8   : > { %v2963_v58 = vpop.f32.mrf.mxu1  ;;  %v3234_v11 = vmul.f32 %v3205_v41, %v2991_v36 }
 0x6b9   : > { %v3233_v49 = vmul.f32 %v3191_v46, %v2963_v58 }
 0x6ba   : > { %v3250_v34 = vpack.c.bf16 %v3234_v11, %v3234_v11 }
 0x6bb   : > { %v3249_v55 = vpack.c.bf16 %v3233_v49, %v3233_v49 }
 0x6bc   : > { %v3408_v21 = vunpack.c.l.b16 %v3250_v34 }
 0x6bd   : > { %v3387_v60 = vunpack.c.l.b16 %v3249_v55 }
 0x6bf   : > { %v3388_v57 = vpack.c.b16 %v3387_v60, %v3386_v56  ;;  %v2993_v37 = vpop.f32.mrf.mxu3 }
 0x6c0   : > { %v3235_v51 = vmul.f32 %v3219_v42, %v2993_v37 }
 0x6c1   : > { %3798 = vmatmul.msk.bf16.vlgmr.msrb.gmra.mxu0 %vm785_vm1, %v3388_v57 }
 0x6c2   : > { %v3251_v26 = vpack.c.bf16 %v3235_v51, %v3235_v51 }
 0x6c3   : > { %v3269_v30 = vpop.f32.mrf.mxu0 }
 0x6c4   : > { %v3409_v50 = vunpack.c.l.b16 %v3251_v26 }
 0x6c6   : > { %v3410_v29 = vpack.c.b16 %v3409_v50, %v3408_v21 }
 0x6c8   : > { %3799 = vmatmul.msk.bf16.vlgmr.msra.gmra.mxu1 %vm785_vm1, %v3410_v29 }
 0x6cb   : > { %v3271_v61 = vpop.f32.mrf.mxu0 }
 0x6e4   : > { %v3291_v59 = vpop.f32.mrf.mxu1 }
 0x6e5   : > { %v3428_v2 = vadd.f32 %v3291_v59, %v3269_v30 }
 0x6ec   : > { %v3293_v52 = vpop.f32.mrf.mxu1 }
 0x6ed   : > { %v3435_v47 = vadd.f32 %v3293_v52, %v3271_v61 }
 0x6f4   : > { %v3313_v18 = vpop.f32.mrf.mxu3 }
 0x6f5   : > { %v3429_v19 = vadd.f32 %v3428_v2, %v3313_v18 }
 0x6fc   : > { %v3315_v63 = vpop.f32.mrf.mxu3 }
 0x6fd   : > { %v3436_v10 = vadd.f32 %v3435_v47, %v3315_v63 }
 0x70e   : > { %v3335_v24 = vpop.f32.mrf.mxu0 }
 0x70f   : > { %v3430_v45 = vadd.f32 %v3429_v19, %v3335_v24 }
 0x715   : > { %v3357_v62 = vpop.f32.mrf.mxu1 }
 0x716   : > { %v3337_v0 = vpop.f32.mrf.mxu0  ;;  %v3431_v6 = vadd.f32 %v3430_v45, %v3357_v62 }
 0x717   : > { %v3437_v16 = vadd.f32 %v3436_v10, %v3337_v0 }
 0x71d   : > { %v3359_v1 = vpop.f32.mrf.mxu1 }
 0x71e   : > { %v3438_v14 = vadd.f32 %v3437_v16, %v3359_v1 }
 0x724   : > { %v3379_v38 = vpop.f32.mrf.mxu3 }
 0x725   : > { %v3432_v39 = vadd.f32 %v3431_v6, %v3379_v38 }
 0x72c   : > { %v3381_v20 = vpop.f32.mrf.mxu3 }
 0x72d   : > { %v3439_v3 = vadd.f32 %v3438_v14, %v3381_v20 }
 0x73e   : > { %v3401_v40 = vpop.f32.mrf.mxu0 }
 0x73f   : > { %v3433_v15 = vadd.f32 %v3432_v39, %v3401_v40 }
 0x745   : > { %v3423_v53 = vpop.f32.mrf.mxu1 }
 0x746   : > { %v3434_v17 = vadd.f32 %v3433_v15, %v3423_v53  ;;  %v3403_v54 = vpop.f32.mrf.mxu0 }
 0x747   : > { %v3440_v23 = vadd.f32 %v3439_v3, %v3403_v54 }
 0x748   : > { %v3442_v13 = vadd.f32 %v4074_v22, %v3434_v17 }
 0x74a   : > { %3800 = vst [vmem:[%s4870_s7 + $0x10] sm:$0xff] %v3442_v13 }
 0x74d   : > { %v3425_v4 = vpop.f32.mrf.mxu1 }
 0x74e   : > { %v3441_v5 = vadd.f32 %v3440_v23, %v3425_v4 }
 0x750   : > { %v3443_v43 = vadd.f32 %v4074_v22, %v3441_v5 }
 0x752   : > { %3801 = vst [vmem:[%s4870_s7 + $0x18] sm:$0xff] %v3443_v43 }
 0x753   : > { %4132 = shalt.err (!%p4129_p7)
}
 0x754   : > { %s4175_s18 = smov 128   ;;  %s4176_s7 = smov 8  }
 0x755   : > { %3855 = dma.vmem_to_hbm [thread:$0]  (%p4262_p11), %s3462_s19, 512, %s3464_s25, %s3448_s20, %s4175_s18, %s4175_s18, %s4176_s7  }
 0x756 PF: > { %s3478_s28 = sand.u32 1, %s4159_s21   ;;  %p5219_p5 = scmp.ge.s32.totalorder %s4171_s24, 2 }
 0x757   : > { %s3479_s29 = scalar_lea.sflag [#allocation4], %s3478_s28 }
 0x758   : > { %p3862_p8 = pnand %p5219_p5, %p4266_p12 }
 0x75a   : > { %p3863_p10 = pneg %p3862_p8 }
 0x75c   : > { %4154 = dma.done.wait (%p3863_p10), %s3479_s29, 512  }
 0x75d   : > { %4156 = vsyncadd (%p3863_p10), %s3479_s29, 4294966784  ;;  %p19_p2 = scmp.ge.s32.totalorder %s4237_s27, 4   ;;  %s5220_s21 = smov %s4163_s22 }
 0x75e   : > { %s5221_s22 = smov %s4167_s23  ;;  %s5222_s23 = smov %s4249_s30 }
 0x75f   : > { %s5223_s24 = smov %s4237_s27  ;;  %21 = sbr.rel (!%p19_p2) target bundleno = 5 (0x5), region = 95 }
 0x764   :  { %3485 = vsyncpa [#allocation3], 1 }
 0x765   :  { %3487 = vsyncpa [#allocation3 + $0x1], 1 }
 0x766   :  { %3488 = vsyncpa [#allocation4], 1 }
 0x767   :  { %3490 = vsyncpa [#allocation4 + $0x1], 1 }

</bundles_post_ra>
